<compile_context>
chip_gen: v7x
topology: tpu7x:2x2x1
jax: 0.10.0
libtpu: 0.0.40
codegen_flags: <defaults>
</compile_context>

<pallas_src>
import jax
import jax.numpy as jnp
from jax.experimental import pallas as pl
from jax.experimental.pallas import tpu as pltpu


IN_FEATURES = 156
HIDDEN_FEATURES = 1500
FEATURE_DIM = 512


def _fused_mlp_kernel(x_ref, w1_ref, b1_ref, w2_ref, b2_ref, o_ref):
    # First linear: (tm, 156) @ (156, 1500) + b1, f32 accumulation on the MXU.
    h = jnp.dot(x_ref[...], w1_ref[...], preferred_element_type=jnp.float32)
    h = h + b1_ref[...]
    # Second linear: (tm, 1500) @ (1500, 512) + b2.
    out = jnp.dot(h.astype(w2_ref.dtype), w2_ref[...],
                  preferred_element_type=jnp.float32)
    out = out + b2_ref[...]
    # pos_encoder = Dropout(p=0.0): exact identity, nothing to apply.
    o_ref[...] = out.astype(o_ref.dtype)


def input_embedding_pos_encoding(x, w1, b1, w2, b2, *, block_m=256):
    """Forward of InputEmbeddingPosEncoding.

    x : (..., 156) float array
    w1: (156, 1500), b1: (1500,)
    w2: (1500, 512), b2: (512,)
    returns (..., 512) array, same dtype as x.
    """
    in_dim, hidden = w1.shape
    hidden2, out_dim = w2.shape
    assert hidden == hidden2 and x.shape[-1] == in_dim

    lead_shape = x.shape[:-1]
    x2 = x.reshape(-1, in_dim)
    m = x2.shape[0]

    # Row tile: multiple of 8 (sublane aligned), whole array if it is small.
    tm = min(block_m, pl.cdiv(m, 8) * 8)
    m_pad = pl.cdiv(m, tm) * tm
    if m_pad != m:
        x2 = jnp.pad(x2, ((0, m_pad - m), (0, 0)))

    # 2-D biases so they broadcast cleanly over the row tile.
    b1_2d = b1.reshape(1, hidden)
    b2_2d = b2.reshape(1, out_dim)

    out = pl.pallas_call(
        _fused_mlp_kernel,
        out_shape=jax.ShapeDtypeStruct((m_pad, out_dim), x.dtype),
        grid=(m_pad // tm,),
        in_specs=[
            pl.BlockSpec((tm, in_dim), lambda i: (i, 0)),      # x rows
            pl.BlockSpec((in_dim, hidden), lambda i: (0, 0)),  # W1 (resident)
            pl.BlockSpec((1, hidden), lambda i: (0, 0)),       # b1 (resident)
            pl.BlockSpec((hidden, out_dim), lambda i: (0, 0)), # W2 (resident)
            pl.BlockSpec((1, out_dim), lambda i: (0, 0)),      # b2 (resident)
        ],
        out_specs=pl.BlockSpec((tm, out_dim), lambda i: (i, 0)),
        compiler_params=pltpu.CompilerParams(
            dimension_semantics=("parallel",),
            vmem_limit_bytes=32 * 1024 * 1024,
        ),
    )(x2, w1, b1_2d, w2, b2_2d)

    if m_pad != m:
        out = out[:m]
    return out.reshape(*lead_shape, out_dim)


if __name__ == "__main__":
    key = jax.random.PRNGKey(0)
    k_x, k_w1, k_b1, k_w2, k_b2 = jax.random.split(key, 5)

    # Small shapes consistent with the module: batch=2, seq=8, in_features=156.
    batch, seq = 2, 8
    x = jax.random.normal(k_x, (batch, seq, IN_FEATURES), dtype=jnp.float32)

    # PyTorch nn.Linear-style init scale (keeps magnitudes O(1) for the check).
    s1 = 1.0 / (IN_FEATURES ** 0.5)
    s2 = 1.0 / (HIDDEN_FEATURES ** 0.5)
    w1 = jax.random.uniform(k_w1, (IN_FEATURES, HIDDEN_FEATURES), jnp.float32, -s1, s1)
    b1 = jax.random.uniform(k_b1, (HIDDEN_FEATURES,), jnp.float32, -s1, s1)
    w2 = jax.random.uniform(k_w2, (HIDDEN_FEATURES, FEATURE_DIM), jnp.float32, -s2, s2)
    b2 = jax.random.uniform(k_b2, (FEATURE_DIM,), jnp.float32, -s2, s2)

    y = input_embedding_pos_encoding(x, w1, b1, w2, b2)
    y = jax.block_until_ready(y)

    # Pure-JAX reference: Linear -> Linear -> Dropout(p=0.0) (identity).
    ref = (x.reshape(-1, IN_FEATURES) @ w1 + b1) @ w2 + b2
    ref = ref.reshape(batch, seq, FEATURE_DIM)

    assert y.shape == (batch, seq, FEATURE_DIM) and y.dtype == x.dtype
    max_err = float(jnp.max(jnp.abs(y - ref)))
    assert jnp.allclose(y, ref, rtol=1e-2, atol=1e-2), f"max abs err {max_err}"

    print("KERNEL_OK")
</pallas_src>

<mosaic_0001>
module attributes {stable_mosaic.version = 11 : i64} {
  func.func @_fused_mlp_kernel(%arg0: i32, %arg1: memref<16x156xf32, #tpu.memory_space<vmem>>, %arg2: memref<156x1500xf32, #tpu.memory_space<vmem>>, %arg3: memref<1x1500xf32, #tpu.memory_space<vmem>>, %arg4: memref<1500x512xf32, #tpu.memory_space<vmem>>, %arg5: memref<1x512xf32, #tpu.memory_space<vmem>>, %arg6: memref<16x512xf32, #tpu.memory_space<vmem>>) attributes {dimension_semantics = [#tpu.dimension_semantics<parallel>], iteration_bounds = array<i64: 1>, scalar_prefetch = 0 : i64, scratch_operands = 0 : i64, tpu.core_type = #tpu.core_type<tc>, window_params = [{transform_indices = @transform_0, window_bounds = array<i64: 16, 156>}, {pipeline_mode = #tpu.pipeline_mode<synchronous>, transform_indices = @transform_1, window_bounds = array<i64: 156, 1500>}, {pipeline_mode = #tpu.pipeline_mode<synchronous>, transform_indices = @transform_2, window_bounds = array<i64: 1, 1500>}, {pipeline_mode = #tpu.pipeline_mode<synchronous>, transform_indices = @transform_3, window_bounds = array<i64: 1500, 512>}, {pipeline_mode = #tpu.pipeline_mode<synchronous>, transform_indices = @transform_4, window_bounds = array<i64: 1, 512>}, {transform_indices = @transform_5, window_bounds = array<i64: 16, 512>}]} {
    %c0 = arith.constant 0 : index
    %c0_0 = arith.constant 0 : index
    %0 = vector.load %arg1[%c0, %c0_0] : memref<16x156xf32, #tpu.memory_space<vmem>>, vector<16x156xf32>
    %c0_1 = arith.constant 0 : index
    %c0_2 = arith.constant 0 : index
    %1 = vector.load %arg2[%c0_1, %c0_2] : memref<156x1500xf32, #tpu.memory_space<vmem>>, vector<156x1500xf32>
    %cst = arith.constant dense<0.000000e+00> : vector<16x1500xf32>
    %2 = tpu.matmul %0, %1, %cst {dimension_numbers = #tpu.dot_dimension_numbers<[1], [0], [0], [1], [0, 0, 1, 1], [], []>} : vector<16x156xf32>, vector<156x1500xf32>, vector<16x1500xf32> -> vector<16x1500xf32>
    %c0_3 = arith.constant 0 : index
    %c0_4 = arith.constant 0 : index
    %3 = vector.load %arg3[%c0_3, %c0_4] : memref<1x1500xf32, #tpu.memory_space<vmem>>, vector<1x1500xf32>
    %4 = vector.broadcast %3 : vector<1x1500xf32> to vector<16x1500xf32>
    %5 = arith.addf %2, %4 : vector<16x1500xf32>
    %c0_5 = arith.constant 0 : index
    %c0_6 = arith.constant 0 : index
    %6 = vector.load %arg4[%c0_5, %c0_6] : memref<1500x512xf32, #tpu.memory_space<vmem>>, vector<1500x512xf32>
    %cst_7 = arith.constant dense<0.000000e+00> : vector<16x512xf32>
    %7 = tpu.matmul %5, %6, %cst_7 {dimension_numbers = #tpu.dot_dimension_numbers<[1], [0], [0], [1], [0, 0, 1, 1], [], []>} : vector<16x1500xf32>, vector<1500x512xf32>, vector<16x512xf32> -> vector<16x512xf32>
    %c0_8 = arith.constant 0 : index
    %c0_9 = arith.constant 0 : index
    %8 = vector.load %arg5[%c0_8, %c0_9] : memref<1x512xf32, #tpu.memory_space<vmem>>, vector<1x512xf32>
    %9 = vector.broadcast %8 : vector<1x512xf32> to vector<16x512xf32>
    %10 = arith.addf %7, %9 : vector<16x512xf32>
    %c0_10 = arith.constant 0 : index
    %c0_11 = arith.constant 0 : index
    %11 = vector.load %arg6[%c0_10, %c0_11] : memref<16x512xf32, #tpu.memory_space<vmem>>, vector<16x512xf32>
    tpu.vector_store %arg6[%c0_10, %c0_11], %10 {strides = array<i32>} : memref<16x512xf32, #tpu.memory_space<vmem>>, vector<16x512xf32>,
    return
  }
  func.func @transform_0(%arg0: i32) -> (i32, i32) {
    %c0_i32 = arith.constant 0 : i32
    %c0_i32_0 = arith.constant 0 : i32
    return %arg0, %c0_i32 : i32, i32
  }
  func.func @transform_1(%arg0: i32) -> (i32, i32) {
    %c0_i32 = arith.constant 0 : i32
    %c0_i32_0 = arith.constant 0 : i32
    %c0_i32_1 = arith.constant 0 : i32
    return %c0_i32, %c0_i32_0 : i32, i32
  }
  func.func @transform_2(%arg0: i32) -> (i32, i32) {
    %c0_i32 = arith.constant 0 : i32
    %c0_i32_0 = arith.constant 0 : i32
    %c0_i32_1 = arith.constant 0 : i32
    return %c0_i32, %c0_i32_0 : i32, i32
  }
  func.func @transform_3(%arg0: i32) -> (i32, i32) {
    %c0_i32 = arith.constant 0 : i32
    %c0_i32_0 = arith.constant 0 : i32
    %c0_i32_1 = arith.constant 0 : i32
    return %c0_i32, %c0_i32_0 : i32, i32
  }
  func.func @transform_4(%arg0: i32) -> (i32, i32) {
    %c0_i32 = arith.constant 0 : i32
    %c0_i32_0 = arith.constant 0 : i32
    %c0_i32_1 = arith.constant 0 : i32
    return %c0_i32, %c0_i32_0 : i32, i32
  }
  func.func @transform_5(%arg0: i32) -> (i32, i32) {
    %c0_i32 = arith.constant 0 : i32
    %c0_i32_0 = arith.constant 0 : i32
    return %arg0, %c0_i32 : i32, i32
  }
}

</mosaic_0001>

<bundles_post_ra>
// kernel: tpu_custom_call.1
= control target key start
LH: loop header
LB: loop body
LE: loop exit
PB: predicated region body
PF: predicated region fallthrough
CT: control target
= control target key end

     0   :  { %10 = vsyncpa [#allocation3], 0  ;;  %s4215_s0 = inlined_call_operand.hbm [shape: f32[16,156], index: 0, kind: input, shape index: {}]   ;;  %s4216_s1 = inlined_call_operand.hbm [shape: f32[156,1500], index: 1, kind: input, shape index: {}]   ;;  %s4217_s2 = inlined_call_operand.hbm [shape: f32[1,1500], index: 2, kind: input, shape index: {}]   ;;  %s4218_s3 = inlined_call_operand.hbm [shape: f32[1500,512], index: 3, kind: input, shape index: {}]   ;;  %s4219_s4 = inlined_call_operand.hbm [shape: f32[1,512], index: 4, kind: input, shape index: {}]   ;;  %s4220_s5 = inlined_call_operand.hbm [shape: f32[16,512], index: 5, kind: output, shape index: {}]  }
   0x1   :  { %11 = vsyncpa [#allocation6], 0 }
   0x2   :  { %12 = vsyncpa [#allocation9], 0 }
   0x3   :  { %13 = vsyncpa [#allocation4], 0  ;;  %s3886_s18 = smov [#allocation5]   ;;  %s3746_s22 = scalar_lea.hbm %s4216_s1, 30720 }
   0x4   :  { %s31_s19 = sshll.u32 %s3886_s18, 4  ;;  %p3747_p0 = scmp.ne.s32.totalorder %s4216_s1, %s3746_s22  ;;  %s32_s19 = int_to_ptr.vmem [resolvable:$true] %s31_s19 }
   0x5   :  { %p3750_p1 = scmp.lt.u32.totalorder %s3746_s22, %s4216_s1 }
   0x7   :  { %p3752_p2 = pnand %p3750_p1, %p3747_p0 }
   0x9   :  { %3755 = shalt.err (!%p3752_p2)
}
   0xa   :  { %s3756_s27 = scalar_lea.vmem %s32_s19, 30720  ;;  %p3761_p4 = scmp.lt.s32.totalorder %s32_s19, %s32_s19 }
   0xb   :  { %p3757_p3 = scmp.ne.s32.totalorder %s32_s19, %s3756_s27  ;;  %p3762_p5 = scmp.lt.s32.totalorder %s3756_s27, %s3756_s27 }
   0xd   :  { %p3763_p6 = por %p3762_p5, %p3761_p4 }
   0xf   :  { %p3764_p7 = pnand %p3763_p6, %p3757_p3 }
  0x11   :  { %3767 = shalt.err (!%p3764_p7)
}
  0x12   :  { %s3887_s28 = smov 1536   ;;  %s3888_s29 = smov 96  }
  0x13   :  { %37 = dma.hbm_to_vmem [thread:$0]  %s4216_s1, 30720, %s32_s19, [#allocation6], %s3887_s28, %s3887_s28, %s3888_s29  }
  0x14   :  { %s3889_s7 = smov [#allocation8]   ;;  %s3768_s11 = scalar_lea.hbm %s4218_s3, 96256 }
  0x15   :  { %s53_s8 = sshll.u32 %s3889_s7, 4  ;;  %p3769_p8 = scmp.ne.s32.totalorder %s4218_s3, %s3768_s11  ;;  %s54_s8 = int_to_ptr.vmem [resolvable:$true] %s53_s8 }
  0x16   :  { %p3772_p9 = scmp.lt.u32.totalorder %s3768_s11, %s4218_s3 }
  0x18   :  { %p3774_p10 = pnand %p3772_p9, %p3769_p8 }
  0x1a   :  { %3777 = shalt.err (!%p3774_p10)
}
  0x1b   :  { %s3778_s16 = scalar_lea.vmem %s54_s8, 96256  ;;  %p3783_p12 = scmp.lt.s32.totalorder %s54_s8, %s54_s8 }
  0x1c   :  { %p3779_p11 = scmp.ne.s32.totalorder %s54_s8, %s3778_s16  ;;  %p3784_p13 = scmp.lt.s32.totalorder %s3778_s16, %s3778_s16 }
  0x1e   :  { %p3785_p0 = por %p3784_p13, %p3783_p12 }
  0x20   :  { %p3786_p1 = pnand %p3785_p0, %p3779_p11 }
  0x22   :  { %3789 = shalt.err (!%p3786_p1)
}
  0x23   :  { %s3890_s1 = smov 512   ;;  %s3891_s17 = smov 32  }
  0x24   :  { %59 = dma.hbm_to_vmem [thread:$0]  %s4218_s3, 96256, %s54_s8, [#allocation9], %s3890_s1, %s3890_s1, %s3891_s17  }
  0x25   :  { %s3892_s20 = smov [#allocation2]   ;;  %s3790_s24 = scalar_lea.hbm %s4215_s0, 512 }
  0x26   :  { %s19_s21 = sshll.u32 %s3892_s20, 4  ;;  %p3791_p2 = scmp.ne.s32.totalorder %s4215_s0, %s3790_s24  ;;  %s20_s21 = int_to_ptr.vmem [resolvable:$true] %s19_s21 }
  0x27   :  { %p3794_p3 = scmp.lt.u32.totalorder %s3790_s24, %s4215_s0 }
  0x29   :  { %p3796_p4 = pnand %p3794_p3, %p3791_p2 }
  0x2b   :  { %3799 = shalt.err (!%p3796_p4)
}
  0x2c   :  { %s3800_s29 = scalar_lea.vmem %s20_s21, 512  ;;  %p3805_p6 = scmp.lt.s32.totalorder %s20_s21, %s20_s21 }
  0x2d   :  { %p3801_p5 = scmp.ne.s32.totalorder %s20_s21, %s3800_s29  ;;  %p3806_p7 = scmp.lt.s32.totalorder %s3800_s29, %s3800_s29 }
  0x2f   :  { %p3807_p8 = por %p3806_p7, %p3805_p6 }
  0x31   :  { %p3808_p9 = pnand %p3807_p8, %p3801_p5 }
  0x33   :  { %3811 = shalt.err (!%p3808_p9)
}
  0x34   :  { %s3893_s3 = smov 256   ;;  %s3894_s30 = smov 16  }
  0x35   :  { %25 = dma.hbm_to_vmem [thread:$0]  %s4215_s0, 512, %s20_s21, [#allocation3], %s3893_s3, %s3893_s3, %s3894_s30  }
  0x36   :  { %s3895_s8 = smov [#allocation7]   ;;  %s3896_s10 = smov [#allocation10]  }
  0x37   :  { %s44_s9 = sshll.u32 %s3895_s8, 4  ;;  %s66_s11 = sshll.u32 %s3896_s10, 4  ;;  %s45_s9 = int_to_ptr.vmem [resolvable:$true] %s44_s9  ;;  %s67_s11 = int_to_ptr.vmem [resolvable:$true] %s66_s11 }
  0x38   :  { %s3812_s14 = scalar_lea.hbm %s4217_s2, 192 }
  0x39   :  { %p3813_p10 = scmp.ne.s32.totalorder %s4217_s2, %s3812_s14  ;;  %p3816_p11 = scmp.lt.u32.totalorder %s3812_s14, %s4217_s2 }
  0x3b   :  { %p3818_p12 = pnand %p3816_p11, %p3813_p10 }
  0x3d   :  { %3821 = shalt.err (!%p3818_p12)
}
  0x3e   :  { %s3822_s0 = scalar_lea.vmem %s45_s9, 192  ;;  %p3827_p0 = scmp.lt.s32.totalorder %s45_s9, %s45_s9 }
  0x3f   :  { %p3823_p13 = scmp.ne.s32.totalorder %s45_s9, %s3822_s0  ;;  %p3828_p1 = scmp.lt.s32.totalorder %s3822_s0, %s3822_s0 }
  0x41   :  { %p3829_p2 = por %p3828_p1, %p3827_p0 }
  0x43   :  { %p3830_p3 = pnand %p3829_p2, %p3823_p13 }
  0x45   :  { %3833 = shalt.err (!%p3830_p3)
}
  0x46   :  { %47 = dma.hbm_to_vmem [thread:$0]  %s4217_s2, 192, %s45_s9, [#allocation6]  }
  0x47   :  { %s3834_s24 = scalar_lea.hbm %s4219_s4, 64 }
  0x48   :  { %p3835_p4 = scmp.ne.s32.totalorder %s4219_s4, %s3834_s24  ;;  %p3838_p5 = scmp.lt.u32.totalorder %s3834_s24, %s4219_s4 }
  0x4a   :  { %p3840_p6 = pnand %p3838_p5, %p3835_p4 }
  0x4c   :  { %3843 = shalt.err (!%p3840_p6)
}
  0x4d   :  { %s3844_s29 = scalar_lea.vmem %s67_s11, 64  ;;  %p3849_p8 = scmp.lt.s32.totalorder %s67_s11, %s67_s11 }
  0x4e   :  { %p3845_p7 = scmp.ne.s32.totalorder %s67_s11, %s3844_s29  ;;  %p3850_p9 = scmp.lt.s32.totalorder %s3844_s29, %s3844_s29 }
  0x50   :  { %p3851_p10 = por %p3850_p9, %p3849_p8 }
  0x52   :  { %p3852_p11 = pnand %p3851_p10, %p3845_p7 }
  0x54   :  { %3855 = shalt.err (!%p3852_p11)
}
  0x55   :  { %69 = dma.hbm_to_vmem [thread:$0]  %s4219_s4, 64, %s67_s11, [#allocation9]  }
  0x56   :  { %3878 = dma.done.wait [#allocation3], 512  }
  0x57   :  { %3879 = vsyncadd [#allocation3], 4294966784 }
  0x58   :  { %3880 = dma.done.wait [#allocation6], 30912  }
  0x59   :  { %3881 = vsyncadd [#allocation6], 4294936384 }
  0x5a   :  { %3882 = dma.done.wait [#allocation9], 96320  }
  0x5b   :  { %3883 = vsyncadd [#allocation9], 4294870976  ;;  %v90_v0 = vld [vmem:[#allocation5 + $0x8] sm:$0xff]  ;;  %v89_v2 = vld [vmem:[#allocation5] sm:$0xff]  ;;  %vm393_vm0 = vcmask 228352   ;;  %vm400_vm1 = vcmask 1043456  }
  0x5c   :  { %v102_v1 = vld [vmem:[#allocation5 + $0x68] sm:$0xff]  ;;  %v101_v4 = vld [vmem:[#allocation5 + $0x60] sm:$0xff]  ;;  %v92_v32 = vld [vmem:[#allocation5 + $0x18] sm:$0xff]  ;;  %vm3897_vm2 = vmmov 1   ;;  %vm1673_vm4 = vcmask 752640   ;;  %s3898_s4 = smov [#allocation11]  }
  0x5d   :  { %v2675_v3 = vpack.c.bf16 %v102_v1, %v90_v0  ;;  %v114_v5 = vld [vmem:[#allocation5 + $0xc8] sm:$0xff]  ;;  %v2677_v7 = vpack.c.bf16 %v101_v4, %v89_v2  ;;  %v113_v9 = vld [vmem:[#allocation5 + $0xc0] sm:$0xff]  ;;  %v104_v33 = vld [vmem:[#allocation5 + $0x78] sm:$0xff]  ;;  %s2629_s30 = sshll.u32 %s3898_s4, 4  ;;  %s2630_s30 = int_to_ptr.vmem [resolvable:$true] %s2629_s30 }
  0x5e   :  { %v126_v6 = vld [vmem:[#allocation5 + $0x128] sm:$0xff]  ;;  %v125_v10 = vld [vmem:[#allocation5 + $0x120] sm:$0xff]  ;;  %v91_v34 = vld [vmem:[#allocation5 + $0x10] sm:$0xff]  ;;  %v2717_v35 = vpack.c.bf16 %v104_v33, %v92_v32  ;;  %s3856_s6 = scalar_lea.vmem %s2630_s30, 1024  ;;  %p3861_p13 = scmp.lt.s32.totalorder %s2630_s30, %s2630_s30 }
  0x5f   :  { %v2679_v8 = vpack.c.bf16 %v126_v6, %v114_v5  ;;  %v138_v11 = vld [vmem:[#allocation5 + $0x188] sm:$0xff]  ;;  %2676 = vmatprep.subr.bf16.mxu0 %v2675_v3  ;;  %v2681_v13 = vpack.c.bf16 %v125_v10, %v113_v9  ;;  %v137_v15 = vld [vmem:[#allocation5 + $0x180] sm:$0xff]  ;;  %v103_v36 = vld [vmem:[#allocation5 + $0x70] sm:$0xff]  ;;  %p3857_p12 = scmp.ne.s32.totalorder %s2630_s30, %s3856_s6  ;;  %p3862_p0 = scmp.lt.s32.totalorder %s3856_s6, %s3856_s6 }
  0x60   :  { %v150_v12 = vld [vmem:[#allocation5 + $0x1e8] sm:$0xff]  ;;  %2678 = vmatpush1.bf16.msra.mxu0 %v2677_v7  ;;  %v149_v16 = vld [vmem:[#allocation5 + $0x1e0] sm:$0xff]  ;;  %v116_v37 = vld [vmem:[#allocation5 + $0xd8] sm:$0xff]  ;;  %v2719_v40 = vpack.c.bf16 %v103_v36, %v91_v34  ;;  %2718 = vmatprep.subr.bf16.mxu1 %v2717_v35 }
  0x61   :  { %2680 = vmatprep.subr.bf16.mxu0 %v2679_v8  ;;  %v2683_v14 = vpack.c.bf16 %v150_v12, %v138_v11  ;;  %v162_v17 = vld [vmem:[#allocation5 + $0x248] sm:$0xff]  ;;  %v2685_v19 = vpack.c.bf16 %v149_v16, %v137_v15  ;;  %v161_v21 = vld [vmem:[#allocation5 + $0x240] sm:$0xff]  ;;  %v128_v38 = vld [vmem:[#allocation5 + $0x138] sm:$0xff]  ;;  %p3863_p1 = por %p3862_p0, %p3861_p13 }
  0x62   :  { %v174_v18 = vld [vmem:[#allocation5 + $0x2a8] sm:$0xff]  ;;  %v173_v22 = vld [vmem:[#allocation5 + $0x2a0] sm:$0xff]  ;;  %v2721_v41 = vpack.c.bf16 %v128_v38, %v116_v37  ;;  %v115_v42 = vld [vmem:[#allocation5 + $0xd0] sm:$0xff]  ;;  %2720 = vmatpush1.bf16.msra.mxu1 %v2719_v40 }
  0x63   :  { %v2687_v20 = vpack.c.bf16 %v174_v18, %v162_v17  ;;  %v186_v23 = vld [vmem:[#allocation5 + $0x308] sm:$0xff]  ;;  %v2689_v25 = vpack.c.bf16 %v173_v22, %v161_v21  ;;  %v185_v26 = vld [vmem:[#allocation5 + $0x300] sm:$0xff]  ;;  %v127_v43 = vld [vmem:[#allocation5 + $0x130] sm:$0xff]  ;;  %p3864_p2 = pnand %p3863_p1, %p3857_p12 }
  0x64   :  { %2682 = vmatpush1.bf16.msra.mxu0 %v2681_v13  ;;  %v198_v24 = vld [vmem:[#allocation5 + $0x368] sm:$0xff]  ;;  %v197_v27 = vld [vmem:[#allocation5 + $0x360] sm:$0xff]  ;;  %v140_v44 = vld [vmem:[#allocation5 + $0x198] sm:$0xff]  ;;  %v2723_v51 = vpack.c.bf16 %v127_v43, %v115_v42  ;;  %2722 = vmatprep.subr.bf16.mxu1 %v2721_v41 }
  0x65   :  { %2684 = vmatprep.subr.bf16.mxu0 %v2683_v14  ;;  %v2691_v28 = vpack.c.bf16 %v198_v24, %v186_v23  ;;  %v210_v29 = vld [vmem:[#allocation5 + $0x3c8] sm:$0xff]  ;;  %v2693_v39 = vpack.c.bf16 %v197_v27, %v185_v26  ;;  %v209_v46 = vld [vmem:[#allocation5 + $0x3c0] sm:$0xff]  ;;  %v152_v48 = vld [vmem:[#allocation5 + $0x1f8] sm:$0xff] }
  0x66   :  { %v222_v30 = vld [vmem:[#allocation5 + $0x428] sm:$0xff]  ;;  %v221_v47 = vld [vmem:[#allocation5 + $0x420] sm:$0xff]  ;;  %v2725_v52 = vpack.c.bf16 %v152_v48, %v140_v44  ;;  %v139_v53 = vld [vmem:[#allocation5 + $0x190] sm:$0xff]  ;;  %2724 = vmatpush1.bf16.msra.mxu1 %v2723_v51 }
  0x67   :  { %v3992_v31 = vld [vmem:[#allocation2 + $0x8] sm:$0xff]  ;;  %v2695_v45 = vpack.c.bf16 %v222_v30, %v210_v29  ;;  %v151_v54 = vld [vmem:[#allocation5 + $0x1f0] sm:$0xff]  ;;  %v2697_v55 = vpack.c.bf16 %v221_v47, %v209_v46  ;;  %v164_v56 = vld [vmem:[#allocation5 + $0x258] sm:$0xff] }
  0x68   :  { %2686 = vmatpush1.bf16.msra.mxu0 %v2685_v19  ;;  %2645 = vmatprep.mubr.msk.f32.mxu0 %vm393_vm0, %v3992_v31  ;;  %v234_v49 = vld [vmem:[#allocation5 + $0x488] sm:$0xff]  ;;  %v176_v57 = vld [vmem:[#allocation5 + $0x2b8] sm:$0xff]  ;;  %v233_v59 = vld [vmem:[#allocation5 + $0x480] sm:$0xff]  ;;  %v2727_v63 = vpack.c.bf16 %v151_v54, %v139_v53 }
  0x69   :  { %2688 = vmatprep.subr.bf16.mxu0 %v2687_v20  ;;  %2649 = vmatprep.mubr.msk.f32.mxu1 %vm393_vm0, %v3992_v31  ;;  %v246_v50 = vld [vmem:[#allocation5 + $0x4e8] sm:$0xff]  ;;  %v245_v60 = vld [vmem:[#allocation5 + $0x4e0] sm:$0xff]  ;;  %v2729_v0 = vpack.c.bf16 %v176_v57, %v164_v56  ;;  %v163_v1 = vld [vmem:[#allocation5 + $0x250] sm:$0xff] }
  0x6a   :  { %v2699_v58 = vpack.c.bf16 %v246_v50, %v234_v49  ;;  %v258_v61 = vld [vmem:[#allocation5 + $0x548] sm:$0xff]  ;;  %2726 = vmatprep.subr.bf16.mxu1 %v2725_v52  ;;  %v175_v2 = vld [vmem:[#allocation5 + $0x2b0] sm:$0xff]  ;;  %v2701_v3 = vpack.c.bf16 %v245_v60, %v233_v59  ;;  %v188_v4 = vld [vmem:[#allocation5 + $0x318] sm:$0xff] }
  0x6b   :  { %v270_v62 = vld [vmem:[#allocation5 + $0x5a8] sm:$0xff]  ;;  %v200_v5 = vld [vmem:[#allocation5 + $0x378] sm:$0xff]  ;;  %v257_v7 = vld [vmem:[#allocation5 + $0x540] sm:$0xff]  ;;  %2728 = vmatpush1.bf16.msra.mxu1 %v2727_v63  ;;  %v2731_v11 = vpack.c.bf16 %v175_v2, %v163_v1 }
  0x6c   :  { %2690 = vmatpush1.bf16.msra.mxu0 %v2689_v25  ;;  %v2703_v6 = vpack.c.bf16 %v270_v62, %v258_v61  ;;  %v269_v8 = vld [vmem:[#allocation5 + $0x5a0] sm:$0xff]  ;;  %v282_v9 = vld [vmem:[#allocation5 + $0x608] sm:$0xff]  ;;  %2730 = vmatprep.subr.bf16.mxu1 %v2729_v0  ;;  %v2733_v12 = vpack.c.bf16 %v200_v5, %v188_v4  ;;  %v187_v13 = vld [vmem:[#allocation5 + $0x310] sm:$0xff] }
  0x6d   :  { %2692 = vmatprep.subr.bf16.mxu0 %v2691_v28  ;;  %v294_v10 = vld [vmem:[#allocation5 + $0x668] sm:$0xff]  ;;  %v199_v14 = vld [vmem:[#allocation5 + $0x370] sm:$0xff]  ;;  %v2705_v15 = vpack.c.bf16 %v269_v8, %v257_v7  ;;  %v212_v16 = vld [vmem:[#allocation5 + $0x3d8] sm:$0xff] }
  0x6e   :  { %v224_v17 = vld [vmem:[#allocation5 + $0x438] sm:$0xff]  ;;  %v2707_v18 = vpack.c.bf16 %v294_v10, %v282_v9  ;;  %v281_v19 = vld [vmem:[#allocation5 + $0x600] sm:$0xff]  ;;  %v306_v21 = vld [vmem:[#allocation5 + $0x6c8] sm:$0xff]  ;;  %v2735_v23 = vpack.c.bf16 %v199_v14, %v187_v13 }
  0x6f   :  { %v293_v20 = vld [vmem:[#allocation5 + $0x660] sm:$0xff]  ;;  %v318_v22 = vld [vmem:[#allocation5 + $0x728] sm:$0xf]  ;;  %2732 = vmatpush1.bf16.msra.mxu1 %v2731_v11  ;;  %v2737_v24 = vpack.c.bf16 %v224_v17, %v212_v16  ;;  %v211_v25 = vld [vmem:[#allocation5 + $0x3d0] sm:$0xff] }
  0x70   :  { %2694 = vmatpush1.bf16.msra.mxu0 %v2693_v39  ;;  %2734 = vmatprep.subr.bf16.mxu1 %v2733_v12  ;;  %v223_v26 = vld [vmem:[#allocation5 + $0x430] sm:$0xff]  ;;  %v2709_v27 = vpack.c.bf16 %v293_v20, %v281_v19  ;;  %v236_v28 = vld [vmem:[#allocation5 + $0x498] sm:$0xff]  ;;  %v2711_v30 = vpack.c.bf16 %v318_v22, %v306_v21  ;;  %v305_v32 = vld [vmem:[#allocation5 + $0x6c0] sm:$0xff] }
  0x71   :  { %2696 = vmatprep.subr.bf16.mxu0 %v2695_v45  ;;  %v248_v29 = vld [vmem:[#allocation5 + $0x4f8] sm:$0xff]  ;;  %v317_v33 = vld [vmem:[#allocation5 + $0x720] sm:$0xf]  ;;  %vm3998_vm3 = vmpackc.low %vm400_vm1, %vm3897_vm2  ;;  %v2739_v35 = vpack.c.bf16 %v223_v26, %v211_v25 }
  0x72   :  { %v94_v36 = vld [vmem:[#allocation5 + $0x28] sm:$0xff]  ;;  %v2741_v38 = vpack.c.bf16 %v248_v29, %v236_v28  ;;  %v235_v39 = vld [vmem:[#allocation5 + $0x490] sm:$0xff]  ;;  %v2714_v41 = vpack.c.bf16 %v317_v33, %v305_v32  ;;  %v260_v42 = vld [vmem:[#allocation5 + $0x558] sm:$0xff] }
  0x73   :  { %2736 = vmatpush1.bf16.msra.mxu1 %v2735_v23  ;;  %v106_v37 = vld [vmem:[#allocation5 + $0x88] sm:$0xff]  ;;  %v247_v40 = vld [vmem:[#allocation5 + $0x4f0] sm:$0xff]  ;;  %v272_v43 = vld [vmem:[#allocation5 + $0x5b8] sm:$0xff] }
  0x74   :  { %2698 = vmatpush1.bf16.msra.mxu0 %v2697_v55  ;;  %2738 = vmatprep.subr.bf16.mxu1 %v2737_v24  ;;  %v2759_v44 = vpack.c.bf16 %v106_v37, %v94_v36  ;;  %v93_v45 = vld [vmem:[#allocation5 + $0x20] sm:$0xff]  ;;  %v2743_v47 = vpack.c.bf16 %v247_v40, %v235_v39  ;;  %v118_v48 = vld [vmem:[#allocation5 + $0xe8] sm:$0xff]  ;;  %v2745_v50 = vpack.c.bf16 %v272_v43, %v260_v42  ;;  %v259_v51 = vld [vmem:[#allocation5 + $0x550] sm:$0xff] }
  0x75   :  { %2700 = vmatprep.subr.bf16.mxu0 %v2699_v58  ;;  %v105_v46 = vld [vmem:[#allocation5 + $0x80] sm:$0xff]  ;;  %v130_v49 = vld [vmem:[#allocation5 + $0x148] sm:$0xff]  ;;  %v271_v52 = vld [vmem:[#allocation5 + $0x5b0] sm:$0xff] }
  0x76   :  { %v4006_v53 = vld [vmem:[#allocation2] sm:$0xff]  ;;  %v284_v54 = vld [vmem:[#allocation5 + $0x618] sm:$0xff]  ;;  %v2761_v56 = vpack.c.bf16 %v105_v46, %v93_v45  ;;  %v2763_v58 = vpack.c.bf16 %v130_v49, %v118_v48  ;;  %v2747_v61 = vpack.c.bf16 %v271_v52, %v259_v51  ;;  %v142_v62 = vld [vmem:[#allocation5 + $0x1a8] sm:$0xff] }
  0x77   :  { %2740 = vmatpush1.bf16.msra.mxu1 %v2739_v35  ;;  %v296_v55 = vld [vmem:[#allocation5 + $0x678] sm:$0xff]  ;;  %v117_v59 = vld [vmem:[#allocation5 + $0xe0] sm:$0xff]  ;;  %v154_v63 = vld [vmem:[#allocation5 + $0x208] sm:$0xff] }
  0x78   :  { %2702 = vmatpush1.bf16.msra.mxu0 %v2701_v3  ;;  %2742 = vmatprep.subr.bf16.mxu1 %v2741_v38  ;;  %v4008_v57 = vld [vmem:[#allocation2 + $0x18] sm:$0xff]  ;;  %v129_v60 = vld [vmem:[#allocation5 + $0x140] sm:$0xff]  ;;  %v2749_v0 = vpack.c.bf16 %v296_v55, %v284_v54  ;;  %v283_v1 = vld [vmem:[#allocation5 + $0x610] sm:$0xff]  ;;  %v2767_v7 = vpack.c.bf16 %v154_v63, %v142_v62 }
  0x79   :  { %2704 = vmatprep.subr.bf16.mxu0 %v2703_v6  ;;  %v295_v2 = vld [vmem:[#allocation5 + $0x670] sm:$0xff]  ;;  %v308_v4 = vld [vmem:[#allocation5 + $0x6d8] sm:$0xff]  ;;  %v2765_v6 = vpack.c.bf16 %v129_v60, %v117_v59  ;;  %v141_v8 = vld [vmem:[#allocation5 + $0x1a0] sm:$0xff] }
  0x7a   :  { %v4013_v3 = vld [vmem:[#allocation2 + $0x10] sm:$0xff]  ;;  %v320_v5 = vld [vmem:[#allocation5 + $0x738] sm:$0xf]  ;;  %v153_v9 = vld [vmem:[#allocation5 + $0x200] sm:$0xff]  ;;  %v2751_v10 = vpack.c.bf16 %v295_v2, %v283_v1 }
  0x7b   :  { %2744 = vmatpush1.bf16.msra.mxu1 %v2743_v47  ;;  %v166_v11 = vld [vmem:[#allocation5 + $0x268] sm:$0xff]  ;;  %v2753_v13 = vpack.c.bf16 %v320_v5, %v308_v4  ;;  %v307_v14 = vld [vmem:[#allocation5 + $0x6d0] sm:$0xff]  ;;  %v96_v16 = vld [vmem:[#allocation5 + $0x38] sm:$0xff] }
  0x7c   :  { %2706 = vmatpush1.bf16.msra.mxu0 %v2705_v15  ;;  %2746 = vmatprep.subr.bf16.mxu1 %v2745_v50  ;;  %v178_v12 = vld [vmem:[#allocation5 + $0x2c8] sm:$0xff]  ;;  %v319_v15 = vld [vmem:[#allocation5 + $0x730] sm:$0xf]  ;;  %v108_v17 = vld [vmem:[#allocation5 + $0x98] sm:$0xff] }
  0x7d   :  { %2708 = vmatprep.subr.bf16.mxu0 %v2707_v18  ;;  %v2769_v18 = vpack.c.bf16 %v153_v9, %v141_v8  ;;  %v2771_v19 = vpack.c.bf16 %v178_v12, %v166_v11  ;;  %v165_v20 = vld [vmem:[#allocation5 + $0x260] sm:$0xff]  ;;  %v2756_v22 = vpack.c.bf16 %v319_v15, %v307_v14  ;;  %v190_v23 = vld [vmem:[#allocation5 + $0x328] sm:$0xff]  ;;  %v2801_v25 = vpack.c.bf16 %v108_v17, %v96_v16  ;;  %v95_v26 = vld [vmem:[#allocation5 + $0x30] sm:$0xff] }
  0x7e   :  { %v177_v21 = vld [vmem:[#allocation5 + $0x2c0] sm:$0xff]  ;;  %v202_v24 = vld [vmem:[#allocation5 + $0x388] sm:$0xff]  ;;  %v120_v28 = vld [vmem:[#allocation5 + $0xf8] sm:$0xff] }
  0x7f   :  { %2748 = vmatpush1.bf16.msra.mxu1 %v2747_v61  ;;  %v132_v29 = vld [vmem:[#allocation5 + $0x158] sm:$0xff]  ;;  %v2775_v32 = vpack.c.bf16 %v202_v24, %v190_v23  ;;  %v189_v33 = vld [vmem:[#allocation5 + $0x320] sm:$0xff]  ;;  %v214_v37 = vld [vmem:[#allocation5 + $0x3e8] sm:$0xff] }
  0x80   :  { %2710 = vmatpush1.bf16.msra.mxu0 %v2709_v27  ;;  %2750 = vmatprep.subr.bf16.mxu1 %v2749_v0  ;;  %v107_v27 = vld [vmem:[#allocation5 + $0x90] sm:$0xff]  ;;  %v201_v35 = vld [vmem:[#allocation5 + $0x380] sm:$0xff]  ;;  %v226_v38 = vld [vmem:[#allocation5 + $0x448] sm:$0xff]  ;;  %v2805_v39 = vpack.c.bf16 %v132_v29, %v120_v28 }
  0x81   :  { %2713 = vmatprep.subr.msk.bf16.mxu0 %vm3998_vm3, %v2711_v30  ;;  %v2773_v30 = vpack.c.bf16 %v177_v21, %v165_v20  ;;  %v2803_v36 = vpack.c.bf16 %v107_v27, %v95_v26  ;;  %v119_v40 = vld [vmem:[#allocation5 + $0xf0] sm:$0xff]  ;;  %v144_v42 = vld [vmem:[#allocation5 + $0x1b8] sm:$0xff]  ;;  %v2779_v45 = vpack.c.bf16 %v226_v38, %v214_v37  ;;  %v213_v46 = vld [vmem:[#allocation5 + $0x3e0] sm:$0xff] }
  0x82   :  { %v156_v43 = vld [vmem:[#allocation5 + $0x218] sm:$0xff]  ;;  %v225_v47 = vld [vmem:[#allocation5 + $0x440] sm:$0xff]  ;;  %v238_v49 = vld [vmem:[#allocation5 + $0x4a8] sm:$0xff] }
  0x83   :  { %2752 = vmatpush1.bf16.msra.mxu1 %v2751_v10  ;;  %v250_v50 = vld [vmem:[#allocation5 + $0x508] sm:$0xff]  ;;  %v2809_v51 = vpack.c.bf16 %v156_v43, %v144_v42  ;;  %v143_v52 = vld [vmem:[#allocation5 + $0x1b0] sm:$0xff]  ;;  %v168_v55 = vld [vmem:[#allocation5 + $0x278] sm:$0xff] }
  0x84   :  { %2716 = vmatpush1.bf16.msk.msra.mxu0 %vm3998_vm3, %v2714_v41  ;;  %2755 = vmatprep.subr.msk.bf16.mxu1 %vm3998_vm3, %v2753_v13  ;;  %v131_v41 = vld [vmem:[#allocation5 + $0x150] sm:$0xff]  ;;  %v2783_v59 = vpack.c.bf16 %v250_v50, %v238_v49  ;;  %v237_v60 = vld [vmem:[#allocation5 + $0x4a0] sm:$0xff]  ;;  %v262_v63 = vld [vmem:[#allocation5 + $0x568] sm:$0xff] }
  0x85   :  { %2760 = vmatprep.subr.bf16.mxu0 %v2759_v44  ;;  %v2777_v44 = vpack.c.bf16 %v201_v35, %v189_v33  ;;  %v2807_v48 = vpack.c.bf16 %v131_v41, %v119_v40  ;;  %v155_v54 = vld [vmem:[#allocation5 + $0x210] sm:$0xff]  ;;  %v249_v61 = vld [vmem:[#allocation5 + $0x500] sm:$0xff]  ;;  %v274_v0 = vld [vmem:[#allocation5 + $0x5c8] sm:$0xff] }
  0x86   :  { %v2811_v62 = vpack.c.bf16 %v155_v54, %v143_v52  ;;  %v167_v2 = vld [vmem:[#allocation5 + $0x270] sm:$0xff]  ;;  %v192_v5 = vld [vmem:[#allocation5 + $0x338] sm:$0xff]  ;;  %v2787_v8 = vpack.c.bf16 %v274_v0, %v262_v63  ;;  %v261_v9 = vld [vmem:[#allocation5 + $0x560] sm:$0xff] }
  0x87   :  { %502 = vmatmul.mubr.f32.vlgmr.msra.gmra.mrb[0].mxu0 %v4006_v53  ;;  %2758 = vmatpush1.bf16.msk.msra.mxu1 %vm3998_vm3, %v2756_v22  ;;  %v179_v4 = vld [vmem:[#allocation5 + $0x2d0] sm:$0xff]  ;;  %v273_v10 = vld [vmem:[#allocation5 + $0x5c0] sm:$0xff]  ;;  %v286_v12 = vld [vmem:[#allocation5 + $0x628] sm:$0xff] }
  0x88   :  { %2646 = vmatprep.mubr.msk.f32.mxu0 %vm393_vm0, %v4008_v57  ;;  %2762 = vmatpush1.bf16.msra.mxu0 %v2761_v56  ;;  %v180_v56 = vld [vmem:[#allocation5 + $0x2d8] sm:$0xff]  ;;  %v2815_v11 = vpack.c.bf16 %v179_v4, %v167_v2  ;;  %v298_v13 = vld [vmem:[#allocation5 + $0x688] sm:$0xff]  ;;  %v191_v15 = vld [vmem:[#allocation5 + $0x330] sm:$0xff] }
  0x89   :  { %2764 = vmatprep.subr.bf16.mxu0 %v2763_v58  ;;  %2802 = vmatprep.subr.bf16.mxu1 %v2801_v25  ;;  %v2781_v58 = vpack.c.bf16 %v225_v47, %v213_v46  ;;  %v2813_v1 = vpack.c.bf16 %v180_v56, %v168_v55  ;;  %v203_v16 = vld [vmem:[#allocation5 + $0x390] sm:$0xff]  ;;  %v216_v17 = vld [vmem:[#allocation5 + $0x3f8] sm:$0xff]  ;;  %v2791_v20 = vpack.c.bf16 %v298_v13, %v286_v12  ;;  %v285_v21 = vld [vmem:[#allocation5 + $0x620] sm:$0xff] }
  0x8a   :  { %579 = vmatmul.mubr.f32.vlgmr.msra.gmra.mrb[0].mxu1 %v4006_v53  ;;  %v297_v22 = vld [vmem:[#allocation5 + $0x680] sm:$0xff]  ;;  %v2819_v23 = vpack.c.bf16 %v203_v16, %v191_v15  ;;  %v310_v24 = vld [vmem:[#allocation5 + $0x6e8] sm:$0xff]  ;;  %v215_v27 = vld [vmem:[#allocation5 + $0x3f0] sm:$0xff] }
  0x8b   :  { %508 = vmatmul.mubr.f32.gmra.mrb[2].mxu0 %v4013_v3  ;;  %2804 = vmatpush1.bf16.msra.mxu1 %v2803_v36  ;;  %v322_v25 = vld [vmem:[#allocation5 + $0x748] sm:$0xf]  ;;  %v227_v28 = vld [vmem:[#allocation5 + $0x450] sm:$0xff]  ;;  %v240_v29 = vld [vmem:[#allocation5 + $0x4b8] sm:$0xff] }
  0x8c   :  { %2766 = vmatpush1.bf16.msra.mxu0 %v2765_v6  ;;  %2653 = vmatprep.mubr.msk.f32.mxu0 %vm393_vm0, %v3992_v31  ;;  %v204_v6 = vld [vmem:[#allocation5 + $0x398] sm:$0xff]  ;;  %v2795_v33 = vpack.c.bf16 %v322_v25, %v310_v24  ;;  %v309_v35 = vld [vmem:[#allocation5 + $0x6e0] sm:$0xff]  ;;  %v2823_v37 = vpack.c.bf16 %v227_v28, %v215_v27  ;;  %v98_v38 = vld [vmem:[#allocation5 + $0x48] sm:$0xff] }
  0x8d   :  { %2768 = vmatprep.subr.bf16.mxu0 %v2767_v7  ;;  %2650 = vmatprep.mubr.msk.f32.mxu1 %vm393_vm0, %v4008_v57  ;;  %v2785_v7 = vpack.c.bf16 %v249_v61, %v237_v60  ;;  %v2817_v14 = vpack.c.bf16 %v204_v6, %v192_v5  ;;  %v321_v36 = vld [vmem:[#allocation5 + $0x740] sm:$0xf]  ;;  %v239_v41 = vld [vmem:[#allocation5 + $0x4b0] sm:$0xff]  ;;  %v264_v43 = vld [vmem:[#allocation5 + $0x578] sm:$0xff] }
  0x8e   :  { %2806 = vmatprep.subr.bf16.mxu1 %v2805_v39  ;;  %585 = vmatmul.mubr.f32.gmra.mrb[2].mxu1 %v4013_v3  ;;  %v110_v39 = vld [vmem:[#allocation5 + $0xa8] sm:$0xff]  ;;  %v251_v42 = vld [vmem:[#allocation5 + $0x510] sm:$0xff]  ;;  %v97_v47 = vld [vmem:[#allocation5 + $0x40] sm:$0xff] }
  0x8f   :  { %2808 = vmatpush1.bf16.msra.mxu1 %v2807_v48  ;;  %2657 = vmatprep.mubr.msk.f32.mxu1 %vm393_vm0, %v3992_v31  ;;  %v2843_v46 = vpack.c.bf16 %v110_v39, %v98_v38  ;;  %v109_v48 = vld [vmem:[#allocation5 + $0xa0] sm:$0xff]  ;;  %v2827_v49 = vpack.c.bf16 %v251_v42, %v239_v41  ;;  %v122_v50 = vld [vmem:[#allocation5 + $0x108] sm:$0xff]  ;;  %v263_v54 = vld [vmem:[#allocation5 + $0x570] sm:$0xff] }
  0x90   :  { %2770 = vmatpush1.bf16.msra.mxu0 %v2769_v18  ;;  %2810 = vmatprep.subr.bf16.mxu1 %v2809_v51  ;;  %v228_v18 = vld [vmem:[#allocation5 + $0x458] sm:$0xff]  ;;  %v134_v51 = vld [vmem:[#allocation5 + $0x168] sm:$0xff]  ;;  %v275_v55 = vld [vmem:[#allocation5 + $0x5d0] sm:$0xff] }
  0x91   :  { %2772 = vmatprep.subr.bf16.mxu0 %v2771_v19  ;;  %v2789_v19 = vpack.c.bf16 %v273_v10, %v261_v9  ;;  %v2821_v26 = vpack.c.bf16 %v228_v18, %v216_v17  ;;  %v288_v56 = vld [vmem:[#allocation5 + $0x638] sm:$0xff]  ;;  %v2847_v60 = vpack.c.bf16 %v134_v51, %v122_v50  ;;  %v121_v61 = vld [vmem:[#allocation5 + $0x100] sm:$0xff]  ;;  %v2831_v63 = vpack.c.bf16 %v275_v55, %v263_v54  ;;  %v146_v0 = vld [vmem:[#allocation5 + $0x1c8] sm:$0xff] }
  0x92   :  { %v287_v4 = vld [vmem:[#allocation5 + $0x630] sm:$0xff]  ;;  %v312_v6 = vld [vmem:[#allocation5 + $0x6f8] sm:$0xff]  ;;  %v145_v10 = vld [vmem:[#allocation5 + $0x1c0] sm:$0xff] }
  0x93   :  { %2812 = vmatpush1.bf16.msra.mxu1 %v2811_v62  ;;  %v133_v62 = vld [vmem:[#allocation5 + $0x160] sm:$0xff]  ;;  %v299_v5 = vld [vmem:[#allocation5 + $0x690] sm:$0xff]  ;;  %v170_v13 = vld [vmem:[#allocation5 + $0x288] sm:$0xff] }
  0x94   :  { %2774 = vmatpush1.bf16.msra.mxu0 %v2773_v30  ;;  %2814 = vmatprep.subr.bf16.mxu1 %v2813_v1  ;;  %v252_v30 = vld [vmem:[#allocation5 + $0x518] sm:$0xff]  ;;  %v158_v1 = vld [vmem:[#allocation5 + $0x228] sm:$0xff]  ;;  %v2835_v12 = vpack.c.bf16 %v299_v5, %v287_v4  ;;  %v311_v16 = vld [vmem:[#allocation5 + $0x6f0] sm:$0xff] }
  0x95   :  { %2776 = vmatprep.subr.bf16.mxu0 %v2775_v32  ;;  %v2793_v32 = vpack.c.bf16 %v297_v22, %v285_v21  ;;  %v2825_v40 = vpack.c.bf16 %v252_v30, %v240_v29  ;;  %v2851_v9 = vpack.c.bf16 %v158_v1, %v146_v0  ;;  %v323_v17 = vld [vmem:[#allocation5 + $0x750] sm:$0xf]  ;;  %v100_v18 = vld [vmem:[#allocation5 + $0x58] sm:$0xff]  ;;  %v169_v22 = vld [vmem:[#allocation5 + $0x280] sm:$0xff] }
  0x96   :  { %v2840_v24 = vpack.c.bf16 %v323_v17, %v311_v16  ;;  %v194_v25 = vld [vmem:[#allocation5 + $0x348] sm:$0xff]  ;;  %v99_v28 = vld [vmem:[#allocation5 + $0x50] sm:$0xff]  ;;  %v124_v30 = vld [vmem:[#allocation5 + $0x118] sm:$0xff] }
  0x97   :  { %2816 = vmatpush1.bf16.msra.mxu1 %v2815_v11  ;;  %v157_v11 = vld [vmem:[#allocation5 + $0x220] sm:$0xff]  ;;  %v111_v29 = vld [vmem:[#allocation5 + $0xb0] sm:$0xff]  ;;  %v218_v39 = vld [vmem:[#allocation5 + $0x408] sm:$0xff] }
  0x98   :  { %2778 = vmatpush1.bf16.msra.mxu0 %v2777_v44  ;;  %2818 = vmatprep.subr.bf16.mxu1 %v2817_v14  ;;  %v276_v44 = vld [vmem:[#allocation5 + $0x5d8] sm:$0xff]  ;;  %v182_v14 = vld [vmem:[#allocation5 + $0x2e8] sm:$0xff]  ;;  %v2887_v38 = vpack.c.bf16 %v111_v29, %v99_v28  ;;  %v123_v42 = vld [vmem:[#allocation5 + $0x110] sm:$0xff] }
  0x99   :  { %2780 = vmatprep.subr.bf16.mxu0 %v2779_v45  ;;  %v2798_v45 = vpack.c.bf16 %v321_v36, %v309_v35  ;;  %v2829_v52 = vpack.c.bf16 %v276_v44, %v264_v43  ;;  %v2855_v21 = vpack.c.bf16 %v182_v14, %v170_v13  ;;  %v193_v36 = vld [vmem:[#allocation5 + $0x340] sm:$0xff]  ;;  %v135_v43 = vld [vmem:[#allocation5 + $0x170] sm:$0xff]  ;;  %v148_v44 = vld [vmem:[#allocation5 + $0x1d8] sm:$0xff] }
  0x9a   :  { %v2891_v50 = vpack.c.bf16 %v135_v43, %v123_v42  ;;  %v242_v51 = vld [vmem:[#allocation5 + $0x4c8] sm:$0xff]  ;;  %v147_v55 = vld [vmem:[#allocation5 + $0x1d0] sm:$0xff] }
  0x9b   :  { %2820 = vmatpush1.bf16.msra.mxu1 %v2819_v23  ;;  %v181_v23 = vld [vmem:[#allocation5 + $0x2e0] sm:$0xff]  ;;  %v266_v1 = vld [vmem:[#allocation5 + $0x588] sm:$0xff]  ;;  %v171_v5 = vld [vmem:[#allocation5 + $0x290] sm:$0xff] }
  0x9c   :  { %2782 = vmatpush1.bf16.msra.mxu0 %v2781_v58  ;;  %2822 = vmatprep.subr.bf16.mxu1 %v2821_v26  ;;  %v300_v58 = vld [vmem:[#allocation5 + $0x698] sm:$0xff]  ;;  %v206_v26 = vld [vmem:[#allocation5 + $0x3a8] sm:$0xff]  ;;  %v195_v17 = vld [vmem:[#allocation5 + $0x350] sm:$0xff] }
  0x9d   :  { %2784 = vmatprep.subr.bf16.mxu0 %v2783_v59  ;;  %v2845_v59 = vpack.c.bf16 %v109_v48, %v97_v47  ;;  %v2833_v2 = vpack.c.bf16 %v300_v58, %v288_v56  ;;  %v2859_v35 = vpack.c.bf16 %v206_v26, %v194_v25  ;;  %v217_v48 = vld [vmem:[#allocation5 + $0x400] sm:$0xff]  ;;  %v159_v56 = vld [vmem:[#allocation5 + $0x230] sm:$0xff]  ;;  %v172_v58 = vld [vmem:[#allocation5 + $0x298] sm:$0xff] }
  0x9e   :  { %v2895_v0 = vpack.c.bf16 %v159_v56, %v147_v55  ;;  %v290_v14 = vld [vmem:[#allocation5 + $0x648] sm:$0xff]  ;;  %v219_v28 = vld [vmem:[#allocation5 + $0x410] sm:$0xff] }
  0x9f   :  { %2824 = vmatpush1.bf16.msra.mxu1 %v2823_v37  ;;  %v205_v37 = vld [vmem:[#allocation5 + $0x3a0] sm:$0xff]  ;;  %v314_v25 = vld [vmem:[#allocation5 + $0x708] sm:$0xff]  ;;  %v231_v29 = vld [vmem:[#allocation5 + $0x470] sm:$0xff] }
  0xa0   :  { %2786 = vmatpush1.bf16.msra.mxu0 %v2785_v7  ;;  %2826 = vmatprep.subr.bf16.mxu1 %v2825_v40  ;;  %v324_v7 = vld [vmem:[#allocation5 + $0x758] sm:$0xf]  ;;  %v230_v40 = vld [vmem:[#allocation5 + $0x468] sm:$0xff]  ;;  %v243_v42 = vld [vmem:[#allocation5 + $0x4d0] sm:$0xff] }
  0xa1   :  { %2788 = vmatprep.subr.bf16.mxu0 %v2787_v8  ;;  %v2849_v8 = vpack.c.bf16 %v133_v62, %v121_v61  ;;  %v2837_v15 = vpack.c.bf16 %v324_v7, %v312_v6  ;;  %v2863_v47 = vpack.c.bf16 %v230_v40, %v218_v39  ;;  %v241_v62 = vld [vmem:[#allocation5 + $0x4c0] sm:$0xff]  ;;  %v183_v6 = vld [vmem:[#allocation5 + $0x2f0] sm:$0xff]  ;;  %v196_v7 = vld [vmem:[#allocation5 + $0x358] sm:$0xff] }
  0xa2   :  { %v2899_v13 = vpack.c.bf16 %v183_v6, %v171_v5  ;;  %v326_v26 = vld [vmem:[#allocation5 + $0x768] sm:$0xf]  ;;  %v900_v39 = vld [vmem:[#allocation8 + $0x8] sm:$0xff] }
  0xa3   :  { %2828 = vmatpush1.bf16.msra.mxu1 %v2827_v49  ;;  %v229_v49 = vld [vmem:[#allocation5 + $0x460] sm:$0xff]  ;;  %v904_v40 = vld [vmem:[#allocation8 + $0x28] sm:$0xff] }
  0xa4   :  { %2790 = vmatpush1.bf16.msra.mxu0 %v2789_v19  ;;  %2830 = vmatprep.subr.bf16.mxu1 %v2829_v52  ;;  %v112_v19 = vld [vmem:[#allocation5 + $0xb8] sm:$0xff]  ;;  %v254_v52 = vld [vmem:[#allocation5 + $0x528] sm:$0xff]  ;;  %v255_v43 = vld [vmem:[#allocation5 + $0x530] sm:$0xff] }
  0xa5   :  { %2792 = vmatprep.subr.bf16.mxu0 %v2791_v20  ;;  %v2853_v20 = vpack.c.bf16 %v157_v11, %v145_v10  ;;  %v2885_v27 = vpack.c.bf16 %v112_v19, %v100_v18  ;;  %v2867_v61 = vpack.c.bf16 %v254_v52, %v242_v51  ;;  %v265_v11 = vld [vmem:[#allocation5 + $0x580] sm:$0xff]  ;;  %v220_v18 = vld [vmem:[#allocation5 + $0x418] sm:$0xff]  ;;  %v267_v55 = vld [vmem:[#allocation5 + $0x590] sm:$0xff] }
  0xa6   :  { %v232_v19 = vld [vmem:[#allocation5 + $0x478] sm:$0xff]  ;;  %v279_v56 = vld [vmem:[#allocation5 + $0x5f0] sm:$0xff] }
  0xa7   :  { %2832 = vmatpush1.bf16.msra.mxu1 %v2831_v63  ;;  %v253_v63 = vld [vmem:[#allocation5 + $0x520] sm:$0xff]  ;;  %v908_v51 = vld [vmem:[#allocation8 + $0x48] sm:$0xff] }
  0xa8   :  { %2794 = vmatpush1.bf16.msra.mxu0 %v2793_v32  ;;  %2834 = vmatprep.subr.bf16.mxu1 %v2833_v2  ;;  %v136_v32 = vld [vmem:[#allocation5 + $0x178] sm:$0xff]  ;;  %v278_v2 = vld [vmem:[#allocation5 + $0x5e8] sm:$0xff]  ;;  %v291_v5 = vld [vmem:[#allocation5 + $0x650] sm:$0xff] }
  0xa9   :  { %2797 = vmatprep.subr.msk.bf16.mxu0 %vm3998_vm3, %v2795_v33  ;;  %v2857_v33 = vpack.c.bf16 %v181_v23, %v169_v22  ;;  %v2889_v41 = vpack.c.bf16 %v136_v32, %v124_v30  ;;  %v2871_v10 = vpack.c.bf16 %v278_v2, %v266_v1  ;;  %v289_v22 = vld [vmem:[#allocation5 + $0x640] sm:$0xff]  ;;  %v244_v30 = vld [vmem:[#allocation5 + $0x4d8] sm:$0xff]  ;;  %v303_v6 = vld [vmem:[#allocation5 + $0x6b0] sm:$0xff] }
  0xaa   :  { %v301_v23 = vld [vmem:[#allocation5 + $0x6a0] sm:$0xff]  ;;  %v256_v32 = vld [vmem:[#allocation5 + $0x538] sm:$0xff] }
  0xab   :  { %2836 = vmatpush1.bf16.msra.mxu1 %v2835_v12  ;;  %v277_v12 = vld [vmem:[#allocation5 + $0x5e0] sm:$0xff]  ;;  %v912_v52 = vld [vmem:[#allocation8 + $0x68] sm:$0xff] }
  0xac   :  { %2800 = vmatpush1.bf16.msk.msra.mxu0 %vm3998_vm3, %v2798_v45  ;;  %2839 = vmatprep.subr.msk.bf16.mxu1 %vm3998_vm3, %v2837_v15  ;;  %v160_v45 = vld [vmem:[#allocation5 + $0x238] sm:$0xff]  ;;  %v302_v15 = vld [vmem:[#allocation5 + $0x6a8] sm:$0xff] }
  0xad   :  { %2844 = vmatprep.subr.bf16.mxu0 %v2843_v46  ;;  %v2861_v46 = vpack.c.bf16 %v205_v37, %v193_v36  ;;  %v2893_v54 = vpack.c.bf16 %v160_v45, %v148_v44  ;;  %v313_v36 = vld [vmem:[#allocation5 + $0x700] sm:$0xff]  ;;  %v268_v44 = vld [vmem:[#allocation5 + $0x598] sm:$0xff] }
  0xae   :  { %v325_v37 = vld [vmem:[#allocation5 + $0x760] sm:$0xf]  ;;  %v280_v45 = vld [vmem:[#allocation5 + $0x5f8] sm:$0xff] }
  0xaf   :  { %656 = vmatmul.mubr.f32.vlgmr.msra.gmra.mrb[4].mxu0 %v4006_v53  ;;  %2842 = vmatpush1.bf16.msk.msra.mxu1 %vm3998_vm3, %v2840_v24  ;;  %v916_v1 = vld [vmem:[#allocation8 + $0x88] sm:$0xff] }
  0xb0   :  { %2846 = vmatpush1.bf16.msra.mxu0 %v2845_v59  ;;  %2654 = vmatprep.mubr.msk.f32.mxu0 %vm393_vm0, %v4008_v57  ;;  %v184_v59 = vld [vmem:[#allocation5 + $0x2f8] sm:$0xff] }
  0xb1   :  { %2848 = vmatprep.subr.bf16.mxu0 %v2847_v60  ;;  %2886 = vmatprep.subr.bf16.mxu1 %v2885_v27  ;;  %v2865_v60 = vpack.c.bf16 %v229_v49, %v217_v48  ;;  %v2897_v4 = vpack.c.bf16 %v184_v59, %v172_v58  ;;  %v2905_v27 = vpack.c.bf16 %v232_v19, %v220_v18  ;;  %v899_v48 = vld [vmem:[#allocation8] sm:$0xff]  ;;  %v292_v58 = vld [vmem:[#allocation5 + $0x658] sm:$0xff]  ;;  %v902_v18 = vld [vmem:[#allocation8 + $0x18] sm:$0xff] }
  0xb2   :  { %733 = vmatmul.mubr.f32.vlgmr.msra.gmra.mrb[4].mxu1 %v4006_v53  ;;  %v903_v49 = vld [vmem:[#allocation8 + $0x20] sm:$0xff]  ;;  %v304_v59 = vld [vmem:[#allocation5 + $0x6b8] sm:$0xff]  ;;  %v906_v19 = vld [vmem:[#allocation8 + $0x38] sm:$0xff] }
  0xb3   :  { %662 = vmatmul.mubr.f32.gmra.mrb[6].mxu0 %v4013_v3  ;;  %2888 = vmatpush1.bf16.msra.mxu1 %v2887_v38  ;;  %v2907_v38 = vpack.c.bf16 %v231_v29, %v219_v28  ;;  %v920_v2 = vld [vmem:[#allocation8 + $0xa8] sm:$0xff]  ;;  %v901_v28 = vld [vmem:[#allocation8 + $0x10] sm:$0xff] }
  0xb4   :  { %2850 = vmatpush1.bf16.msra.mxu0 %v2849_v8  ;;  %2661 = vmatprep.mubr.msk.f32.mxu0 %vm393_vm0, %v3992_v31  ;;  %v208_v8 = vld [vmem:[#allocation5 + $0x3b8] sm:$0xff] }
  0xb5   :  { %2852 = vmatprep.subr.bf16.mxu0 %v2851_v9  ;;  %2658 = vmatprep.mubr.msk.f32.mxu1 %vm393_vm0, %v4008_v57  ;;  %v2869_v9 = vpack.c.bf16 %v253_v63, %v241_v62  ;;  %v2901_v16 = vpack.c.bf16 %v208_v8, %v196_v7  ;;  %v907_v62 = vld [vmem:[#allocation8 + $0x40] sm:$0xff]  ;;  %v316_v7 = vld [vmem:[#allocation5 + $0x718] sm:$0xff] }
  0xb6   :  { %2890 = vmatprep.subr.bf16.mxu1 %v2889_v41  ;;  %739 = vmatmul.mubr.f32.gmra.mrb[6].mxu1 %v4013_v3  ;;  %v2909_v41 = vpack.c.bf16 %v256_v32, %v244_v30  ;;  %v911_v63 = vld [vmem:[#allocation8 + $0x60] sm:$0xff]  ;;  %v328_v8 = vld [vmem:[#allocation5 + $0x778] sm:$0xf]  ;;  %v905_v29 = vld [vmem:[#allocation8 + $0x30] sm:$0xff] }
  0xb7   :  { %2892 = vmatpush1.bf16.msra.mxu1 %v2891_v50  ;;  %2665 = vmatprep.mubr.msk.f32.mxu1 %vm393_vm0, %v3992_v31  ;;  %v207_v31 = vld [vmem:[#allocation5 + $0x3b0] sm:$0xff]  ;;  %v2911_v50 = vpack.c.bf16 %v255_v43, %v243_v42  ;;  %v910_v30 = vld [vmem:[#allocation8 + $0x58] sm:$0xff]  ;;  %v909_v42 = vld [vmem:[#allocation8 + $0x50] sm:$0xff] }
  0xb8   :  { %2854 = vmatpush1.bf16.msra.mxu0 %v2853_v20  ;;  %2894 = vmatprep.subr.bf16.mxu1 %v2893_v54  ;;  %v2873_v20 = vpack.c.bf16 %v277_v12, %v265_v11  ;;  %v2903_v24 = vpack.c.bf16 %v207_v31, %v195_v17  ;;  %v2913_v54 = vpack.c.bf16 %v280_v45, %v268_v44  ;;  %v915_v11 = vld [vmem:[#allocation8 + $0x80] sm:$0xff]  ;;  %v914_v32 = vld [vmem:[#allocation8 + $0x78] sm:$0xff]  ;;  %v913_v43 = vld [vmem:[#allocation8 + $0x70] sm:$0xff] }
  0xb9   :  { %2856 = vmatprep.subr.bf16.mxu0 %v2855_v21  ;;  %v2875_v21 = vpack.c.bf16 %v302_v15, %v290_v14  ;;  %v919_v12 = vld [vmem:[#allocation8 + $0xa0] sm:$0xff]  ;;  %v924_v14 = vld [vmem:[#allocation8 + $0xc8] sm:$0xff]  ;;  %v918_v44 = vld [vmem:[#allocation8 + $0x98] sm:$0xff] }
  0xba   :  { %v928_v15 = vld [vmem:[#allocation8 + $0xe8] sm:$0xff]  ;;  %v327_v31 = vld [vmem:[#allocation5 + $0x770] sm:$0xf]  ;;  %v922_v45 = vld [vmem:[#allocation8 + $0xb8] sm:$0xff] }
  0xbb   :  { %2896 = vmatpush1.bf16.msra.mxu1 %v2895_v0  ;;  %v2915_v0 = vpack.c.bf16 %v279_v56, %v267_v55  ;;  %v315_v17 = vld [vmem:[#allocation5 + $0x710] sm:$0xff]  ;;  %v917_v55 = vld [vmem:[#allocation8 + $0x90] sm:$0xff] }
  0xbc   :  { %2858 = vmatpush1.bf16.msra.mxu0 %v2857_v33  ;;  %2898 = vmatprep.subr.bf16.mxu1 %v2897_v4  ;;  %v2877_v33 = vpack.c.bf16 %v301_v23, %v289_v22  ;;  %v2917_v4 = vpack.c.bf16 %v304_v59, %v292_v58  ;;  %v923_v22 = vld [vmem:[#allocation8 + $0xc0] sm:$0xff]  ;;  %v921_v56 = vld [vmem:[#allocation8 + $0xb0] sm:$0xff]  ;;  %v926_v58 = vld [vmem:[#allocation8 + $0xd8] sm:$0xff] }
  0xbd   :  { %2860 = vmatprep.subr.bf16.mxu0 %v2859_v35  ;;  %v2879_v35 = vpack.c.bf16 %v326_v26, %v314_v25  ;;  %v927_v23 = vld [vmem:[#allocation8 + $0xe0] sm:$0xff]  ;;  %v932_v25 = vld [vmem:[#allocation8 + $0x108] sm:$0xff]  ;;  %v930_v59 = vld [vmem:[#allocation8 + $0xf8] sm:$0xff] }
  0xbe   :  { %v936_v26 = vld [vmem:[#allocation8 + $0x128] sm:$0xff] }
  0xbf   :  { %2900 = vmatpush1.bf16.msra.mxu1 %v2899_v13  ;;  %v2919_v13 = vpack.c.bf16 %v303_v6, %v291_v5  ;;  %v934_v5 = vld [vmem:[#allocation8 + $0x118] sm:$0xff] }
  0xc0   :  { %2862 = vmatpush1.bf16.msra.mxu0 %v2861_v46  ;;  %2902 = vmatprep.subr.bf16.mxu1 %v2901_v16  ;;  %v2882_v46 = vpack.c.bf16 %v325_v37, %v313_v36  ;;  %v2921_v16 = vpack.c.bf16 %v328_v8, %v316_v7  ;;  %v931_v36 = vld [vmem:[#allocation8 + $0x100] sm:$0xff]  ;;  %v938_v6 = vld [vmem:[#allocation8 + $0x138] sm:$0xff] }
  0xc1   :  { %2864 = vmatprep.subr.bf16.mxu0 %v2863_v47  ;;  %v2927_v47 = vpack.c.bf16 %v904_v40, %v900_v39  ;;  %v935_v37 = vld [vmem:[#allocation8 + $0x120] sm:$0xff]  ;;  %v940_v39 = vld [vmem:[#allocation8 + $0x148] sm:$0xff] }
  0xc2   :  { %v944_v40 = vld [vmem:[#allocation8 + $0x168] sm:$0xff] }
  0xc3   :  { %2904 = vmatpush1.bf16.msra.mxu1 %v2903_v24  ;;  %v2924_v24 = vpack.c.bf16 %v327_v31, %v315_v17  ;;  %v946_v17 = vld [vmem:[#allocation8 + $0x178] sm:$0xff] }
  0xc4   :  { %2866 = vmatpush1.bf16.msra.mxu0 %v2865_v60  ;;  %2906 = vmatprep.subr.bf16.mxu1 %v2905_v27  ;;  %v2929_v60 = vpack.c.bf16 %v903_v49, %v899_v48  ;;  %v3305_v27 = vpack.c.bf16 %v906_v19, %v902_v18  ;;  %v939_v48 = vld [vmem:[#allocation8 + $0x140] sm:$0xff] }
  0xc5   :  { %2868 = vmatprep.subr.bf16.mxu0 %v2867_v61  ;;  %v2931_v61 = vpack.c.bf16 %v912_v52, %v908_v51  ;;  %v943_v49 = vld [vmem:[#allocation8 + $0x160] sm:$0xff]  ;;  %v948_v51 = vld [vmem:[#allocation8 + $0x188] sm:$0xff] }
  0xc6   :  { %v952_v52 = vld [vmem:[#allocation8 + $0x1a8] sm:$0xff]  ;;  %v963_v19 = vld [vmem:[#allocation8 + $0x200] sm:$0xff] }
  0xc7   :  { %2908 = vmatpush1.bf16.msra.mxu1 %v2907_v38  ;;  %v3307_v38 = vpack.c.bf16 %v905_v29, %v901_v28  ;;  %v954_v28 = vld [vmem:[#allocation8 + $0x1b8] sm:$0xff] }
  0xc8   :  { %2870 = vmatpush1.bf16.msra.mxu0 %v2869_v9  ;;  %2910 = vmatprep.subr.bf16.mxu1 %v2909_v41  ;;  %v2933_v9 = vpack.c.bf16 %v911_v63, %v907_v62  ;;  %v3309_v41 = vpack.c.bf16 %v914_v32, %v910_v30  ;;  %v951_v62 = vld [vmem:[#allocation8 + $0x1a0] sm:$0xff]  ;;  %v3315_v63 = vpack.c.bf16 %v921_v56, %v917_v55  ;;  %v970_v55 = vld [vmem:[#allocation8 + $0x238] sm:$0xff] }
  0xc9   :  { %2872 = vmatprep.subr.bf16.mxu0 %v2871_v10  ;;  %v2935_v10 = vpack.c.bf16 %v920_v2, %v916_v1  ;;  %v960_v1 = vld [vmem:[#allocation8 + $0x1e8] sm:$0xff]  ;;  %v925_v2 = vld [vmem:[#allocation8 + $0xd0] sm:$0xff]  ;;  %v971_v32 = vld [vmem:[#allocation8 + $0x240] sm:$0xff] }
  0xcb   :  { %2912 = vmatpush1.bf16.msra.mxu1 %v2911_v50  ;;  %v3311_v50 = vpack.c.bf16 %v913_v43, %v909_v42  ;;  %v962_v42 = vld [vmem:[#allocation8 + $0x1f8] sm:$0xff] }
  0xcc   :  { %2874 = vmatpush1.bf16.msra.mxu0 %v2873_v20  ;;  %2914 = vmatprep.subr.bf16.mxu1 %v2913_v54  ;;  %v2937_v20 = vpack.c.bf16 %v919_v12, %v915_v11  ;;  %v3313_v54 = vpack.c.bf16 %v922_v45, %v918_v44  ;;  %v964_v12 = vld [vmem:[#allocation8 + $0x208] sm:$0xff]  ;;  %v979_v45 = vld [vmem:[#allocation8 + $0x280] sm:$0xff] }
  0xcd   :  { %2876 = vmatprep.subr.bf16.mxu0 %v2875_v21  ;;  %v2939_v21 = vpack.c.bf16 %v928_v15, %v924_v14  ;;  %v933_v14 = vld [vmem:[#allocation8 + $0x110] sm:$0xff] }
  0xce   :  { %v937_v15 = vld [vmem:[#allocation8 + $0x130] sm:$0xff] }
  0xcf   :  { %2916 = vmatpush1.bf16.msra.mxu1 %v2915_v0  ;;  %v956_v0 = vld [vmem:[#allocation8 + $0x1c8] sm:$0xff] }
  0xd0   :  { %2878 = vmatpush1.bf16.msra.mxu0 %v2877_v33  ;;  %2918 = vmatprep.subr.bf16.mxu1 %v2917_v4  ;;  %v2941_v33 = vpack.c.bf16 %v927_v23, %v923_v22  ;;  %v929_v4 = vld [vmem:[#allocation8 + $0xf0] sm:$0xff]  ;;  %v2955_v8 = vpack.c.bf16 %v960_v1, %v956_v0  ;;  %v972_v22 = vld [vmem:[#allocation8 + $0x248] sm:$0xff] }
  0xd1   :  { %2881 = vmatprep.subr.msk.bf16.mxu0 %vm3998_vm3, %v2879_v35  ;;  %v2943_v35 = vpack.c.bf16 %v936_v26, %v932_v25  ;;  %v3319_v11 = vpack.c.bf16 %v929_v4, %v925_v2  ;;  %v976_v23 = vld [vmem:[#allocation8 + $0x268] sm:$0xff]  ;;  %v941_v25 = vld [vmem:[#allocation8 + $0x150] sm:$0xff]  ;;  %v978_v2 = vld [vmem:[#allocation8 + $0x278] sm:$0xff] }
  0xd2   :  { %v945_v26 = vld [vmem:[#allocation8 + $0x170] sm:$0xff]  ;;  %v2963_v30 = vpack.c.bf16 %v976_v23, %v972_v22 }
  0xd3   :  { %2920 = vmatpush1.bf16.msra.mxu1 %v2919_v13  ;;  %v3321_v13 = vpack.c.bf16 %v938_v6, %v934_v5  ;;  %v965_v0 = vld [vmem:[#allocation8 + $0x210] sm:$0xff]  ;;  %v995_v6 = vld [vmem:[#allocation8 + $0x300] sm:$0xff] }
  0xd4   :  { %2884 = vmatpush1.bf16.msk.msra.mxu0 %vm3998_vm3, %v2882_v46  ;;  %2923 = vmatprep.subr.msk.bf16.mxu1 %vm3998_vm3, %v2921_v16  ;;  %v2945_v46 = vpack.c.bf16 %v935_v37, %v931_v36  ;;  %v942_v16 = vld [vmem:[#allocation8 + $0x158] sm:$0xff]  ;;  %v980_v36 = vld [vmem:[#allocation8 + $0x288] sm:$0xff]  ;;  %v969_v1 = vld [vmem:[#allocation8 + $0x230] sm:$0xff] }
  0xd5   :  { %2928 = vmatprep.subr.bf16.mxu0 %v2927_v47  ;;  %v2947_v47 = vpack.c.bf16 %v944_v40, %v940_v39  ;;  %v984_v37 = vld [vmem:[#allocation8 + $0x2a8] sm:$0xff]  ;;  %v949_v39 = vld [vmem:[#allocation8 + $0x190] sm:$0xff] }
  0xd6   :  { %v953_v40 = vld [vmem:[#allocation8 + $0x1b0] sm:$0xff]  ;;  %v2967_v44 = vpack.c.bf16 %v984_v37, %v980_v36 }
  0xd7   :  { %810 = vmatmul.mubr.f32.vlgmr.msra.gmra.mrb[8].mxu0 %v4006_v53  ;;  %2926 = vmatpush1.bf16.msk.msra.mxu1 %vm3998_vm3, %v2924_v24  ;;  %v3325_v24 = vpack.c.bf16 %v946_v17, %v942_v16  ;;  %v1003_v17 = vld [vmem:[#allocation8 + $0x340] sm:$0xff]  ;;  %v981_v22 = vld [vmem:[#allocation8 + $0x290] sm:$0xff] }
  0xd8   :  { %2930 = vmatpush1.bf16.msra.mxu0 %v2929_v60  ;;  %2662 = vmatprep.mubr.msk.f32.mxu0 %vm393_vm0, %v4008_v57  ;;  %v2949_v60 = vpack.c.bf16 %v943_v49, %v939_v48  ;;  %v988_v48 = vld [vmem:[#allocation8 + $0x2c8] sm:$0xff]  ;;  %v985_v23 = vld [vmem:[#allocation8 + $0x2b0] sm:$0xff] }
  0xd9   :  { %2932 = vmatprep.subr.bf16.mxu0 %v2931_v61  ;;  %3306 = vmatprep.subr.bf16.mxu1 %v3305_v27  ;;  %v947_v61 = vld [vmem:[#allocation8 + $0x180] sm:$0xff]  ;;  %v950_v27 = vld [vmem:[#allocation8 + $0x198] sm:$0xff]  ;;  %v992_v49 = vld [vmem:[#allocation8 + $0x2e8] sm:$0xff] }
  0xda   :  { %887 = vmatmul.mubr.f32.vlgmr.msra.gmra.mrb[8].mxu1 %v4006_v53  ;;  %v2951_v53 = vpack.c.bf16 %v952_v52, %v948_v51  ;;  %v2953_v7 = vpack.c.bf16 %v951_v62, %v947_v61  ;;  %v957_v51 = vld [vmem:[#allocation8 + $0x1d0] sm:$0xff]  ;;  %v996_v61 = vld [vmem:[#allocation8 + $0x308] sm:$0xff] }
  0xdb   :  { %816 = vmatmul.mubr.f32.gmra.mrb[10].mxu0 %v4013_v3  ;;  %3308 = vmatpush1.bf16.msra.mxu1 %v3307_v38  ;;  %v3329_v38 = vpack.c.bf16 %v954_v28, %v950_v27  ;;  %v961_v52 = vld [vmem:[#allocation8 + $0x1f0] sm:$0xff]  ;;  %v1000_v62 = vld [vmem:[#allocation8 + $0x328] sm:$0xff]  ;;  %v1011_v28 = vld [vmem:[#allocation8 + $0x380] sm:$0xff] }
  0xdc   :  { %2934 = vmatpush1.bf16.msra.mxu0 %v2933_v9  ;;  %2666 = vmatprep.mubr.msk.f32.mxu1 %vm393_vm0, %v4008_v57  ;;  %v3317_v57 = vpack.c.bf16 %v930_v59, %v926_v58  ;;  %v955_v9 = vld [vmem:[#allocation8 + $0x1c0] sm:$0xff]  ;;  %v2971_v58 = vpack.c.bf16 %v992_v49, %v988_v48  ;;  %v2975_v5 = vpack.c.bf16 %v1000_v62, %v996_v61  ;;  %v989_v36 = vld [vmem:[#allocation8 + $0x2d0] sm:$0xff] }
  0xdd   :  { %2936 = vmatprep.subr.bf16.mxu0 %v2935_v10  ;;  %3310 = vmatprep.subr.bf16.mxu1 %v3309_v41  ;;  %v959_v10 = vld [vmem:[#allocation8 + $0x1e0] sm:$0xff]  ;;  %v958_v41 = vld [vmem:[#allocation8 + $0x1d8] sm:$0xff]  ;;  %v993_v37 = vld [vmem:[#allocation8 + $0x2f0] sm:$0xff] }
  0xde   :  { %893 = vmatmul.mubr.f32.gmra.mrb[10].mxu1 %v4013_v3  ;;  %v968_v3 = vld [vmem:[#allocation8 + $0x228] sm:$0xff]  ;;  %v2957_v31 = vpack.c.bf16 %v959_v10, %v955_v9  ;;  %v987_v59 = vld [vmem:[#allocation8 + $0x2c0] sm:$0xff]  ;;  %v997_v48 = vld [vmem:[#allocation8 + $0x310] sm:$0xff] }
  0xdf   :  { %3312 = vmatpush1.bf16.msra.mxu1 %v3311_v50  ;;  %v2959_v18 = vpack.c.bf16 %v968_v3, %v964_v12  ;;  %v3333_v50 = vpack.c.bf16 %v962_v42, %v958_v41  ;;  %v1004_v9 = vld [vmem:[#allocation8 + $0x348] sm:$0xff]  ;;  %v973_v12 = vld [vmem:[#allocation8 + $0x250] sm:$0xff]  ;;  %v1019_v42 = vld [vmem:[#allocation8 + $0x3c0] sm:$0xff] }
  0xe0   :  { %2938 = vmatpush1.bf16.msra.mxu0 %v2937_v20  ;;  %3314 = vmatprep.subr.bf16.mxu1 %v3313_v54  ;;  %v967_v20 = vld [vmem:[#allocation8 + $0x220] sm:$0xff]  ;;  %v966_v54 = vld [vmem:[#allocation8 + $0x218] sm:$0xff]  ;;  %v1008_v10 = vld [vmem:[#allocation8 + $0x368] sm:$0xff] }
  0xe1   :  { %2940 = vmatprep.subr.bf16.mxu0 %v2939_v21  ;;  %v3323_v21 = vpack.c.bf16 %v937_v15, %v933_v14  ;;  %v2961_v29 = vpack.c.bf16 %v967_v20, %v963_v19  ;;  %v977_v3 = vld [vmem:[#allocation8 + $0x270] sm:$0xff]  ;;  %v986_v14 = vld [vmem:[#allocation8 + $0x2b8] sm:$0xff]  ;;  %v2979_v16 = vpack.c.bf16 %v1008_v10, %v1004_v9  ;;  %v1012_v19 = vld [vmem:[#allocation8 + $0x388] sm:$0xff] }
  0xe2   :  { %v1016_v20 = vld [vmem:[#allocation8 + $0x3a8] sm:$0xff]  ;;  %v1001_v49 = vld [vmem:[#allocation8 + $0x330] sm:$0xff] }
  0xe3   :  { %3316 = vmatpush1.bf16.msra.mxu1 %v3315_v63  ;;  %v3337_v63 = vpack.c.bf16 %v970_v55, %v966_v54  ;;  %v2983_v27 = vpack.c.bf16 %v1016_v20, %v1012_v19  ;;  %v3355_v55 = vpack.c.bf16 %v1001_v49, %v997_v48  ;;  %v1033_v19 = vld [vmem:[#allocation8 + $0x430] sm:$0xff]  ;;  %v1036_v20 = vld [vmem:[#allocation8 + $0x448] sm:$0xff]  ;;  %v1047_v48 = vld [vmem:[#allocation8 + $0x4a0] sm:$0xff] }
  0xe4   :  { %2942 = vmatpush1.bf16.msra.mxu0 %v2941_v33  ;;  %3318 = vmatprep.subr.bf16.mxu1 %v3317_v57  ;;  %v975_v33 = vld [vmem:[#allocation8 + $0x260] sm:$0xff]  ;;  %v974_v57 = vld [vmem:[#allocation8 + $0x258] sm:$0xff] }
  0xe5   :  { %2944 = vmatprep.subr.bf16.mxu0 %v2943_v35  ;;  %v3327_v35 = vpack.c.bf16 %v945_v26, %v941_v25  ;;  %v2965_v43 = vpack.c.bf16 %v975_v33, %v971_v32  ;;  %v994_v25 = vld [vmem:[#allocation8 + $0x2f8] sm:$0xff]  ;;  %v1020_v32 = vld [vmem:[#allocation8 + $0x3c8] sm:$0xff] }
  0xe6   :  { %v1024_v33 = vld [vmem:[#allocation8 + $0x3e8] sm:$0xff] }
  0xe7   :  { %3320 = vmatpush1.bf16.msra.mxu1 %v3319_v11  ;;  %v3341_v11 = vpack.c.bf16 %v978_v2, %v974_v57  ;;  %v2987_v41 = vpack.c.bf16 %v1024_v33, %v1020_v32  ;;  %v1026_v57 = vld [vmem:[#allocation8 + $0x3f8] sm:$0xff] }
  0xe8   :  { %2946 = vmatpush1.bf16.msra.mxu0 %v2945_v46  ;;  %3322 = vmatprep.subr.bf16.mxu1 %v3321_v13  ;;  %v983_v46 = vld [vmem:[#allocation8 + $0x2a0] sm:$0xff]  ;;  %v982_v13 = vld [vmem:[#allocation8 + $0x298] sm:$0xff] }
  0xe9   :  { %2948 = vmatprep.subr.bf16.mxu0 %v2947_v47  ;;  %v3331_v47 = vpack.c.bf16 %v953_v40, %v949_v39  ;;  %v2969_v56 = vpack.c.bf16 %v983_v46, %v979_v45  ;;  %v1002_v39 = vld [vmem:[#allocation8 + $0x338] sm:$0xff]  ;;  %v1028_v45 = vld [vmem:[#allocation8 + $0x408] sm:$0xff] }
  0xea   :  { %v1032_v46 = vld [vmem:[#allocation8 + $0x428] sm:$0xff] }
  0xeb   :  { %3324 = vmatpush1.bf16.msra.mxu1 %v3323_v21  ;;  %v3345_v21 = vpack.c.bf16 %v986_v14, %v982_v13  ;;  %v2991_v54 = vpack.c.bf16 %v1032_v46, %v1028_v45  ;;  %v4069_v13 = vld [vmem:[#allocation7] sm:$0xff] }
  0xec   :  { %2950 = vmatpush1.bf16.msra.mxu0 %v2949_v60  ;;  %3326 = vmatprep.subr.bf16.mxu1 %v3325_v24  ;;  %v991_v60 = vld [vmem:[#allocation8 + $0x2e0] sm:$0xff]  ;;  %v990_v24 = vld [vmem:[#allocation8 + $0x2d8] sm:$0xff] }
  0xed   :  { %2952 = vmatprep.subr.bf16.mxu0 %v2951_v53  ;;  %v3335_v53 = vpack.c.bf16 %v961_v52, %v957_v51  ;;  %v2973_v4 = vpack.c.bf16 %v991_v60, %v987_v59  ;;  %v1010_v51 = vld [vmem:[#allocation8 + $0x378] sm:$0xff]  ;;  %v1009_v59 = vld [vmem:[#allocation8 + $0x370] sm:$0xff] }
  0xee   :  { %v1014_v60 = vld [vmem:[#allocation8 + $0x398] sm:$0xff] }
  0xef   :  { %3328 = vmatpush1.bf16.msra.mxu1 %v3327_v35  ;;  %v3349_v35 = vpack.c.bf16 %v994_v25, %v990_v24  ;;  %v1042_v24 = vld [vmem:[#allocation8 + $0x478] sm:$0xff] }
  0xf0   :  { %2954 = vmatpush1.bf16.msra.mxu0 %v2953_v7  ;;  %3330 = vmatprep.subr.bf16.mxu1 %v3329_v38  ;;  %v999_v7 = vld [vmem:[#allocation8 + $0x320] sm:$0xff]  ;;  %v998_v38 = vld [vmem:[#allocation8 + $0x318] sm:$0xff] }
  0xf1   :  { %2956 = vmatprep.subr.bf16.mxu0 %v2955_v8  ;;  %v3339_v8 = vpack.c.bf16 %v969_v1, %v965_v0  ;;  %v2977_v15 = vpack.c.bf16 %v999_v7, %v995_v6  ;;  %v1017_v0 = vld [vmem:[#allocation8 + $0x3b0] sm:$0xff]  ;;  %v1022_v1 = vld [vmem:[#allocation8 + $0x3d8] sm:$0xff] }
  0xf2   :  { %v1025_v6 = vld [vmem:[#allocation8 + $0x3f0] sm:$0xff]  ;;  %v1030_v7 = vld [vmem:[#allocation8 + $0x418] sm:$0xff] }
  0xf3   :  { %3332 = vmatpush1.bf16.msra.mxu1 %v3331_v47  ;;  %v3353_v47 = vpack.c.bf16 %v1002_v39, %v998_v38  ;;  %v1044_v38 = vld [vmem:[#allocation8 + $0x488] sm:$0xff] }
  0xf4   :  { %2958 = vmatpush1.bf16.msra.mxu0 %v2957_v31  ;;  %3334 = vmatprep.subr.bf16.mxu1 %v3333_v50  ;;  %v1007_v31 = vld [vmem:[#allocation8 + $0x360] sm:$0xff]  ;;  %v1006_v50 = vld [vmem:[#allocation8 + $0x358] sm:$0xff]  ;;  %v1048_v39 = vld [vmem:[#allocation8 + $0x4a8] sm:$0xff] }
  0xf5   :  { %2960 = vmatprep.subr.bf16.mxu0 %v2959_v18  ;;  %v3343_v18 = vpack.c.bf16 %v977_v3, %v973_v12  ;;  %v2981_v26 = vpack.c.bf16 %v1007_v31, %v1003_v17  ;;  %v1031_v17 = vld [vmem:[#allocation8 + $0x420] sm:$0xff] }
  0xf7   :  { %3336 = vmatpush1.bf16.msra.mxu1 %v3335_v53  ;;  %v1018_v53 = vld [vmem:[#allocation8 + $0x3b8] sm:$0xff] }
  0xf8   :  { %2962 = vmatpush1.bf16.msra.mxu0 %v2961_v29  ;;  %3338 = vmatprep.subr.bf16.mxu1 %v3337_v63  ;;  %v1015_v29 = vld [vmem:[#allocation8 + $0x3a0] sm:$0xff]  ;;  %v3361_v62 = vpack.c.bf16 %v1018_v53, %v1014_v60  ;;  %v1013_v63 = vld [vmem:[#allocation8 + $0x390] sm:$0xff] }
  0xf9   :  { %2964 = vmatprep.subr.bf16.mxu0 %v2963_v30  ;;  %v3347_v30 = vpack.c.bf16 %v985_v23, %v981_v22  ;;  %v2985_v40 = vpack.c.bf16 %v1015_v29, %v1011_v28  ;;  %v3363_v2 = vpack.c.bf16 %v1017_v0, %v1013_v63  ;;  %v1040_v22 = vld [vmem:[#allocation8 + $0x468] sm:$0xff]  ;;  %v1038_v23 = vld [vmem:[#allocation8 + $0x458] sm:$0xff]  ;;  %v1035_v29 = vld [vmem:[#allocation8 + $0x440] sm:$0xff] }
  0xfa   :  { %v2995_v33 = vpack.c.bf16 %v1040_v22, %v1036_v20  ;;  %v1055_v63 = vld [vmem:[#allocation8 + $0x4e0] sm:$0xff]  ;;  %v1068_v20 = vld [vmem:[#allocation8 + $0x548] sm:$0xff] }
  0xfb   :  { %3340 = vmatpush1.bf16.msra.mxu1 %v3339_v8  ;;  %v1034_v8 = vld [vmem:[#allocation8 + $0x438] sm:$0xff]  ;;  %v1072_v22 = vld [vmem:[#allocation8 + $0x568] sm:$0xff] }
  0xfc   :  { %2966 = vmatpush1.bf16.msra.mxu0 %v2965_v43  ;;  %3342 = vmatprep.subr.bf16.mxu1 %v3341_v11  ;;  %v1023_v43 = vld [vmem:[#allocation8 + $0x3e0] sm:$0xff]  ;;  %v3369_v10 = vpack.c.bf16 %v1034_v8, %v1030_v7  ;;  %v333_v11 = vlaneseq  ;;  %v1066_v7 = vld [vmem:[#allocation8 + $0x538] sm:$0xff] }
  0xfd   :  { %2968 = vmatprep.subr.bf16.mxu0 %v2967_v44  ;;  %v3351_v44 = vpack.c.bf16 %v993_v37, %v989_v36  ;;  %v2989_v52 = vpack.c.bf16 %v1023_v43, %v1019_v42  ;;  %v1037_v36 = vld [vmem:[#allocation8 + $0x450] sm:$0xff] }
  0xfe   :  { %v4064_v12 = vshrl.u32 %v333_v11, 7  ;;  %v1041_v37 = vld [vmem:[#allocation8 + $0x470] sm:$0xff]  ;;  %v1059_v11 = vld [vmem:[#allocation8 + $0x500] sm:$0xff] }
  0xff   :  { %3344 = vmatpush1.bf16.msra.mxu1 %v3343_v18  ;;  %v1029_v18 = vld [vmem:[#allocation8 + $0x410] sm:$0xff]  ;;  %v3375_v46 = vpack.c.bf16 %v1041_v37, %v1037_v36  ;;  %v1076_v37 = vld [vmem:[#allocation8 + $0x588] sm:$0xff] }
 0x100   :  { %2970 = vmatpush1.bf16.msra.mxu0 %v2969_v56  ;;  %3346 = vmatprep.subr.bf16.mxu1 %v3345_v21  ;;  %v3357_v56 = vpack.c.bf16 %v1010_v51, %v1006_v50  ;;  %v4067_v3 = vsub.s32 1, %v4064_v12  ;;  %v4072_v14 = vsub.s32 0, %v4064_v12  ;;  %v3371_v28 = vpack.c.bf16 %v1033_v19, %v1029_v18  ;;  %v1061_v18 = vld [vmem:[#allocation8 + $0x510] sm:$0xff] }
 0x101   :  { %2972 = vmatprep.subr.bf16.mxu0 %v2971_v58  ;;  %v1005_v58 = vld [vmem:[#allocation8 + $0x350] sm:$0xff]  ;;  %v2999_v50 = vpack.c.bf16 %v1048_v39, %v1044_v38  ;;  %v4079_v60 = vsub.s32 3, %v4064_v12  ;;  %v1080_v39 = vld [vmem:[#allocation8 + $0x5a8] sm:$0xff] }
 0x102   :  { %v3359_v61 = vpack.c.bf16 %v1009_v59, %v1005_v58  ;;  %v336_v31 = vrot.slane %v4069_v13, %v4072_v14  ;;  %v1054_v58 = vld [vmem:[#allocation8 + $0x4d8] sm:$0xff]  ;;  %v1065_v19 = vld [vmem:[#allocation8 + $0x530] sm:$0xff] }
 0x103   :  { %3348 = vmatpush1.bf16.msra.mxu1 %v3347_v30  ;;  %v1039_v30 = vld [vmem:[#allocation8 + $0x460] sm:$0xff]  ;;  %v1058_v59 = vld [vmem:[#allocation8 + $0x4f8] sm:$0xff]  ;;  %v4083_v8 = vrot.slane %v4069_v13, %v4079_v60  ;;  %v1073_v36 = vld [vmem:[#allocation8 + $0x570] sm:$0xff] }
 0x104   :  { %2974 = vmatpush1.bf16.msra.mxu0 %v2973_v4  ;;  %3350 = vmatprep.subr.bf16.mxu1 %v3349_v35  ;;  %v3365_v4 = vpack.c.bf16 %v1026_v57, %v1022_v1  ;;  %v3373_v35 = vpack.c.bf16 %v1042_v24, %v1038_v23  ;;  %v2997_v45 = vpack.c.bf16 %v1039_v30, %v1035_v29  ;;  %v1053_v57 = vld [vmem:[#allocation8 + $0x4d0] sm:$0xff]  ;;  %v1070_v23 = vld [vmem:[#allocation8 + $0x558] sm:$0xff]  ;;  %v1071_v29 = vld [vmem:[#allocation8 + $0x560] sm:$0xff] }
 0x105   :  { %2976 = vmatprep.subr.bf16.mxu0 %v2975_v5  ;;  %v1021_v5 = vld [vmem:[#allocation8 + $0x3d0] sm:$0xff]  ;;  %v3381_v1 = vpack.c.bf16 %v1058_v59, %v1054_v58  ;;  %v1074_v24 = vld [vmem:[#allocation8 + $0x578] sm:$0xff]  ;;  %v1083_v58 = vld [vmem:[#allocation8 + $0x5c0] sm:$0xff] }
 0x106   :  { %v3367_v9 = vpack.c.bf16 %v1025_v6, %v1021_v5  ;;  %v1064_v5 = vld [vmem:[#allocation8 + $0x528] sm:$0xff]  ;;  %v1062_v6 = vld [vmem:[#allocation8 + $0x518] sm:$0xff]  ;;  %v1087_v59 = vld [vmem:[#allocation8 + $0x5e0] sm:$0xff] }
 0x107   :  { %3352 = vmatpush1.bf16.msra.mxu1 %v3351_v44 }
 0x108   :  { %2978 = vmatpush1.bf16.msra.mxu0 %v2977_v15  ;;  %3354 = vmatprep.subr.bf16.mxu1 %v3353_v47  ;;  %v340_v15 = vrot.slane %v4069_v13, %v4067_v3  ;;  %v1043_v47 = vld [vmem:[#allocation8 + $0x480] sm:$0xff] }
 0x109   :  { %2980 = vmatprep.subr.bf16.mxu0 %v2979_v16  ;;  %v1027_v16 = vld [vmem:[#allocation8 + $0x400] sm:$0xff]  ;;  %v3001_v53 = vpack.c.bf16 %v1047_v48, %v1043_v47  ;;  %v1077_v48 = vld [vmem:[#allocation8 + $0x590] sm:$0xff] }
 0x10b   :  { %3356 = vmatpush1.bf16.msra.mxu1 %v3355_v55  ;;  %v1052_v55 = vld [vmem:[#allocation8 + $0x4c8] sm:$0xff] }
 0x10c   :  { %2982 = vmatpush1.bf16.msra.mxu0 %v2981_v26  ;;  %3358 = vmatprep.subr.bf16.mxu1 %v3357_v56  ;;  %v1056_v56 = vld [vmem:[#allocation8 + $0x4e8] sm:$0xff] }
 0x10d   :  { %2984 = vmatprep.subr.bf16.mxu0 %v2983_v27  ;;  %v2993_v27 = vpack.c.bf16 %v1031_v17, %v1027_v16  ;;  %v3003_v0 = vpack.c.bf16 %v1056_v56, %v1052_v55 }
 0x10f   :  { %3360 = vmatpush1.bf16.msra.mxu1 %v3359_v61 }
 0x110   :  { %2986 = vmatpush1.bf16.msra.mxu0 %v2985_v40  ;;  %3362 = vmatprep.subr.bf16.mxu1 %v3361_v62  ;;  %v1046_v40 = vld [vmem:[#allocation8 + $0x498] sm:$0xff]  ;;  %v1051_v62 = vld [vmem:[#allocation8 + $0x4c0] sm:$0xff] }
 0x111   :  { %2988 = vmatprep.subr.bf16.mxu0 %v2987_v41  ;;  %v1050_v41 = vld [vmem:[#allocation8 + $0x4b8] sm:$0xff] }
 0x112   :  { %v3377_v51 = vpack.c.bf16 %v1050_v41, %v1046_v40  ;;  %v1078_v40 = vld [vmem:[#allocation8 + $0x598] sm:$0xff] }
 0x113   :  { %3364 = vmatpush1.bf16.msra.mxu1 %v3363_v2  ;;  %v1057_v2 = vld [vmem:[#allocation8 + $0x4f0] sm:$0xff]  ;;  %v1082_v41 = vld [vmem:[#allocation8 + $0x5b8] sm:$0xff] }
 0x114   :  { %2990 = vmatpush1.bf16.msra.mxu0 %v2989_v52  ;;  %3366 = vmatprep.subr.bf16.mxu1 %v3365_v4  ;;  %v1045_v52 = vld [vmem:[#allocation8 + $0x490] sm:$0xff]  ;;  %v1060_v4 = vld [vmem:[#allocation8 + $0x508] sm:$0xff]  ;;  %v3393_v47 = vpack.c.bf16 %v1082_v41, %v1078_v40 }
 0x115   :  { %2992 = vmatprep.subr.bf16.mxu0 %v2991_v54  ;;  %v1049_v54 = vld [vmem:[#allocation8 + $0x4b0] sm:$0xff]  ;;  %v3007_v17 = vpack.c.bf16 %v1064_v5, %v1060_v4  ;;  %v3021_v4 = vpack.c.bf16 %v1087_v59, %v1083_v58 }
 0x116   :  { %v3379_v61 = vpack.c.bf16 %v1049_v54, %v1045_v52  ;;  %v1086_v52 = vld [vmem:[#allocation8 + $0x5d8] sm:$0xff]  ;;  %v1117_v58 = vld [vmem:[#allocation8 + $0x6d0] sm:$0xff] }
 0x117   :  { %3368 = vmatpush1.bf16.msra.mxu1 %v3367_v9  ;;  %v3005_v9 = vpack.c.bf16 %v1055_v63, %v1051_v62  ;;  %v1090_v54 = vld [vmem:[#allocation8 + $0x5f8] sm:$0xff]  ;;  %v1085_v62 = vld [vmem:[#allocation8 + $0x5d0] sm:$0xff] }
 0x118   :  { %3370 = vmatprep.subr.bf16.mxu1 %v3369_v10  ;;  %v3383_v10 = vpack.c.bf16 %v1057_v2, %v1053_v57  ;;  %v1089_v63 = vld [vmem:[#allocation8 + $0x5f0] sm:$0xff]  ;;  %v1094_v57 = vld [vmem:[#allocation8 + $0x618] sm:$0xff] }
 0x119   :  { %v1098_v2 = vld [vmem:[#allocation8 + $0x638] sm:$0xff]  ;;  %v3399_v5 = vpack.c.bf16 %v1089_v63, %v1085_v62  ;;  %v1121_v59 = vld [vmem:[#allocation8 + $0x6f0] sm:$0xff] }
 0x11a   :  { %v1126_v62 = vld [vmem:[#allocation8 + $0x718] sm:$0xff] }
 0x11b   :  { %v1130_v63 = vld [vmem:[#allocation8 + $0x738] sm:$0xff] }
 0x15a   :  { %v503_v21 = vpop.f32.mrb[0].mxu0 }
 0x15b   :  { %v505_v25 = vpop.f32.mrb[1].mxu0  ;;  %v504_v32 = vadd.f32 %v503_v21, %v336_v31 }
 0x15c   :  { %v506_v26 = vadd.f32 %v505_v25, %v340_v15 }
 0x15d   :  { %v4085_v16 = vpop.f32.mrb[0].mxu1 }
 0x15e   :  { %1756 = vmatprep.mubr.f32.mxu0 %v506_v26  ;;  %2218 = vmatprep.mubr.f32.mxu1 %v506_v26  ;;  %v509_v42 = vpop.f32.mrb[2].mxu0  ;;  %v582_v21 = vpop.f32.mrb[1].mxu1 }
 0x15f   :  { %1757 = vmatmul.mubr.f32.vlgmr.msra.gmra.mrb[12].mxu0 %v504_v32  ;;  %2219 = vmatmul.mubr.f32.vlgmr.msra.gmra.mrb[12].mxu1 %v504_v32  ;;  %v510_v43 = vadd.f32 %v509_v42, %v336_v31  ;;  %v511_v44 = vpop.f32.mrb[3].mxu0  ;;  %v3385_v31 = vpack.c.bf16 %v1066_v7, %v1062_v6  ;;  %v583_v25 = vadd.f32 %v582_v21, %v4083_v8  ;;  %v1091_v6 = vld [vmem:[#allocation8 + $0x600] sm:$0xff] }
 0x160   :  { %2994 = vmatpush1.bf16.msra.mxu0 %v2993_v27  ;;  %3372 = vmatpush1.bf16.msra.mxu1 %v3371_v28  ;;  %v512_v49 = vadd.f32 %v511_v44, %v340_v15  ;;  %v1063_v15 = vld [vmem:[#allocation8 + $0x520] sm:$0xff]  ;;  %v3387_v27 = vpack.c.bf16 %v1065_v19, %v1061_v18  ;;  %v3011_v32 = vpack.c.bf16 %v1072_v22, %v1068_v20  ;;  %v1102_v18 = vld [vmem:[#allocation8 + $0x658] sm:$0xff] }
 0x161   :  { %2996 = vmatprep.subr.bf16.mxu0 %v2995_v33  ;;  %3374 = vmatprep.subr.bf16.mxu1 %v3373_v35  ;;  %v3009_v26 = vpack.c.bf16 %v1063_v15, %v1059_v11  ;;  %v1067_v28 = vld [vmem:[#allocation8 + $0x540] sm:$0xff]  ;;  %v4088_v30 = vpop.f32.mrb[2].mxu1  ;;  %v3389_v33 = vpack.c.bf16 %v1074_v24, %v1070_v23  ;;  %v1069_v35 = vld [vmem:[#allocation8 + $0x550] sm:$0xff]  ;;  %v1106_v19 = vld [vmem:[#allocation8 + $0x678] sm:$0xff] }
 0x162   :  { %1762 = vmatprep.mubr.f32.mxu0 %v512_v49  ;;  %2224 = vmatprep.mubr.f32.mxu1 %v512_v49  ;;  %v4090_v38 = vpop.f32.mrb[3].mxu1  ;;  %v3013_v42 = vpack.c.bf16 %v1071_v29, %v1067_v28  ;;  %v1075_v44 = vld [vmem:[#allocation8 + $0x580] sm:$0xff]  ;;  %v1081_v49 = vld [vmem:[#allocation8 + $0x5b0] sm:$0xff]  ;;  %v1108_v28 = vld [vmem:[#allocation8 + $0x688] sm:$0xff] }
 0x163   :  { %1763 = vmatmul.mubr.f32.gmra.mrb[14].mxu0 %v510_v43  ;;  %2225 = vmatmul.mubr.f32.gmra.mrb[14].mxu1 %v510_v43  ;;  %v3391_v43 = vpack.c.bf16 %v1073_v36, %v1069_v35  ;;  %v3395_v56 = vpack.c.bf16 %v1081_v49, %v1077_v48  ;;  %v1095_v7 = vld [vmem:[#allocation8 + $0x620] sm:$0xff]  ;;  %v1093_v11 = vld [vmem:[#allocation8 + $0x610] sm:$0xff]  ;;  %v1112_v29 = vld [vmem:[#allocation8 + $0x6a8] sm:$0xff] }
 0x164   :  { %2998 = vmatpush1.bf16.msra.mxu0 %v2997_v45  ;;  %3376 = vmatpush1.bf16.msra.mxu1 %v3375_v46  ;;  %v1079_v45 = vld [vmem:[#allocation8 + $0x5a0] sm:$0xff]  ;;  %v3015_v46 = vpack.c.bf16 %v1080_v39, %v1076_v37  ;;  %v1097_v15 = vld [vmem:[#allocation8 + $0x630] sm:$0xff]  ;;  %v3025_v20 = vpack.c.bf16 %v1095_v7, %v1091_v6  ;;  %v3031_v40 = vpack.c.bf16 %v1112_v29, %v1108_v28  ;;  %v1142_v28 = vld [vmem:[#allocation8 + $0x798] sm:$0xff] }
 0x165   :  { %3000 = vmatprep.subr.bf16.mxu0 %v2999_v50  ;;  %3378 = vmatprep.subr.bf16.mxu1 %v3377_v51  ;;  %v1084_v50 = vld [vmem:[#allocation8 + $0x5c8] sm:$0xff]  ;;  %v3017_v55 = vpack.c.bf16 %v1079_v45, %v1075_v44  ;;  %v3403_v21 = vpack.c.bf16 %v1097_v15, %v1093_v11  ;;  %v1099_v22 = vld [vmem:[#allocation8 + $0x640] sm:$0xff]  ;;  %v3417_v7 = vpack.c.bf16 %v1130_v63, %v1126_v62  ;;  %v1146_v29 = vld [vmem:[#allocation8 + $0x7b8] sm:$0xff] }
 0x166   :  { %1833 = vmatprep.mubr.f32.mxu0 %v583_v25  ;;  %2295 = vmatprep.mubr.f32.mxu1 %v583_v25  ;;  %v1088_v51 = vld [vmem:[#allocation8 + $0x5e8] sm:$0xff]  ;;  %v1103_v23 = vld [vmem:[#allocation8 + $0x660] sm:$0xff]  ;;  %v3405_v25 = vpack.c.bf16 %v1106_v19, %v1102_v18 }
 0x167   :  { %v3029_v35 = vpack.c.bf16 %v1103_v23, %v1099_v22  ;;  %v1107_v37 = vld [vmem:[#allocation8 + $0x680] sm:$0xff]  ;;  %v1116_v44 = vld [vmem:[#allocation8 + $0x6c8] sm:$0xff] }
 0x168   :  { %3002 = vmatpush1.bf16.msra.mxu0 %v3001_v53  ;;  %3380 = vmatpush1.bf16.msra.mxu1 %v3379_v61  ;;  %v3019_v53 = vpack.c.bf16 %v1088_v51, %v1084_v50  ;;  %v3397_v61 = vpack.c.bf16 %v1090_v54, %v1086_v52  ;;  %v1111_v39 = vld [vmem:[#allocation8 + $0x6a0] sm:$0xff]  ;;  %v1120_v45 = vld [vmem:[#allocation8 + $0x6e8] sm:$0xff] }
 0x169   :  { %3004 = vmatprep.subr.bf16.mxu0 %v3003_v0  ;;  %3382 = vmatprep.subr.bf16.mxu1 %v3381_v1  ;;  %v1092_v0 = vld [vmem:[#allocation8 + $0x608] sm:$0xff]  ;;  %v3033_v50 = vpack.c.bf16 %v1111_v39, %v1107_v37  ;;  %v1115_v52 = vld [vmem:[#allocation8 + $0x6c0] sm:$0xff] }
 0x16a   :  { %v1096_v1 = vld [vmem:[#allocation8 + $0x628] sm:$0xff]  ;;  %v1119_v54 = vld [vmem:[#allocation8 + $0x6e0] sm:$0xff] }
 0x16b   :  { %v1132_v11 = vld [vmem:[#allocation8 + $0x748] sm:$0xff] }
 0x16c   :  { %3006 = vmatpush1.bf16.msra.mxu0 %v3005_v9  ;;  %3384 = vmatpush1.bf16.msra.mxu1 %v3383_v10  ;;  %v3023_v9 = vpack.c.bf16 %v1096_v1, %v1092_v0  ;;  %v3401_v10 = vpack.c.bf16 %v1098_v2, %v1094_v57  ;;  %v3037_v57 = vpack.c.bf16 %v1119_v54, %v1115_v52  ;;  %v1136_v15 = vld [vmem:[#allocation8 + $0x768] sm:$0xff]  ;;  %v1147_v54 = vld [vmem:[#allocation8 + $0x7c0] sm:$0xff] }
 0x16d   :  { %3008 = vmatprep.subr.bf16.mxu0 %v3007_v17  ;;  %3386 = vmatprep.subr.bf16.mxu1 %v3385_v31  ;;  %v1100_v17 = vld [vmem:[#allocation8 + $0x648] sm:$0xff]  ;;  %v3415_v2 = vpack.c.bf16 %v1121_v59, %v1117_v58  ;;  %v3043_v22 = vpack.c.bf16 %v1136_v15, %v1132_v11 }
 0x16e   :  { %v1104_v31 = vld [vmem:[#allocation8 + $0x668] sm:$0xff] }
 0x16f   :  { %v3027_v24 = vpack.c.bf16 %v1104_v31, %v1100_v17  ;;  %v1134_v17 = vld [vmem:[#allocation8 + $0x758] sm:$0xff]  ;;  %v1156_v62 = vld [vmem:[#allocation8 + $0x808] sm:$0xff] }
 0x170   :  { %3010 = vmatpush1.bf16.msra.mxu0 %v3009_v26  ;;  %3388 = vmatpush1.bf16.msra.mxu1 %v3387_v27  ;;  %v1101_v26 = vld [vmem:[#allocation8 + $0x650] sm:$0xff]  ;;  %v1138_v31 = vld [vmem:[#allocation8 + $0x778] sm:$0xff] }
 0x171   :  { %3012 = vmatprep.subr.bf16.mxu0 %v3011_v32  ;;  %3390 = vmatprep.subr.bf16.mxu1 %v3389_v33  ;;  %v1105_v27 = vld [vmem:[#allocation8 + $0x670] sm:$0xff]  ;;  %v1110_v32 = vld [vmem:[#allocation8 + $0x698] sm:$0xff]  ;;  %v3421_v23 = vpack.c.bf16 %v1138_v31, %v1134_v17 }
 0x172   :  { %v1114_v33 = vld [vmem:[#allocation8 + $0x6b8] sm:$0xff]  ;;  %v3407_v36 = vpack.c.bf16 %v1105_v27, %v1101_v26  ;;  %v1140_v26 = vld [vmem:[#allocation8 + $0x788] sm:$0xff]  ;;  %v1157_v17 = vld [vmem:[#allocation8 + $0x810] sm:$0xff] }
 0x173   :  { %v3409_v41 = vpack.c.bf16 %v1114_v33, %v1110_v32  ;;  %v1144_v27 = vld [vmem:[#allocation8 + $0x7a8] sm:$0xff]  ;;  %v1161_v31 = vld [vmem:[#allocation8 + $0x830] sm:$0xff] }
 0x174   :  { %3014 = vmatpush1.bf16.msra.mxu0 %v3013_v42  ;;  %3392 = vmatpush1.bf16.msra.mxu1 %v3391_v43  ;;  %v1109_v42 = vld [vmem:[#allocation8 + $0x690] sm:$0xff]  ;;  %v3047_v39 = vpack.c.bf16 %v1144_v27, %v1140_v26  ;;  %v1163_v26 = vld [vmem:[#allocation8 + $0x840] sm:$0xff] }
 0x175   :  { %3016 = vmatprep.subr.bf16.mxu0 %v3015_v46  ;;  %3394 = vmatprep.subr.bf16.mxu1 %v3393_v47  ;;  %v1113_v43 = vld [vmem:[#allocation8 + $0x6b0] sm:$0xff]  ;;  %v1118_v46 = vld [vmem:[#allocation8 + $0x6d8] sm:$0xff]  ;;  %v1167_v27 = vld [vmem:[#allocation8 + $0x860] sm:$0xff] }
 0x176   :  { %v1122_v47 = vld [vmem:[#allocation8 + $0x6f8] sm:$0xff]  ;;  %v3411_v51 = vpack.c.bf16 %v1113_v43, %v1109_v42  ;;  %v1145_v42 = vld [vmem:[#allocation8 + $0x7b0] sm:$0xff]  ;;  %v1148_v43 = vld [vmem:[#allocation8 + $0x7c8] sm:$0xff] }
 0x178   :  { %3018 = vmatpush1.bf16.msra.mxu0 %v3017_v55  ;;  %3396 = vmatpush1.bf16.msra.mxu1 %v3395_v56  ;;  %v3035_v55 = vpack.c.bf16 %v1120_v45, %v1116_v44  ;;  %v3413_v56 = vpack.c.bf16 %v1122_v47, %v1118_v46  ;;  %v1152_v45 = vld [vmem:[#allocation8 + $0x7e8] sm:$0xff]  ;;  %v1150_v46 = vld [vmem:[#allocation8 + $0x7d8] sm:$0xff] }
 0x179   :  { %3020 = vmatprep.subr.bf16.mxu0 %v3019_v53  ;;  %3398 = vmatprep.subr.bf16.mxu1 %v3397_v61  ;;  %v1124_v53 = vld [vmem:[#allocation8 + $0x708] sm:$0xff]  ;;  %v1154_v47 = vld [vmem:[#allocation8 + $0x7f8] sm:$0xff]  ;;  %v3051_v58 = vpack.c.bf16 %v1152_v45, %v1148_v43  ;;  %v3061_v43 = vpack.c.bf16 %v1167_v27, %v1163_v26 }
 0x17a   :  { %v1128_v61 = vld [vmem:[#allocation8 + $0x728] sm:$0xff]  ;;  %v3429_v59 = vpack.c.bf16 %v1154_v47, %v1150_v46  ;;  %v1171_v46 = vld [vmem:[#allocation8 + $0x880] sm:$0xff] }
 0x17b   :  { %v3039_v6 = vpack.c.bf16 %v1128_v61, %v1124_v53  ;;  %v1149_v53 = vld [vmem:[#allocation8 + $0x7d0] sm:$0xff]  ;;  %v1175_v47 = vld [vmem:[#allocation8 + $0x8a0] sm:$0xff] }
 0x17c   :  { %3022 = vmatpush1.bf16.msra.mxu0 %v3021_v4  ;;  %3400 = vmatpush1.bf16.msra.mxu1 %v3399_v5  ;;  %v1123_v4 = vld [vmem:[#allocation8 + $0x700] sm:$0xff]  ;;  %v1153_v61 = vld [vmem:[#allocation8 + $0x7f0] sm:$0xff] }
 0x17d   :  { %3024 = vmatprep.subr.bf16.mxu0 %v3023_v9  ;;  %3402 = vmatprep.subr.bf16.mxu1 %v3401_v10  ;;  %v1127_v5 = vld [vmem:[#allocation8 + $0x720] sm:$0xff]  ;;  %v1125_v9 = vld [vmem:[#allocation8 + $0x710] sm:$0xff] }
 0x17e   :  { %v1129_v10 = vld [vmem:[#allocation8 + $0x730] sm:$0xff]  ;;  %v3041_v18 = vpack.c.bf16 %v1127_v5, %v1123_v4  ;;  %v1162_v4 = vld [vmem:[#allocation8 + $0x838] sm:$0xff] }
 0x17f   :  { %v3419_v19 = vpack.c.bf16 %v1129_v10, %v1125_v9  ;;  %v1155_v9 = vld [vmem:[#allocation8 + $0x800] sm:$0xff] }
 0x180   :  { %3026 = vmatpush1.bf16.msra.mxu0 %v3025_v20  ;;  %3404 = vmatpush1.bf16.msra.mxu1 %v3403_v21  ;;  %v1131_v20 = vld [vmem:[#allocation8 + $0x740] sm:$0xff] }
 0x181   :  { %3028 = vmatprep.subr.bf16.mxu0 %v3027_v24  ;;  %3406 = vmatprep.subr.bf16.mxu1 %v3405_v25  ;;  %v1135_v21 = vld [vmem:[#allocation8 + $0x760] sm:$0xff]  ;;  %v1133_v24 = vld [vmem:[#allocation8 + $0x750] sm:$0xff] }
 0x182   :  { %v4092_v48 = vpop.f32.mrb[4].mxu0  ;;  %v1137_v25 = vld [vmem:[#allocation8 + $0x770] sm:$0xff]  ;;  %v3045_v32 = vpack.c.bf16 %v1135_v21, %v1131_v20  ;;  %v1159_v10 = vld [vmem:[#allocation8 + $0x820] sm:$0xff]  ;;  %v1166_v20 = vld [vmem:[#allocation8 + $0x858] sm:$0xff] }
 0x183   :  { %v4094_v49 = vpop.f32.mrb[5].mxu0  ;;  %v3423_v33 = vpack.c.bf16 %v1137_v25, %v1133_v24  ;;  %v1170_v21 = vld [vmem:[#allocation8 + $0x878] sm:$0xff]  ;;  %v3057_v24 = vpack.c.bf16 %v1159_v10, %v1155_v9  ;;  %v3435_v25 = vpack.c.bf16 %v1161_v31, %v1157_v17  ;;  %v1191_v17 = vld [vmem:[#allocation8 + $0x920] sm:$0xff] }
 0x184   :  { %3030 = vmatpush1.bf16.msra.mxu0 %v3029_v35  ;;  %3408 = vmatpush1.bf16.msra.mxu1 %v3407_v36  ;;  %v1139_v35 = vld [vmem:[#allocation8 + $0x780] sm:$0xff]  ;;  %v1190_v9 = vld [vmem:[#allocation8 + $0x918] sm:$0xff] }
 0x185   :  { %3032 = vmatprep.subr.bf16.mxu0 %v3031_v40  ;;  %3410 = vmatprep.subr.bf16.mxu1 %v3409_v41  ;;  %v1143_v36 = vld [vmem:[#allocation8 + $0x7a0] sm:$0xff]  ;;  %v4100_v37 = vpop.f32.mrb[4].mxu1  ;;  %v3425_v40 = vpack.c.bf16 %v1146_v29, %v1142_v28  ;;  %v1141_v41 = vld [vmem:[#allocation8 + $0x790] sm:$0xff]  ;;  %v3437_v29 = vpack.c.bf16 %v1170_v21, %v1166_v20  ;;  %v1194_v10 = vld [vmem:[#allocation8 + $0x938] sm:$0xff] }
 0x186   :  { %v4096_v0 = vpop.f32.mrb[6].mxu0  ;;  %v4102_v44 = vpop.f32.mrb[5].mxu1  ;;  %v3427_v52 = vpack.c.bf16 %v1145_v42, %v1141_v41  ;;  %v589_v41 = vadd.f32 %v4090_v38, %v4083_v8  ;;  %v1180_v8 = vld [vmem:[#allocation8 + $0x8c8] sm:$0xff]  ;;  %v1193_v20 = vld [vmem:[#allocation8 + $0x930] sm:$0xff] }
 0x187   :  { %v4098_v1 = vpop.f32.mrb[7].mxu0  ;;  %v1184_v38 = vld [vmem:[#allocation8 + $0x8e8] sm:$0xff] }
 0x188   :  { %3034 = vmatpush1.bf16.msra.mxu0 %v3033_v50  ;;  %3412 = vmatpush1.bf16.msra.mxu1 %v3411_v51  ;;  %v4105_v50 = vsub.s32 2, %v4064_v12  ;;  %v3049_v51 = vpack.c.bf16 %v1143_v36, %v1139_v35  ;;  %v1172_v35 = vld [vmem:[#allocation8 + $0x888] sm:$0xff] }
 0x189   :  { %3036 = vmatprep.subr.bf16.mxu0 %v3035_v55  ;;  %3414 = vmatprep.subr.bf16.mxu1 %v3413_v56  ;;  %v1151_v55 = vld [vmem:[#allocation8 + $0x7e0] sm:$0xff]  ;;  %v4107_v56 = vpop.f32.mrb[6].mxu1  ;;  %v1176_v36 = vld [vmem:[#allocation8 + $0x8a8] sm:$0xff] }
 0x18a   :  { %v4109_v63 = vpop.f32.mrb[7].mxu1  ;;  %v344_v5 = vrot.slane %v4069_v13, %v4105_v50  ;;  %v1196_v21 = vld [vmem:[#allocation8 + $0x948] sm:$0xff] }
 0x18c   :  { %3038 = vmatpush1.bf16.msra.mxu0 %v3037_v57  ;;  %3416 = vmatpush1.bf16.msra.mxu1 %v3415_v2  ;;  %v1160_v57 = vld [vmem:[#allocation8 + $0x828] sm:$0xff]  ;;  %v1158_v2 = vld [vmem:[#allocation8 + $0x818] sm:$0xff]  ;;  %v587_v42 = vadd.f32 %v4088_v30, %v344_v5 }
 0x18d   :  { %3040 = vmatprep.subr.bf16.mxu0 %v3039_v6  ;;  %3418 = vmatprep.subr.bf16.mxu1 %v3417_v7  ;;  %v3053_v6 = vpack.c.bf16 %v1151_v55, %v1147_v54  ;;  %v3431_v7 = vpack.c.bf16 %v1153_v61, %v1149_v53  ;;  %v3055_v11 = vpack.c.bf16 %v1160_v57, %v1156_v62  ;;  %v1173_v54 = vld [vmem:[#allocation8 + $0x890] sm:$0xff]  ;;  %v1179_v61 = vld [vmem:[#allocation8 + $0x8c0] sm:$0xff] }
 0x18e   :  { %v3433_v15 = vpack.c.bf16 %v1162_v4, %v1158_v2  ;;  %v1177_v55 = vld [vmem:[#allocation8 + $0x8b0] sm:$0xff]  ;;  %v1183_v62 = vld [vmem:[#allocation8 + $0x8e0] sm:$0xff]  ;;  %v3067_v57 = vpack.c.bf16 %v1184_v38, %v1180_v8 }
 0x18f   :  { %v3443_v53 = vpack.c.bf16 %v1177_v55, %v1173_v54  ;;  %v1181_v4 = vld [vmem:[#allocation8 + $0x8d0] sm:$0xff]  ;;  %v1207_v54 = vld [vmem:[#allocation8 + $0x9a0] sm:$0xff] }
 0x190   :  { %3042 = vmatpush1.bf16.msra.mxu0 %v3041_v18  ;;  %3420 = vmatpush1.bf16.msra.mxu1 %v3419_v19  ;;  %v1164_v18 = vld [vmem:[#allocation8 + $0x848] sm:$0xff]  ;;  %v1205_v55 = vld [vmem:[#allocation8 + $0x990] sm:$0xff] }
 0x191   :  { %3044 = vmatprep.subr.bf16.mxu0 %v3043_v22  ;;  %3422 = vmatprep.subr.bf16.mxu1 %v3421_v23  ;;  %v1168_v19 = vld [vmem:[#allocation8 + $0x868] sm:$0xff]  ;;  %v355_v22 = vsub.s32 5, %v4064_v12  ;;  %v581_v23 = vadd.f32 %v4085_v16, %v344_v5  ;;  %v1185_v5 = vld [vmem:[#allocation8 + $0x8f0] sm:$0xff] }
 0x192   :  { %v3059_v28 = vpack.c.bf16 %v1168_v19, %v1164_v18  ;;  %v3449_v18 = vpack.c.bf16 %v1194_v10, %v1190_v9  ;;  %v1189_v19 = vld [vmem:[#allocation8 + $0x910] sm:$0xff]  ;;  %v1220_v10 = vld [vmem:[#allocation8 + $0xa08] sm:$0xff] }
 0x193   :  { %v4118_v16 = vrot.slane %v4069_v13, %v355_v22  ;;  %v1182_v13 = vld [vmem:[#allocation8 + $0x8d8] sm:$0xff]  ;;  %v1200_v22 = vld [vmem:[#allocation8 + $0x968] sm:$0xff]  ;;  %v1217_v9 = vld [vmem:[#allocation8 + $0x9f0] sm:$0xff] }
 0x194   :  { %3046 = vmatpush1.bf16.msra.mxu0 %v3045_v32  ;;  %3424 = vmatpush1.bf16.msra.mxu1 %v3423_v33  ;;  %v1165_v32 = vld [vmem:[#allocation8 + $0x850] sm:$0xff] }
 0x195   :  { %3048 = vmatprep.subr.bf16.mxu0 %v3047_v39  ;;  %3426 = vmatprep.subr.bf16.mxu1 %v3425_v40  ;;  %v1169_v33 = vld [vmem:[#allocation8 + $0x870] sm:$0xff]  ;;  %v1174_v39 = vld [vmem:[#allocation8 + $0x898] sm:$0xff]  ;;  %v660_v30 = vadd.f32 %v4094_v49, %v4118_v16  ;;  %v3069_v49 = vpack.c.bf16 %v1183_v62, %v1179_v61 }
 0x196   :  { %v1178_v40 = vld [vmem:[#allocation8 + $0x8b8] sm:$0xff]  ;;  %v3439_v45 = vpack.c.bf16 %v1169_v33, %v1165_v32  ;;  %v1199_v32 = vld [vmem:[#allocation8 + $0x960] sm:$0xff]  ;;  %v3075_v33 = vpack.c.bf16 %v1200_v22, %v1196_v21 }
 0x197   :  { %v4131_v61 = vld [vmem:[#allocation7 + $0x8] sm:$0xf]  ;;  %v1223_v21 = vld [vmem:[#allocation8 + $0xa20] sm:$0xff] }
 0x198   :  { %3050 = vmatpush1.bf16.msra.mxu0 %v3049_v51  ;;  %3428 = vmatpush1.bf16.msra.mxu1 %v3427_v52  ;;  %v3063_v51 = vpack.c.bf16 %v1176_v36, %v1172_v35  ;;  %v3441_v52 = vpack.c.bf16 %v1178_v40, %v1174_v39  ;;  %v1197_v36 = vld [vmem:[#allocation8 + $0x950] sm:$0xff]  ;;  %v1204_v40 = vld [vmem:[#allocation8 + $0x988] sm:$0xff] }
 0x199   :  { %3052 = vmatprep.subr.bf16.mxu0 %v3051_v58  ;;  %3430 = vmatprep.subr.bf16.mxu1 %v3429_v59  ;;  %v1186_v58 = vld [vmem:[#allocation8 + $0x8f8] sm:$0xff]  ;;  %v3065_v59 = vpack.c.bf16 %v1175_v47, %v1171_v46  ;;  %v1201_v39 = vld [vmem:[#allocation8 + $0x970] sm:$0xff] }
 0x19a   :  { %v3445_v2 = vpack.c.bf16 %v1186_v58, %v1182_v13  ;;  %v1209_v13 = vld [vmem:[#allocation8 + $0x9b0] sm:$0xff]  ;;  %v1212_v58 = vld [vmem:[#allocation8 + $0x9c8] sm:$0xff] }
 0x19c   :  { %3054 = vmatpush1.bf16.msra.mxu0 %v3053_v6  ;;  %3432 = vmatpush1.bf16.msra.mxu1 %v3431_v7  ;;  %v1188_v6 = vld [vmem:[#allocation8 + $0x908] sm:$0xff] }
 0x19d   :  { %3056 = vmatprep.subr.bf16.mxu0 %v3055_v11  ;;  %3434 = vmatprep.subr.bf16.mxu1 %v3433_v15  ;;  %v1192_v7 = vld [vmem:[#allocation8 + $0x928] sm:$0xff]  ;;  %v3447_v11 = vpack.c.bf16 %v1185_v5, %v1181_v4  ;;  %v1187_v15 = vld [vmem:[#allocation8 + $0x900] sm:$0xff] }
 0x19e   :  { %v3071_v31 = vpack.c.bf16 %v1192_v7, %v1188_v6  ;;  %v3073_v27 = vpack.c.bf16 %v1191_v17, %v1187_v15  ;;  %v1215_v4 = vld [vmem:[#allocation8 + $0x9e0] sm:$0xff]  ;;  %v1213_v7 = vld [vmem:[#allocation8 + $0x9d0] sm:$0xff]  ;;  %v1222_v15 = vld [vmem:[#allocation8 + $0xa18] sm:$0xff] }
 0x19f   :  { %1834 = vmatmul.mubr.f32.vlgmr.msra.gmra.mrb[12].mxu0 %v581_v23  ;;  %2296 = vmatmul.mubr.f32.vlgmr.msra.gmra.mrb[12].mxu1 %v581_v23  ;;  %v1198_v23 = vld [vmem:[#allocation8 + $0x958] sm:$0xff] }
 0x1a0   :  { %3058 = vmatpush1.bf16.msra.mxu0 %v3057_v24  ;;  %3436 = vmatpush1.bf16.msra.mxu1 %v3435_v25  ;;  %v1202_v24 = vld [vmem:[#allocation8 + $0x978] sm:$0xff] }
 0x1a1   :  { %3060 = vmatprep.subr.bf16.mxu0 %v3059_v28  ;;  %3438 = vmatprep.subr.bf16.mxu1 %v3437_v29  ;;  %v3451_v28 = vpack.c.bf16 %v1193_v20, %v1189_v19  ;;  %v1195_v29 = vld [vmem:[#allocation8 + $0x940] sm:$0xff]  ;;  %v3453_v35 = vpack.c.bf16 %v1202_v24, %v1198_v23  ;;  %v1226_v17 = vld [vmem:[#allocation8 + $0xa38] sm:$0xff]  ;;  %v3463_v19 = vpack.c.bf16 %v1217_v9, %v1213_v7  ;;  %v1237_v9 = vld [vmem:[#allocation8 + $0xa90] sm:$0xff] }
 0x1a2   :  { %1839 = vmatprep.mubr.f32.mxu0 %v589_v41  ;;  %2301 = vmatprep.mubr.f32.mxu1 %v589_v41  ;;  %v1208_v41 = vld [vmem:[#allocation8 + $0x9a8] sm:$0xff]  ;;  %v3077_v47 = vpack.c.bf16 %v1199_v32, %v1195_v29  ;;  %v1219_v20 = vld [vmem:[#allocation8 + $0xa00] sm:$0xff]  ;;  %v3465_v24 = vpack.c.bf16 %v1226_v17, %v1222_v15  ;;  %v1246_v15 = vld [vmem:[#allocation8 + $0xad8] sm:$0xff] }
 0x1a3   :  { %1840 = vmatmul.mubr.f32.gmra.mrb[14].mxu0 %v587_v42  ;;  %2302 = vmatmul.mubr.f32.gmra.mrb[14].mxu1 %v587_v42  ;;  %v1206_v42 = vld [vmem:[#allocation8 + $0x998] sm:$0xff]  ;;  %v3079_v8 = vpack.c.bf16 %v1208_v41, %v1204_v40  ;;  %v1228_v29 = vld [vmem:[#allocation8 + $0xa48] sm:$0xff]  ;;  %v3089_v41 = vpack.c.bf16 %v1223_v21, %v1219_v20  ;;  %v1247_v20 = vld [vmem:[#allocation8 + $0xae0] sm:$0xff] }
 0x1a4   :  { %3062 = vmatpush1.bf16.msra.mxu0 %v3061_v43  ;;  %3440 = vmatpush1.bf16.msra.mxu1 %v3439_v45  ;;  %v1210_v43 = vld [vmem:[#allocation8 + $0x9b8] sm:$0xff] }
 0x1a5   :  { %3064 = vmatprep.subr.bf16.mxu0 %v3063_v51  ;;  %3442 = vmatprep.subr.bf16.mxu1 %v3441_v52  ;;  %v3455_v51 = vpack.c.bf16 %v1201_v39, %v1197_v36  ;;  %v1203_v52 = vld [vmem:[#allocation8 + $0x980] sm:$0xff]  ;;  %v3457_v38 = vpack.c.bf16 %v1210_v43, %v1206_v42  ;;  %v1230_v36 = vld [vmem:[#allocation8 + $0xa58] sm:$0xff] }
 0x1a6   :  { %1910 = vmatprep.mubr.f32.mxu0 %v660_v30  ;;  %2372 = vmatprep.mubr.f32.mxu1 %v660_v30  ;;  %v1216_v30 = vld [vmem:[#allocation8 + $0x9e8] sm:$0xff]  ;;  %v3081_v62 = vpack.c.bf16 %v1207_v54, %v1203_v52  ;;  %v1234_v39 = vld [vmem:[#allocation8 + $0xa78] sm:$0xff]  ;;  %v1227_v43 = vld [vmem:[#allocation8 + $0xa40] sm:$0xff] }
 0x1a7   :  { %v3083_v5 = vpack.c.bf16 %v1216_v30, %v1212_v58  ;;  %v3469_v54 = vpack.c.bf16 %v1234_v39, %v1230_v36  ;;  %v1240_v30 = vld [vmem:[#allocation8 + $0xaa8] sm:$0xff]  ;;  %v1250_v17 = vld [vmem:[#allocation8 + $0xaf8] sm:$0xff]  ;;  %v1251_v39 = vld [vmem:[#allocation8 + $0xb00] sm:$0xff] }
 0x1a8   :  { %3066 = vmatpush1.bf16.msra.mxu0 %v3065_v59  ;;  %3444 = vmatpush1.bf16.msra.mxu1 %v3443_v53  ;;  %v1214_v59 = vld [vmem:[#allocation8 + $0x9d8] sm:$0xff] }
 0x1a9   :  { %3068 = vmatprep.subr.bf16.mxu0 %v3067_v57  ;;  %3446 = vmatprep.subr.bf16.mxu1 %v3445_v2  ;;  %v1218_v53 = vld [vmem:[#allocation8 + $0x9f8] sm:$0xff]  ;;  %v3459_v57 = vpack.c.bf16 %v1209_v13, %v1205_v55  ;;  %v1211_v2 = vld [vmem:[#allocation8 + $0x9c0] sm:$0xff]  ;;  %v1229_v55 = vld [vmem:[#allocation8 + $0xa50] sm:$0xff] }
 0x1aa   :  { %v4123_v25 = vpop.f32.mrb[8].mxu0  ;;  %v3461_v6 = vpack.c.bf16 %v1218_v53, %v1214_v59  ;;  %v1238_v59 = vld [vmem:[#allocation8 + $0xa98] sm:$0xff] }
 0x1ab   :  { %v4125_v26 = vpop.f32.mrb[9].mxu0  ;;  %v1242_v53 = vld [vmem:[#allocation8 + $0xab8] sm:$0xff] }
 0x1ac   :  { %3070 = vmatpush1.bf16.msra.mxu0 %v3069_v49  ;;  %3448 = vmatpush1.bf16.msra.mxu1 %v3447_v11  ;;  %v376_v49 = vrot.slane %v4131_v61, %v4105_v50  ;;  %v1224_v11 = vld [vmem:[#allocation8 + $0xa28] sm:$0xff]  ;;  %v3473_v7 = vpack.c.bf16 %v1242_v53, %v1238_v59  ;;  %v1263_v59 = vld [vmem:[#allocation8 + $0xb60] sm:$0xff] }
 0x1ad   :  { %3072 = vmatprep.subr.bf16.mxu0 %v3071_v31  ;;  %3450 = vmatprep.subr.bf16.mxu1 %v3449_v18  ;;  %v380_v31 = vrot.slane %v4131_v61, %v4079_v60  ;;  %v3085_v18 = vpack.c.bf16 %v1215_v4, %v1211_v2  ;;  %v888_v22 = vpop.f32.mrb[8].mxu1  ;;  %v3087_v23 = vpack.c.bf16 %v1224_v11, %v1220_v10  ;;  %v1235_v4 = vld [vmem:[#allocation8 + $0xa80] sm:$0xff]  ;;  %v1241_v10 = vld [vmem:[#allocation8 + $0xab0] sm:$0xff]  ;;  %v1248_v11 = vld [vmem:[#allocation8 + $0xae8] sm:$0xff] }
 0x1ae   :  { %v4127_v45 = vpop.f32.mrb[10].mxu0  ;;  %v4137_v32 = vadd.f32 %v888_v22, %v376_v49  ;;  %v3477_v22 = vpack.c.bf16 %v1250_v17, %v1246_v15  ;;  %v1271_v15 = vld [vmem:[#allocation8 + $0xba0] sm:$0xff] }
 0x1af   :  { %v4129_v46 = vpop.f32.mrb[11].mxu0 }
 0x1b0   :  { %3074 = vmatpush1.bf16.msra.mxu0 %v3073_v27  ;;  %3452 = vmatpush1.bf16.msra.mxu1 %v3451_v28  ;;  %v1221_v27 = vld [vmem:[#allocation8 + $0xa10] sm:$0xff] }
 0x1b1   :  { %3076 = vmatprep.subr.bf16.mxu0 %v3075_v33  ;;  %3454 = vmatprep.subr.bf16.mxu1 %v3453_v35  ;;  %v1225_v28 = vld [vmem:[#allocation8 + $0xa30] sm:$0xff]  ;;  %v890_v33 = vpop.f32.mrb[9].mxu1  ;;  %v1232_v35 = vld [vmem:[#allocation8 + $0xa68] sm:$0xff] }
 0x1b2   :  { %v4139_v40 = vadd.f32 %v890_v33, %v380_v31  ;;  %v3467_v42 = vpack.c.bf16 %v1225_v28, %v1221_v27  ;;  %v3091_v52 = vpack.c.bf16 %v1232_v35, %v1228_v29  ;;  %v1252_v27 = vld [vmem:[#allocation8 + $0xb08] sm:$0xff]  ;;  %v1254_v29 = vld [vmem:[#allocation8 + $0xb18] sm:$0xff] }
 0x1b3   :  { %v1256_v28 = vld [vmem:[#allocation8 + $0xb28] sm:$0xff]  ;;  %v1258_v33 = vld [vmem:[#allocation8 + $0xb38] sm:$0xff] }
 0x1b4   :  { %3078 = vmatpush1.bf16.msra.mxu0 %v3077_v47  ;;  %3456 = vmatpush1.bf16.msra.mxu1 %v3455_v51  ;;  %v1231_v47 = vld [vmem:[#allocation8 + $0xa60] sm:$0xff]  ;;  %v894_v51 = vpop.f32.mrb[10].mxu1 }
 0x1b5   :  { %3080 = vmatprep.subr.bf16.mxu0 %v3079_v8  ;;  %3458 = vmatprep.subr.bf16.mxu1 %v3457_v38  ;;  %v1233_v8 = vld [vmem:[#allocation8 + $0xa70] sm:$0xff]  ;;  %v1236_v38 = vld [vmem:[#allocation8 + $0xa88] sm:$0xff]  ;;  %v4141_v13 = vadd.f32 %v894_v51, %v376_v49  ;;  %v896_v58 = vpop.f32.mrb[11].mxu1 }
 0x1b6   :  { %v3471_v2 = vpack.c.bf16 %v1233_v8, %v1229_v55  ;;  %v1244_v49 = vld [vmem:[#allocation8 + $0xac8] sm:$0xff]  ;;  %v1257_v51 = vld [vmem:[#allocation8 + $0xb30] sm:$0xff]  ;;  %v1262_v55 = vld [vmem:[#allocation8 + $0xb58] sm:$0xff] }
 0x1b7   :  { %v3099_v21 = vpack.c.bf16 %v1248_v11, %v1244_v49  ;;  %v1266_v8 = vld [vmem:[#allocation8 + $0xb78] sm:$0xff]  ;;  %v1267_v11 = vld [vmem:[#allocation8 + $0xb80] sm:$0xff] }
 0x1b8   :  { %3082 = vmatpush1.bf16.msra.mxu0 %v3081_v62  ;;  %3460 = vmatpush1.bf16.msra.mxu1 %v3459_v57  ;;  %v4143_v62 = vadd.f32 %v896_v58, %v380_v31  ;;  %v3093_v57 = vpack.c.bf16 %v1231_v47, %v1227_v43  ;;  %v3481_v43 = vpack.c.bf16 %v1258_v33, %v1254_v29  ;;  %v1253_v47 = vld [vmem:[#allocation8 + $0xb10] sm:$0xff]  ;;  %v1279_v29 = vld [vmem:[#allocation8 + $0xbe0] sm:$0xff]  ;;  %v351_v33 = vsub.s32 4, %v4064_v12 }
 0x1b9   :  { %3084 = vmatprep.subr.bf16.mxu0 %v3083_v5  ;;  %3462 = vmatprep.subr.bf16.mxu1 %v3461_v6  ;;  %v1239_v5 = vld [vmem:[#allocation8 + $0xaa0] sm:$0xff]  ;;  %v3095_v6 = vpack.c.bf16 %v1240_v30, %v1236_v38  ;;  %v3483_v58 = vpack.c.bf16 %v1257_v51, %v1253_v47  ;;  %v1286_v47 = vld [vmem:[#allocation8 + $0xc18] sm:$0xff] }
 0x1ba   :  { %v3097_v31 = vpack.c.bf16 %v1239_v5, %v1235_v4  ;;  %v1259_v30 = vld [vmem:[#allocation8 + $0xb40] sm:$0xff]  ;;  %v1265_v4 = vld [vmem:[#allocation8 + $0xb70] sm:$0xff]  ;;  %v1268_v5 = vld [vmem:[#allocation8 + $0xb88] sm:$0xff] }
 0x1bb   :  { %v1290_v51 = vld [vmem:[#allocation8 + $0xc38] sm:$0xff] }
 0x1bc   :  { %3086 = vmatpush1.bf16.msra.mxu0 %v3085_v18  ;;  %3464 = vmatpush1.bf16.msra.mxu1 %v3463_v19  ;;  %v3475_v18 = vpack.c.bf16 %v1241_v10, %v1237_v9  ;;  %v1243_v19 = vld [vmem:[#allocation8 + $0xac0] sm:$0xff]  ;;  %v1274_v9 = vld [vmem:[#allocation8 + $0xbb8] sm:$0xff]  ;;  %v3109_v10 = vpack.c.bf16 %v1263_v59, %v1259_v30  ;;  %v3497_v30 = vpack.c.bf16 %v1290_v51, %v1286_v47 }
 0x1bd   :  { %3088 = vmatprep.subr.bf16.mxu0 %v3087_v23  ;;  %3466 = vmatprep.subr.bf16.mxu1 %v3465_v24  ;;  %v1245_v23 = vld [vmem:[#allocation8 + $0xad0] sm:$0xff]  ;;  %v3101_v35 = vpack.c.bf16 %v1247_v20, %v1243_v19  ;;  %v1276_v20 = vld [vmem:[#allocation8 + $0xbc8] sm:$0xff]  ;;  %v1287_v59 = vld [vmem:[#allocation8 + $0xc20] sm:$0xff] }
 0x1be   :  { %v1249_v24 = vld [vmem:[#allocation8 + $0xaf0] sm:$0xff]  ;;  %v1314_v47 = vld [vmem:[#allocation8 + $0xcf8] sm:$0xff] }
 0x1bf   :  { %v3479_v36 = vpack.c.bf16 %v1249_v24, %v1245_v23  ;;  %v1273_v19 = vld [vmem:[#allocation8 + $0xbb0] sm:$0xff]  ;;  %v1282_v23 = vld [vmem:[#allocation8 + $0xbf8] sm:$0xff]  ;;  %v3113_v24 = vpack.c.bf16 %v1271_v15, %v1267_v11  ;;  %v666_v11 = vadd.f32 %v4098_v1, %v4118_v16  ;;  %v1291_v15 = vld [vmem:[#allocation8 + $0xc40] sm:$0xff] }
 0x1c0   :  { %3090 = vmatpush1.bf16.msra.mxu0 %v3089_v41  ;;  %3468 = vmatpush1.bf16.msra.mxu1 %v3467_v42  ;;  %v1255_v41 = vld [vmem:[#allocation8 + $0xb20] sm:$0xff]  ;;  %v3103_v42 = vpack.c.bf16 %v1256_v28, %v1252_v27 }
 0x1c1   :  { %3092 = vmatprep.subr.bf16.mxu0 %v3091_v52  ;;  %3470 = vmatprep.subr.bf16.mxu1 %v3469_v54  ;;  %v1260_v52 = vld [vmem:[#allocation8 + $0xb48] sm:$0xff]  ;;  %v3105_v38 = vpack.c.bf16 %v1255_v41, %v1251_v39  ;;  %v1275_v28 = vld [vmem:[#allocation8 + $0xbc0] sm:$0xff]  ;;  %v1277_v39 = vld [vmem:[#allocation8 + $0xbd0] sm:$0xff] }
 0x1c2   :  { %v1264_v54 = vld [vmem:[#allocation8 + $0xb68] sm:$0xff]  ;;  %v1281_v41 = vld [vmem:[#allocation8 + $0xbf0] sm:$0xff] }
 0x1c3   :  { %v3107_v53 = vpack.c.bf16 %v1264_v54, %v1260_v52  ;;  %v3117_v52 = vpack.c.bf16 %v1279_v29, %v1275_v28  ;;  %v3495_v54 = vpack.c.bf16 %v1281_v41, %v1277_v39  ;;  %v1299_v28 = vld [vmem:[#allocation8 + $0xc80] sm:$0xff]  ;;  %v1305_v39 = vld [vmem:[#allocation8 + $0xcb0] sm:$0xff]  ;;  %v1308_v41 = vld [vmem:[#allocation8 + $0xcc8] sm:$0xff] }
 0x1c4   :  { %3094 = vmatpush1.bf16.msra.mxu0 %v3093_v57  ;;  %3472 = vmatpush1.bf16.msra.mxu1 %v3471_v2  ;;  %v3485_v57 = vpack.c.bf16 %v1266_v8, %v1262_v55  ;;  %v1261_v2 = vld [vmem:[#allocation8 + $0xb50] sm:$0xff]  ;;  %v1283_v55 = vld [vmem:[#allocation8 + $0xc00] sm:$0xff] }
 0x1c5   :  { %3096 = vmatprep.subr.bf16.mxu0 %v3095_v6  ;;  %3474 = vmatprep.subr.bf16.mxu1 %v3473_v7  ;;  %v1272_v6 = vld [vmem:[#allocation8 + $0xba8] sm:$0xff]  ;;  %v1270_v7 = vld [vmem:[#allocation8 + $0xb98] sm:$0xff]  ;;  %v3487_v49 = vpack.c.bf16 %v1265_v4, %v1261_v2  ;;  %v363_v2 = vsub.s32 7, %v4064_v12  ;;  %v1303_v29 = vld [vmem:[#allocation8 + $0xca0] sm:$0xff] }
 0x1c6   :  { %v3111_v17 = vpack.c.bf16 %v1272_v6, %v1268_v5  ;;  %v4146_v8 = vld [vmem:[#allocation7] sm:$0xff]  ;;  %v1292_v4 = vld [vmem:[#allocation8 + $0xc48] sm:$0xff]  ;;  %v3129_v51 = vpack.c.bf16 %v1303_v29, %v1299_v28 }
 0x1c7   :  { %v1296_v5 = vld [vmem:[#allocation8 + $0xc68] sm:$0xff]  ;;  %v1294_v6 = vld [vmem:[#allocation8 + $0xc58] sm:$0xff] }
 0x1c8   :  { %3098 = vmatpush1.bf16.msra.mxu0 %v3097_v31  ;;  %3476 = vmatpush1.bf16.msra.mxu1 %v3475_v18  ;;  %v3489_v31 = vpack.c.bf16 %v1274_v9, %v1270_v7  ;;  %v1269_v18 = vld [vmem:[#allocation8 + $0xb90] sm:$0xff]  ;;  %v1298_v7 = vld [vmem:[#allocation8 + $0xc78] sm:$0xff]  ;;  %v3121_v9 = vpack.c.bf16 %v1287_v59, %v1283_v55  ;;  %v1307_v55 = vld [vmem:[#allocation8 + $0xcc0] sm:$0xff] }
 0x1c9   :  { %3100 = vmatprep.subr.bf16.mxu0 %v3099_v21  ;;  %3478 = vmatprep.subr.bf16.mxu1 %v3477_v22  ;;  %v1280_v21 = vld [vmem:[#allocation8 + $0xbe8] sm:$0xff]  ;;  %v1278_v22 = vld [vmem:[#allocation8 + $0xbd8] sm:$0xff]  ;;  %v3491_v27 = vpack.c.bf16 %v1273_v19, %v1269_v18  ;;  %v3123_v18 = vpack.c.bf16 %v1296_v5, %v1292_v4  ;;  %v3501_v19 = vpack.c.bf16 %v1298_v7, %v1294_v6  ;;  %v1315_v7 = vld [vmem:[#allocation8 + $0xd00] sm:$0xff] }
 0x1ca   :  { %v1316_v59 = vld [vmem:[#allocation8 + $0xd08] sm:$0xff]  ;;  %v1334_v29 = vld [vmem:[#allocation8 + $0xd98] sm:$0xff] }
 0x1cb   :  { %v1336_v28 = vld [vmem:[#allocation8 + $0xda8] sm:$0xff] }
 0x1cc   :  { %3102 = vmatpush1.bf16.msra.mxu0 %v3101_v35  ;;  %3480 = vmatpush1.bf16.msra.mxu1 %v3479_v36  ;;  %v3115_v35 = vpack.c.bf16 %v1280_v21, %v1276_v20  ;;  %v3493_v36 = vpack.c.bf16 %v1282_v23, %v1278_v22  ;;  %v1293_v20 = vld [vmem:[#allocation8 + $0xc50] sm:$0xff]  ;;  %v1300_v22 = vld [vmem:[#allocation8 + $0xc88] sm:$0xff] }
 0x1cd   :  { %3104 = vmatprep.subr.bf16.mxu0 %v3103_v42  ;;  %3482 = vmatprep.subr.bf16.mxu1 %v3481_v43  ;;  %v1284_v42 = vld [vmem:[#allocation8 + $0xc08] sm:$0xff]  ;;  %v1297_v21 = vld [vmem:[#allocation8 + $0xc70] sm:$0xff] }
 0x1ce   :  { %v1288_v43 = vld [vmem:[#allocation8 + $0xc28] sm:$0xff]  ;;  %v3503_v16 = vpack.c.bf16 %v1297_v21, %v1293_v20 }
 0x1d0   :  { %3106 = vmatpush1.bf16.msra.mxu0 %v3105_v38  ;;  %3484 = vmatpush1.bf16.msra.mxu1 %v3483_v58  ;;  %v352_v38 = vrot.slane %v4146_v8, %v351_v33  ;;  %v3119_v58 = vpack.c.bf16 %v1288_v43, %v1284_v42  ;;  %v1301_v33 = vld [vmem:[#allocation8 + $0xc90] sm:$0xff]  ;;  %v1312_v42 = vld [vmem:[#allocation8 + $0xce8] sm:$0xff]  ;;  %v1310_v43 = vld [vmem:[#allocation8 + $0xcd8] sm:$0xff] }
 0x1d1   :  { %3108 = vmatprep.subr.bf16.mxu0 %v3107_v53  ;;  %3486 = vmatprep.subr.bf16.mxu1 %v3485_v57  ;;  %v1285_v53 = vld [vmem:[#allocation8 + $0xc10] sm:$0xff] }
 0x1d2   :  { %v1289_v57 = vld [vmem:[#allocation8 + $0xc30] sm:$0xff]  ;;  %v664_v23 = vadd.f32 %v4096_v0, %v352_v38 }
 0x1d4   :  { %3110 = vmatpush1.bf16.msra.mxu0 %v3109_v10  ;;  %3488 = vmatpush1.bf16.msra.mxu1 %v3487_v49  ;;  %v3499_v10 = vpack.c.bf16 %v1289_v57, %v1285_v53  ;;  %v658_v49 = vadd.f32 %v4092_v48, %v352_v38  ;;  %v1304_v48 = vld [vmem:[#allocation8 + $0xca8] sm:$0xff]  ;;  %v1309_v38 = vld [vmem:[#allocation8 + $0xcd0] sm:$0xff]  ;;  %v1318_v57 = vld [vmem:[#allocation8 + $0xd18] sm:$0xff] }
 0x1d5   :  { %3112 = vmatprep.subr.bf16.mxu0 %v3111_v17  ;;  %3490 = vmatprep.subr.bf16.mxu1 %v3489_v31  ;;  %v1295_v17 = vld [vmem:[#allocation8 + $0xc60] sm:$0xff]  ;;  %v4154_v31 = vrot.slane %v4146_v8, %v363_v2  ;;  %v3127_v0 = vpack.c.bf16 %v1304_v48, %v1300_v22  ;;  %v1320_v53 = vld [vmem:[#allocation8 + $0xd28] sm:$0xff]  ;;  %v1322_v2 = vld [vmem:[#allocation8 + $0xd38] sm:$0xff] }
 0x1d6   :  { %v3125_v1 = vpack.c.bf16 %v1295_v17, %v1291_v15  ;;  %v3135_v6 = vpack.c.bf16 %v1320_v53, %v1316_v59  ;;  %v1324_v15 = vld [vmem:[#allocation8 + $0xd48] sm:$0xff]  ;;  %v1327_v48 = vld [vmem:[#allocation8 + $0xd60] sm:$0xff]  ;;  %v1341_v53 = vld [vmem:[#allocation8 + $0xdd0] sm:$0xff] }
 0x1d7   :  { %v1328_v17 = vld [vmem:[#allocation8 + $0xd68] sm:$0xff]  ;;  %v1343_v59 = vld [vmem:[#allocation8 + $0xde0] sm:$0xff] }
 0x1d8   :  { %3114 = vmatpush1.bf16.msra.mxu0 %v3113_v24  ;;  %3492 = vmatpush1.bf16.msra.mxu1 %v3491_v27  ;;  %v1302_v24 = vld [vmem:[#allocation8 + $0xc98] sm:$0xff]  ;;  %v3139_v22 = vpack.c.bf16 %v1328_v17, %v1324_v15  ;;  %v1351_v15 = vld [vmem:[#allocation8 + $0xe20] sm:$0xff]  ;;  %v1349_v17 = vld [vmem:[#allocation8 + $0xe10] sm:$0xff] }
 0x1d9   :  { %3116 = vmatprep.subr.bf16.mxu0 %v3115_v35  ;;  %3494 = vmatprep.subr.bf16.mxu1 %v3493_v36  ;;  %v1306_v27 = vld [vmem:[#allocation8 + $0xcb8] sm:$0xff]  ;;  %v737_v35 = vadd.f32 %v4102_v44, %v4154_v31  ;;  %v1311_v44 = vld [vmem:[#allocation8 + $0xce0] sm:$0xff] }
 0x1da   :  { %v3505_v36 = vpack.c.bf16 %v1306_v27, %v1302_v24  ;;  %v3133_v4 = vpack.c.bf16 %v1311_v44, %v1307_v55  ;;  %v1325_v24 = vld [vmem:[#allocation8 + $0xd50] sm:$0xff]  ;;  %v1346_v55 = vld [vmem:[#allocation8 + $0xdf8] sm:$0xff] }
 0x1dc   :  { %3118 = vmatpush1.bf16.msra.mxu0 %v3117_v52  ;;  %3496 = vmatpush1.bf16.msra.mxu1 %v3495_v54  ;;  %v3507_v52 = vpack.c.bf16 %v1305_v39, %v1301_v33  ;;  %v3131_v54 = vpack.c.bf16 %v1312_v42, %v1308_v41  ;;  %v1338_v33 = vld [vmem:[#allocation8 + $0xdb8] sm:$0xff]  ;;  %v1331_v39 = vld [vmem:[#allocation8 + $0xd80] sm:$0xff]  ;;  %v1333_v42 = vld [vmem:[#allocation8 + $0xd90] sm:$0xff] }
 0x1dd   :  { %3120 = vmatprep.subr.bf16.mxu0 %v3119_v58  ;;  %3498 = vmatprep.subr.bf16.mxu1 %v3497_v30  ;;  %v3509_v58 = vpack.c.bf16 %v1314_v47, %v1310_v43  ;;  %v1313_v30 = vld [vmem:[#allocation8 + $0xcf0] sm:$0xff]  ;;  %v1335_v41 = vld [vmem:[#allocation8 + $0xda0] sm:$0xff]  ;;  %v3521_v43 = vpack.c.bf16 %v1338_v33, %v1334_v29 }
 0x1de   :  { %v3511_v5 = vpack.c.bf16 %v1313_v30, %v1309_v38  ;;  %v1337_v47 = vld [vmem:[#allocation8 + $0xdb0] sm:$0xff]  ;;  %v3145_v44 = vpack.c.bf16 %v1335_v41, %v1331_v39  ;;  %v1339_v30 = vld [vmem:[#allocation8 + $0xdc0] sm:$0xff]  ;;  %v1370_v39 = vld [vmem:[#allocation8 + $0xeb8] sm:$0xff] }
 0x1df   :  { %1911 = vmatmul.mubr.f32.vlgmr.msra.gmra.mrb[12].mxu0 %v658_v49  ;;  %2373 = vmatmul.mubr.f32.vlgmr.msra.gmra.mrb[12].mxu1 %v658_v49  ;;  %v3513_v49 = vpack.c.bf16 %v1322_v2, %v1318_v57  ;;  %v3523_v38 = vpack.c.bf16 %v1337_v47, %v1333_v42  ;;  %v1345_v2 = vld [vmem:[#allocation8 + $0xdf0] sm:$0xff]  ;;  %v1363_v47 = vld [vmem:[#allocation8 + $0xe80] sm:$0xff] }
 0x1e0   :  { %3122 = vmatpush1.bf16.msra.mxu0 %v3121_v9  ;;  %3500 = vmatpush1.bf16.msra.mxu1 %v3499_v10  ;;  %v1319_v9 = vld [vmem:[#allocation8 + $0xd20] sm:$0xff]  ;;  %v1317_v10 = vld [vmem:[#allocation8 + $0xd10] sm:$0xff] }
 0x1e1   :  { %1916 = vmatprep.mubr.f32.mxu0 %v666_v11  ;;  %2378 = vmatprep.mubr.f32.mxu1 %v666_v11  ;;  %v1321_v11 = vld [vmem:[#allocation8 + $0xd30] sm:$0xff]  ;;  %v3137_v20 = vpack.c.bf16 %v1319_v9, %v1315_v7  ;;  %v1354_v7 = vld [vmem:[#allocation8 + $0xe38] sm:$0xff]  ;;  %v3149_v9 = vpack.c.bf16 %v1343_v59, %v1339_v30 }
 0x1e2   :  { %3124 = vmatprep.subr.bf16.mxu0 %v3123_v18  ;;  %3502 = vmatprep.subr.bf16.mxu1 %v3501_v19  ;;  %v1326_v18 = vld [vmem:[#allocation8 + $0xd58] sm:$0xff]  ;;  %v3515_v21 = vpack.c.bf16 %v1321_v11, %v1317_v10  ;;  %v3527_v10 = vpack.c.bf16 %v1345_v2, %v1341_v53  ;;  %v1347_v11 = vld [vmem:[#allocation8 + $0xe00] sm:$0xff]  ;;  %v1361_v33 = vld [vmem:[#allocation8 + $0xe70] sm:$0xff] }
 0x1e3   :  { %1917 = vmatmul.mubr.f32.gmra.mrb[14].mxu0 %v664_v23  ;;  %2379 = vmatmul.mubr.f32.gmra.mrb[14].mxu1 %v664_v23  ;;  %v1330_v19 = vld [vmem:[#allocation8 + $0xd78] sm:$0xff]  ;;  %v1323_v23 = vld [vmem:[#allocation8 + $0xd40] sm:$0xff] }
 0x1e4   :  { %3126 = vmatpush1.bf16.msra.mxu0 %v3125_v1  ;;  %1987 = vmatprep.mubr.f32.mxu0 %v737_v35  ;;  %v3517_v27 = vpack.c.bf16 %v1330_v19, %v1326_v18  ;;  %v1329_v1 = vld [vmem:[#allocation8 + $0xd70] sm:$0xff]  ;;  %v1378_v30 = vld [vmem:[#allocation8 + $0xef8] sm:$0xff]  ;;  %v1371_v2 = vld [vmem:[#allocation8 + $0xec0] sm:$0xff] }
 0x1e5   :  { %3504 = vmatpush1.bf16.msra.mxu1 %v3503_v16  ;;  %2449 = vmatprep.mubr.f32.mxu1 %v737_v35  ;;  %v1332_v16 = vld [vmem:[#allocation8 + $0xd88] sm:$0xff]  ;;  %v3141_v35 = vpack.c.bf16 %v1327_v48, %v1323_v23  ;;  %v1353_v19 = vld [vmem:[#allocation8 + $0xe30] sm:$0xff]  ;;  %v1362_v23 = vld [vmem:[#allocation8 + $0xe78] sm:$0xff]  ;;  %v3153_v48 = vpack.c.bf16 %v1351_v15, %v1347_v11 }
 0x1e6   :  { %3128 = vmatprep.subr.bf16.mxu0 %v3127_v0  ;;  %3506 = vmatprep.subr.bf16.mxu1 %v3505_v36  ;;  %v3519_v0 = vpack.c.bf16 %v1329_v1, %v1325_v24  ;;  %v3143_v36 = vpack.c.bf16 %v1336_v28, %v1332_v16  ;;  %v3531_v24 = vpack.c.bf16 %v1353_v19, %v1349_v17  ;;  %v1355_v1 = vld [vmem:[#allocation8 + $0xe40] sm:$0xff]  ;;  %v1357_v28 = vld [vmem:[#allocation8 + $0xe50] sm:$0xff]  ;;  %v1386_v11 = vld [vmem:[#allocation8 + $0xf38] sm:$0xff] }
 0x1e7   :  { %v1359_v16 = vld [vmem:[#allocation8 + $0xe60] sm:$0xff]  ;;  %v3535_v42 = vpack.c.bf16 %v1361_v33, %v1357_v28 }
 0x1e8   :  { %3130 = vmatpush1.bf16.msra.mxu0 %v3129_v51  ;;  %v1340_v51 = vld [vmem:[#allocation8 + $0xdc8] sm:$0xff]  ;;  %v3157_v41 = vpack.c.bf16 %v1359_v16, %v1355_v1  ;;  %v1379_v19 = vld [vmem:[#allocation8 + $0xf00] sm:$0xff]  ;;  %v1394_v1 = vld [vmem:[#allocation8 + $0xf78] sm:$0xff] }
 0x1e9   :  { %3508 = vmatpush1.bf16.msra.mxu1 %v3507_v52  ;;  %3132 = vmatprep.subr.bf16.mxu0 %v3131_v54  ;;  %v1344_v52 = vld [vmem:[#allocation8 + $0xde8] sm:$0xff]  ;;  %v1342_v54 = vld [vmem:[#allocation8 + $0xdd8] sm:$0xff]  ;;  %v1387_v33 = vld [vmem:[#allocation8 + $0xf40] sm:$0xff] }
 0x1ea   :  { %3510 = vmatprep.subr.bf16.mxu1 %v3509_v58  ;;  %v3147_v58 = vpack.c.bf16 %v1344_v52, %v1340_v51  ;;  %v3525_v57 = vpack.c.bf16 %v1346_v55, %v1342_v54  ;;  %v1367_v51 = vld [vmem:[#allocation8 + $0xea0] sm:$0xff]  ;;  %v1365_v52 = vld [vmem:[#allocation8 + $0xe90] sm:$0xff] }
 0x1eb   :  { %v1369_v55 = vld [vmem:[#allocation8 + $0xeb0] sm:$0xff]  ;;  %v3161_v59 = vpack.c.bf16 %v1367_v51, %v1363_v47  ;;  %v1402_v47 = vld [vmem:[#allocation8 + $0xfb8] sm:$0xff] }
 0x1ec   :  { %3134 = vmatpush1.bf16.msra.mxu0 %v3133_v4  ;;  %v1348_v4 = vld [vmem:[#allocation8 + $0xe08] sm:$0xff]  ;;  %v3539_v53 = vpack.c.bf16 %v1369_v55, %v1365_v52  ;;  %v1395_v55 = vld [vmem:[#allocation8 + $0xf80] sm:$0xff] }
 0x1ed   :  { %3512 = vmatpush1.bf16.msra.mxu1 %v3511_v5  ;;  %3136 = vmatprep.subr.bf16.mxu0 %v3135_v6  ;;  %v1352_v5 = vld [vmem:[#allocation8 + $0xe28] sm:$0xff]  ;;  %v1350_v6 = vld [vmem:[#allocation8 + $0xe18] sm:$0xff] }
 0x1ee   :  { %3514 = vmatprep.subr.bf16.mxu1 %v3513_v49  ;;  %v3151_v49 = vpack.c.bf16 %v1352_v5, %v1348_v4  ;;  %v3529_v18 = vpack.c.bf16 %v1354_v7, %v1350_v6  ;;  %v1375_v4 = vld [vmem:[#allocation8 + $0xee0] sm:$0xff]  ;;  %v1373_v5 = vld [vmem:[#allocation8 + $0xed0] sm:$0xff] }
 0x1ef   :  { %v1377_v7 = vld [vmem:[#allocation8 + $0xef0] sm:$0xff]  ;;  %v3165_v15 = vpack.c.bf16 %v1375_v4, %v1371_v2  ;;  %v1410_v2 = vld [vmem:[#allocation8 + $0xff8] sm:$0xff] }
 0x1f0   :  { %3138 = vmatpush1.bf16.msra.mxu0 %v3137_v20  ;;  %v1356_v20 = vld [vmem:[#allocation8 + $0xe48] sm:$0xff]  ;;  %v3543_v17 = vpack.c.bf16 %v1377_v7, %v1373_v5  ;;  %v359_v5 = vsub.s32 6, %v4064_v12 }
 0x1f1   :  { %3516 = vmatpush1.bf16.msra.mxu1 %v3515_v21  ;;  %3140 = vmatprep.subr.bf16.mxu0 %v3139_v22  ;;  %v1360_v21 = vld [vmem:[#allocation8 + $0xe68] sm:$0xff]  ;;  %v1358_v22 = vld [vmem:[#allocation8 + $0xe58] sm:$0xff] }
 0x1f2   :  { %3518 = vmatprep.subr.bf16.mxu1 %v3517_v27  ;;  %v3155_v27 = vpack.c.bf16 %v1360_v21, %v1356_v20  ;;  %v3533_v29 = vpack.c.bf16 %v1362_v23, %v1358_v22  ;;  %v1383_v20 = vld [vmem:[#allocation8 + $0xf20] sm:$0xff]  ;;  %v1381_v21 = vld [vmem:[#allocation8 + $0xf10] sm:$0xff] }
 0x1f3   :  { %v1385_v23 = vld [vmem:[#allocation8 + $0xf30] sm:$0xff]  ;;  %v3169_v16 = vpack.c.bf16 %v1383_v20, %v1379_v19  ;;  %v1414_v19 = vld [vmem:[#allocation8 + $0x1018] sm:$0xff] }
 0x1f4   :  { %3142 = vmatpush1.bf16.msra.mxu0 %v3141_v35  ;;  %v1364_v35 = vld [vmem:[#allocation8 + $0xe88] sm:$0xff]  ;;  %v3547_v28 = vpack.c.bf16 %v1385_v23, %v1381_v21  ;;  %v1418_v20 = vld [vmem:[#allocation8 + $0x1038] sm:$0xff] }
 0x1f5   :  { %3520 = vmatpush1.bf16.msra.mxu1 %v3519_v0  ;;  %3144 = vmatprep.subr.bf16.mxu0 %v3143_v36  ;;  %v1368_v0 = vld [vmem:[#allocation8 + $0xea8] sm:$0xff]  ;;  %v1366_v36 = vld [vmem:[#allocation8 + $0xe98] sm:$0xff] }
 0x1f6   :  { %3522 = vmatprep.subr.bf16.mxu1 %v3521_v43  ;;  %v3159_v43 = vpack.c.bf16 %v1368_v0, %v1364_v35  ;;  %v3537_v54 = vpack.c.bf16 %v1370_v39, %v1366_v36  ;;  %v1391_v35 = vld [vmem:[#allocation8 + $0xf60] sm:$0xff]  ;;  %v1389_v0 = vld [vmem:[#allocation8 + $0xf50] sm:$0xff] }
 0x1f7   :  { %v1393_v39 = vld [vmem:[#allocation8 + $0xf70] sm:$0xff]  ;;  %v3173_v51 = vpack.c.bf16 %v1391_v35, %v1387_v33  ;;  %v1422_v33 = vld [vmem:[#allocation8 + $0x1058] sm:$0xff] }
 0x1f8   :  { %3146 = vmatpush1.bf16.msra.mxu0 %v3145_v44  ;;  %v1372_v44 = vld [vmem:[#allocation8 + $0xec8] sm:$0xff]  ;;  %v3551_v52 = vpack.c.bf16 %v1393_v39, %v1389_v0  ;;  %v1426_v35 = vld [vmem:[#allocation8 + $0x1078] sm:$0xff]  ;;  %v4166_v39 = vrot.slane %v4131_v61, %v4067_v3 }
 0x1f9   :  { %3524 = vmatpush1.bf16.msra.mxu1 %v3523_v38  ;;  %3148 = vmatprep.subr.bf16.mxu0 %v3147_v58  ;;  %v1376_v38 = vld [vmem:[#allocation8 + $0xee8] sm:$0xff]  ;;  %v1374_v58 = vld [vmem:[#allocation8 + $0xed8] sm:$0xff] }
 0x1fa   :  { %3526 = vmatprep.subr.bf16.mxu1 %v3525_v57  ;;  %v3163_v57 = vpack.c.bf16 %v1376_v38, %v1372_v44  ;;  %v3541_v6 = vpack.c.bf16 %v1378_v30, %v1374_v58  ;;  %v1399_v44 = vld [vmem:[#allocation8 + $0xfa0] sm:$0xff]  ;;  %v1397_v38 = vld [vmem:[#allocation8 + $0xf90] sm:$0xff] }
 0x1fb   :  { %v1401_v30 = vld [vmem:[#allocation8 + $0xfb0] sm:$0xff]  ;;  %v3177_v4 = vpack.c.bf16 %v1399_v44, %v1395_v55  ;;  %v1432_v55 = vld [vmem:[#allocation8 + $0x10a8] sm:$0xff]  ;;  %v1430_v44 = vld [vmem:[#allocation8 + $0x1098] sm:$0xff] }
 0x1fc   :  { %3150 = vmatpush1.bf16.msra.mxu0 %v3149_v9  ;;  %v1380_v9 = vld [vmem:[#allocation8 + $0xf08] sm:$0xff] }
 0x1fd   :  { %3528 = vmatpush1.bf16.msra.mxu1 %v3527_v10  ;;  %3152 = vmatprep.subr.bf16.mxu0 %v3151_v49  ;;  %v1384_v10 = vld [vmem:[#allocation8 + $0xf28] sm:$0xff]  ;;  %v1382_v49 = vld [vmem:[#allocation8 + $0xf18] sm:$0xff] }
 0x1fe   :  { %3530 = vmatprep.subr.bf16.mxu1 %v3529_v18  ;;  %v3167_v18 = vpack.c.bf16 %v1384_v10, %v1380_v9  ;;  %v3545_v22 = vpack.c.bf16 %v1386_v11, %v1382_v49  ;;  %v1403_v9 = vld [vmem:[#allocation8 + $0xfc0] sm:$0xff]  ;;  %v1405_v49 = vld [vmem:[#allocation8 + $0xfd0] sm:$0xff] }
 0x1ff   :  { %v1407_v10 = vld [vmem:[#allocation8 + $0xfe0] sm:$0xff] }
 0x200   :  { %3154 = vmatpush1.bf16.msra.mxu0 %v3153_v48  ;;  %v1388_v48 = vld [vmem:[#allocation8 + $0xf48] sm:$0xff]  ;;  %v3181_v21 = vpack.c.bf16 %v1407_v10, %v1403_v9 }
 0x201   :  { %3532 = vmatpush1.bf16.msra.mxu1 %v3531_v24  ;;  %3156 = vmatprep.subr.bf16.mxu0 %v3155_v27  ;;  %v1392_v24 = vld [vmem:[#allocation8 + $0xf68] sm:$0xff]  ;;  %v1390_v27 = vld [vmem:[#allocation8 + $0xf58] sm:$0xff] }
 0x202   :  { %3534 = vmatprep.subr.bf16.mxu1 %v3533_v29  ;;  %v3171_v29 = vpack.c.bf16 %v1392_v24, %v1388_v48  ;;  %v3549_v36 = vpack.c.bf16 %v1394_v1, %v1390_v27  ;;  %v3561_v48 = vpack.c.bf16 %v1418_v20, %v1414_v19  ;;  %v1411_v24 = vld [vmem:[#allocation8 + $0x1000] sm:$0xff]  ;;  %v1413_v1 = vld [vmem:[#allocation8 + $0x1010] sm:$0xff]  ;;  %v1444_v19 = vld [vmem:[#allocation8 + $0x1108] sm:$0xff] }
 0x203   :  { %v1415_v27 = vld [vmem:[#allocation8 + $0x1020] sm:$0xff]  ;;  %v1448_v20 = vld [vmem:[#allocation8 + $0x1128] sm:$0xff] }
 0x204   :  { %3158 = vmatpush1.bf16.msra.mxu0 %v3157_v41  ;;  %v1396_v41 = vld [vmem:[#allocation8 + $0xf88] sm:$0xff] }
 0x205   :  { %3536 = vmatpush1.bf16.msra.mxu1 %v3535_v42  ;;  %3160 = vmatprep.subr.bf16.mxu0 %v3159_v43  ;;  %v1400_v42 = vld [vmem:[#allocation8 + $0xfa8] sm:$0xff]  ;;  %v1398_v43 = vld [vmem:[#allocation8 + $0xf98] sm:$0xff] }
 0x206   :  { %3538 = vmatprep.subr.bf16.mxu1 %v3537_v54  ;;  %v3175_v54 = vpack.c.bf16 %v1400_v42, %v1396_v41  ;;  %v3553_v58 = vpack.c.bf16 %v1402_v47, %v1398_v43  ;;  %v1419_v43 = vld [vmem:[#allocation8 + $0x1040] sm:$0xff] }
 0x207   :  { %v1423_v47 = vld [vmem:[#allocation8 + $0x1060] sm:$0xff] }
 0x208   :  { %3162 = vmatpush1.bf16.msra.mxu0 %v3161_v59  ;;  %v1404_v59 = vld [vmem:[#allocation8 + $0xfc8] sm:$0xff]  ;;  %v3189_v61 = vpack.c.bf16 %v1423_v47, %v1419_v43  ;;  %v1455_v43 = vld [vmem:[#allocation8 + $0x1160] sm:$0xff]  ;;  %v1453_v47 = vld [vmem:[#allocation8 + $0x1150] sm:$0xff] }
 0x209   :  { %3540 = vmatpush1.bf16.msra.mxu1 %v3539_v53  ;;  %3164 = vmatprep.subr.bf16.mxu0 %v3163_v57  ;;  %v1408_v53 = vld [vmem:[#allocation8 + $0xfe8] sm:$0xff]  ;;  %v1406_v57 = vld [vmem:[#allocation8 + $0xfd8] sm:$0xff] }
 0x20a   :  { %3542 = vmatprep.subr.bf16.mxu1 %v3541_v6  ;;  %v3555_v6 = vpack.c.bf16 %v1401_v30, %v1397_v38  ;;  %v3179_v7 = vpack.c.bf16 %v1408_v53, %v1404_v59  ;;  %v3557_v11 = vpack.c.bf16 %v1410_v2, %v1406_v57  ;;  %v1434_v38 = vld [vmem:[#allocation8 + $0x10b8] sm:$0xff]  ;;  %v1427_v59 = vld [vmem:[#allocation8 + $0x1080] sm:$0xff]  ;;  %v1429_v57 = vld [vmem:[#allocation8 + $0x1090] sm:$0xff] }
 0x20b   :  { %v1431_v53 = vld [vmem:[#allocation8 + $0x10a0] sm:$0xff]  ;;  %v3569_v2 = vpack.c.bf16 %v1434_v38, %v1430_v44  ;;  %v1466_v44 = vld [vmem:[#allocation8 + $0x11b8] sm:$0xff] }
 0x20c   :  { %3166 = vmatpush1.bf16.msra.mxu0 %v3165_v15  ;;  %v1409_v15 = vld [vmem:[#allocation8 + $0xff0] sm:$0xff] }
 0x20d   :  { %3544 = vmatpush1.bf16.msra.mxu1 %v3543_v17  ;;  %3168 = vmatprep.subr.bf16.mxu0 %v3167_v18  ;;  %v1412_v17 = vld [vmem:[#allocation8 + $0x1008] sm:$0xff]  ;;  %v3559_v12 = vpack.c.bf16 %v1409_v15, %v1405_v49  ;;  %v1435_v49 = vld [vmem:[#allocation8 + $0x10c0] sm:$0xff]  ;;  %v1437_v15 = vld [vmem:[#allocation8 + $0x10d0] sm:$0xff] }
 0x20e   :  { %3546 = vmatprep.subr.bf16.mxu1 %v3545_v22  ;;  %v1416_v18 = vld [vmem:[#allocation8 + $0x1028] sm:$0xff]  ;;  %v360_v22 = vrot.slane %v4146_v8, %v359_v5  ;;  %v3185_v8 = vpack.c.bf16 %v1415_v27, %v1411_v24  ;;  %v1443_v24 = vld [vmem:[#allocation8 + $0x1100] sm:$0xff] }
 0x20f   :  { %v3183_v23 = vpack.c.bf16 %v1416_v18, %v1412_v17  ;;  %v1436_v5 = vld [vmem:[#allocation8 + $0x10c8] sm:$0xff]  ;;  %v1441_v18 = vld [vmem:[#allocation8 + $0x10f0] sm:$0xff]  ;;  %v1447_v27 = vld [vmem:[#allocation8 + $0x1120] sm:$0xff] }
 0x210   :  { %3170 = vmatpush1.bf16.msra.mxu0 %v3169_v16  ;;  %v1417_v16 = vld [vmem:[#allocation8 + $0x1030] sm:$0xff]  ;;  %v735_v0 = vadd.f32 %v4100_v37, %v360_v22  ;;  %v1428_v37 = vld [vmem:[#allocation8 + $0x1088] sm:$0xff] }
 0x211   :  { %3548 = vmatpush1.bf16.msra.mxu1 %v3547_v28  ;;  %3172 = vmatprep.subr.bf16.mxu0 %v3171_v29  ;;  %v1420_v28 = vld [vmem:[#allocation8 + $0x1048] sm:$0xff]  ;;  %v3563_v41 = vpack.c.bf16 %v1417_v16, %v1413_v1  ;;  %v3191_v30 = vpack.c.bf16 %v1432_v55, %v1428_v37  ;;  %v1445_v1 = vld [vmem:[#allocation8 + $0x1110] sm:$0xff]  ;;  %v1462_v55 = vld [vmem:[#allocation8 + $0x1198] sm:$0xff] }
 0x212   :  { %3550 = vmatprep.subr.bf16.mxu1 %v3549_v36  ;;  %v1424_v29 = vld [vmem:[#allocation8 + $0x1068] sm:$0xff]  ;;  %v743_v36 = vadd.f32 %v4109_v63, %v4154_v31  ;;  %v741_v63 = vadd.f32 %v4107_v56, %v360_v22  ;;  %v814_v31 = vadd.f32 %v4125_v26, %v4166_v39  ;;  %v1438_v56 = vld [vmem:[#allocation8 + $0x10d8] sm:$0xff]  ;;  %v3193_v26 = vpack.c.bf16 %v1431_v53, %v1427_v59  ;;  %v1465_v53 = vld [vmem:[#allocation8 + $0x11b0] sm:$0xff] }
 0x213   :  { %v3187_v42 = vpack.c.bf16 %v1424_v29, %v1420_v28  ;;  %v1450_v22 = vld [vmem:[#allocation8 + $0x1138] sm:$0xff]  ;;  %v1449_v28 = vld [vmem:[#allocation8 + $0x1130] sm:$0xff]  ;;  %v1452_v29 = vld [vmem:[#allocation8 + $0x1148] sm:$0xff]  ;;  %v3585_v59 = vpack.c.bf16 %v1466_v44, %v1462_v55 }
 0x214   :  { %3174 = vmatpush1.bf16.msra.mxu0 %v3173_v51  ;;  %v1421_v51 = vld [vmem:[#allocation8 + $0x1050] sm:$0xff]  ;;  %v1464_v37 = vld [vmem:[#allocation8 + $0x11a8] sm:$0xff] }
 0x215   :  { %3552 = vmatpush1.bf16.msra.mxu1 %v3551_v52  ;;  %3176 = vmatprep.subr.bf16.mxu0 %v3175_v54  ;;  %v3565_v52 = vpack.c.bf16 %v1426_v35, %v1422_v33  ;;  %v1425_v54 = vld [vmem:[#allocation8 + $0x1070] sm:$0xff]  ;;  %v1456_v33 = vld [vmem:[#allocation8 + $0x1168] sm:$0xff]  ;;  %v1454_v35 = vld [vmem:[#allocation8 + $0x1158] sm:$0xff] }
 0x216   :  { %3554 = vmatprep.subr.bf16.mxu1 %v3553_v58  ;;  %v3567_v58 = vpack.c.bf16 %v1425_v54, %v1421_v51  ;;  %v1460_v54 = vld [vmem:[#allocation8 + $0x1188] sm:$0xff] }
 0x218   :  { %3178 = vmatpush1.bf16.msra.mxu0 %v3177_v4  ;;  %v1433_v4 = vld [vmem:[#allocation8 + $0x10b0] sm:$0xff] }
 0x219   :  { %3556 = vmatpush1.bf16.msra.mxu1 %v3555_v6  ;;  %3180 = vmatprep.subr.bf16.mxu0 %v3179_v7  ;;  %v1440_v6 = vld [vmem:[#allocation8 + $0x10e8] sm:$0xff]  ;;  %v1442_v7 = vld [vmem:[#allocation8 + $0x10f8] sm:$0xff]  ;;  %v3571_v9 = vpack.c.bf16 %v1433_v4, %v1429_v57 }
 0x21a   :  { %3558 = vmatprep.subr.bf16.mxu1 %v3557_v11  ;;  %v3195_v10 = vpack.c.bf16 %v1440_v6, %v1436_v5  ;;  %v1439_v11 = vld [vmem:[#allocation8 + $0x10e0] sm:$0xff]  ;;  %v3573_v17 = vpack.c.bf16 %v1442_v7, %v1438_v56  ;;  %v1468_v57 = vld [vmem:[#allocation8 + $0x11c8] sm:$0xff]  ;;  %v1470_v4 = vld [vmem:[#allocation8 + $0x11d8] sm:$0xff] }
 0x21b   :  { %v1474_v5 = vld [vmem:[#allocation8 + $0x11f8] sm:$0xff] }
 0x21c   :  { %3182 = vmatpush1.bf16.msra.mxu0 %v3181_v21  ;;  %v1446_v21 = vld [vmem:[#allocation8 + $0x1118] sm:$0xff] }
 0x21d   :  { %3560 = vmatpush1.bf16.msra.mxu1 %v3559_v12  ;;  %3184 = vmatprep.subr.bf16.mxu0 %v3183_v23  ;;  %v3197_v12 = vpack.c.bf16 %v1439_v11, %v1435_v49  ;;  %v3575_v23 = vpack.c.bf16 %v1441_v18, %v1437_v15  ;;  %v3577_v16 = vpack.c.bf16 %v1450_v22, %v1446_v21  ;;  %v1473_v11 = vld [vmem:[#allocation8 + $0x11f0] sm:$0xff]  ;;  %v1476_v15 = vld [vmem:[#allocation8 + $0x1208] sm:$0xff]  ;;  %v1478_v18 = vld [vmem:[#allocation8 + $0x1218] sm:$0xff] }
 0x21e   :  { %3562 = vmatprep.subr.bf16.mxu1 %v3561_v48  ;;  %v3199_v48 = vpack.c.bf16 %v1448_v20, %v1444_v19  ;;  %v3589_v49 = vpack.c.bf16 %v1474_v5, %v1470_v4  ;;  %v1482_v19 = vld [vmem:[#allocation8 + $0x1238] sm:$0xff] }
 0x21f   :  { %1988 = vmatmul.mubr.f32.vlgmr.msra.gmra.mrb[12].mxu0 %v735_v0 }
 0x220   :  { %2450 = vmatmul.mubr.f32.vlgmr.msra.gmra.mrb[12].mxu1 %v735_v0  ;;  %1993 = vmatprep.mubr.f32.mxu0 %v743_v36  ;;  %v1458_v0 = vld [vmem:[#allocation8 + $0x1178] sm:$0xff] }
 0x221   :  { %3186 = vmatpush1.bf16.msra.mxu0 %v3185_v8  ;;  %2455 = vmatprep.mubr.f32.mxu1 %v743_v36  ;;  %v3201_v8 = vpack.c.bf16 %v1447_v27, %v1443_v24  ;;  %v3579_v36 = vpack.c.bf16 %v1449_v28, %v1445_v1  ;;  %v3581_v51 = vpack.c.bf16 %v1458_v0, %v1454_v35  ;;  %v1481_v27 = vld [vmem:[#allocation8 + $0x1230] sm:$0xff]  ;;  %v1484_v1 = vld [vmem:[#allocation8 + $0x1248] sm:$0xff]  ;;  %v1486_v28 = vld [vmem:[#allocation8 + $0x1258] sm:$0xff] }
 0x222   :  { %3564 = vmatpush1.bf16.msra.mxu1 %v3563_v41  ;;  %3188 = vmatprep.subr.bf16.mxu0 %v3187_v42  ;;  %v3203_v41 = vpack.c.bf16 %v1456_v33, %v1452_v29  ;;  %v1451_v42 = vld [vmem:[#allocation8 + $0x1140] sm:$0xff]  ;;  %v3593_v24 = vpack.c.bf16 %v1482_v19, %v1478_v18  ;;  %v1490_v29 = vld [vmem:[#allocation8 + $0x1278] sm:$0xff] }
 0x223   :  { %1994 = vmatmul.mubr.f32.gmra.mrb[14].mxu0 %v741_v63  ;;  %3566 = vmatprep.subr.bf16.mxu1 %v3565_v52  ;;  %v1457_v52 = vld [vmem:[#allocation8 + $0x1170] sm:$0xff]  ;;  %v3205_v38 = vpack.c.bf16 %v1455_v43, %v1451_v42  ;;  %v3597_v42 = vpack.c.bf16 %v1490_v29, %v1486_v28 }
 0x224   :  { %2456 = vmatmul.mubr.f32.gmra.mrb[14].mxu1 %v741_v63  ;;  %2064 = vmatprep.mubr.f32.mxu0 %v814_v31  ;;  %v3583_v63 = vpack.c.bf16 %v1457_v52, %v1453_v47  ;;  %v1489_v43 = vld [vmem:[#allocation8 + $0x1270] sm:$0xff]  ;;  %v1492_v47 = vld [vmem:[#allocation8 + $0x1288] sm:$0xff]  ;;  %v1494_v52 = vld [vmem:[#allocation8 + $0x1298] sm:$0xff] }
 0x225   :  { %3190 = vmatpush1.bf16.msra.mxu0 %v3189_v61  ;;  %2526 = vmatprep.mubr.f32.mxu1 %v814_v31  ;;  %v3207_v61 = vpack.c.bf16 %v1464_v37, %v1460_v54  ;;  %v1459_v31 = vld [vmem:[#allocation8 + $0x1180] sm:$0xff]  ;;  %v1498_v54 = vld [vmem:[#allocation8 + $0x12b8] sm:$0xff] }
 0x226   :  { %3568 = vmatpush1.bf16.msra.mxu1 %v3567_v58  ;;  %3192 = vmatprep.subr.bf16.mxu0 %v3191_v30  ;;  %v1463_v58 = vld [vmem:[#allocation8 + $0x11a0] sm:$0xff]  ;;  %v1461_v30 = vld [vmem:[#allocation8 + $0x1190] sm:$0xff] }
 0x227   :  { %3570 = vmatprep.subr.bf16.mxu1 %v3569_v2  ;;  %v1472_v2 = vld [vmem:[#allocation8 + $0x11e8] sm:$0xff]  ;;  %v3209_v6 = vpack.c.bf16 %v1463_v58, %v1459_v31  ;;  %v3587_v56 = vpack.c.bf16 %v1465_v53, %v1461_v30  ;;  %v3601_v31 = vpack.c.bf16 %v1498_v54, %v1494_v52  ;;  %v1497_v58 = vld [vmem:[#allocation8 + $0x12b0] sm:$0xff]  ;;  %v1502_v53 = vld [vmem:[#allocation8 + $0x12d8] sm:$0xff] }
 0x228   :  { %v3211_v7 = vpack.c.bf16 %v1472_v2, %v1468_v57  ;;  %v1500_v30 = vld [vmem:[#allocation8 + $0x12c8] sm:$0xff]  ;;  %v1506_v57 = vld [vmem:[#allocation8 + $0x12f8] sm:$0xff] }
 0x229   :  { %3194 = vmatpush1.bf16.msra.mxu0 %v3193_v26  ;;  %v1467_v26 = vld [vmem:[#allocation8 + $0x11c0] sm:$0xff] }
 0x22a   :  { %3572 = vmatpush1.bf16.msra.mxu1 %v3571_v9  ;;  %3196 = vmatprep.subr.bf16.mxu0 %v3195_v10  ;;  %v1471_v9 = vld [vmem:[#allocation8 + $0x11e0] sm:$0xff]  ;;  %v1469_v10 = vld [vmem:[#allocation8 + $0x11d0] sm:$0xff] }
 0x22b   :  { %3574 = vmatprep.subr.bf16.mxu1 %v3573_v17  ;;  %v1480_v17 = vld [vmem:[#allocation8 + $0x1228] sm:$0xff]  ;;  %v3213_v20 = vpack.c.bf16 %v1471_v9, %v1467_v26  ;;  %v3591_v21 = vpack.c.bf16 %v1473_v11, %v1469_v10  ;;  %v3605_v26 = vpack.c.bf16 %v1506_v57, %v1502_v53  ;;  %v1505_v9 = vld [vmem:[#allocation8 + $0x12f0] sm:$0xff]  ;;  %v1510_v11 = vld [vmem:[#allocation8 + $0x1318] sm:$0xff] }
 0x22c   :  { %v3215_v22 = vpack.c.bf16 %v1480_v17, %v1476_v15  ;;  %v1508_v10 = vld [vmem:[#allocation8 + $0x1308] sm:$0xff]  ;;  %v1514_v15 = vld [vmem:[#allocation8 + $0x1338] sm:$0xff] }
 0x22d   :  { %3198 = vmatpush1.bf16.msra.mxu0 %v3197_v12  ;;  %v1475_v12 = vld [vmem:[#allocation8 + $0x1200] sm:$0xff] }
 0x22e   :  { %3576 = vmatpush1.bf16.msra.mxu1 %v3575_v23  ;;  %3200 = vmatprep.subr.bf16.mxu0 %v3199_v48  ;;  %v1479_v23 = vld [vmem:[#allocation8 + $0x1220] sm:$0xff]  ;;  %v1477_v48 = vld [vmem:[#allocation8 + $0x1210] sm:$0xff] }
 0x22f   :  { %3578 = vmatprep.subr.bf16.mxu1 %v3577_v16  ;;  %v1488_v16 = vld [vmem:[#allocation8 + $0x1268] sm:$0xff]  ;;  %v3217_v33 = vpack.c.bf16 %v1479_v23, %v1475_v12  ;;  %v3595_v35 = vpack.c.bf16 %v1481_v27, %v1477_v48  ;;  %v3609_v12 = vpack.c.bf16 %v1514_v15, %v1510_v11  ;;  %v1513_v23 = vld [vmem:[#allocation8 + $0x1330] sm:$0xff]  ;;  %v1518_v27 = vld [vmem:[#allocation8 + $0x1358] sm:$0xff] }
 0x230   :  { %v3219_v0 = vpack.c.bf16 %v1488_v16, %v1484_v1  ;;  %v1516_v48 = vld [vmem:[#allocation8 + $0x1348] sm:$0xff]  ;;  %v1522_v1 = vld [vmem:[#allocation8 + $0x1378] sm:$0xff] }
 0x231   :  { %3202 = vmatpush1.bf16.msra.mxu0 %v3201_v8  ;;  %v1483_v8 = vld [vmem:[#allocation8 + $0x1240] sm:$0xff]  ;;  %v3745_v11 = vld [vmem:[#allocation7 + $0x8] sm:$0xf] }
 0x232   :  { %3580 = vmatpush1.bf16.msra.mxu1 %v3579_v36  ;;  %3204 = vmatprep.subr.bf16.mxu0 %v3203_v41  ;;  %v1487_v36 = vld [vmem:[#allocation8 + $0x1260] sm:$0xff]  ;;  %v1485_v41 = vld [vmem:[#allocation8 + $0x1250] sm:$0xff]  ;;  %v368_v15 = vrot.slane %v3745_v11, %v4072_v14 }
 0x233   :  { %3582 = vmatprep.subr.bf16.mxu1 %v3581_v51  ;;  %v1496_v51 = vld [vmem:[#allocation8 + $0x12a8] sm:$0xff]  ;;  %v3221_v37 = vpack.c.bf16 %v1487_v36, %v1483_v8  ;;  %v3599_v55 = vpack.c.bf16 %v1489_v43, %v1485_v41  ;;  %v3613_v8 = vpack.c.bf16 %v1522_v1, %v1518_v27  ;;  %v1521_v36 = vld [vmem:[#allocation8 + $0x1370] sm:$0xff]  ;;  %v1526_v43 = vld [vmem:[#allocation8 + $0x1398] sm:$0xff] }
 0x234   :  { %v3223_v44 = vpack.c.bf16 %v1496_v51, %v1492_v47  ;;  %v1524_v41 = vld [vmem:[#allocation8 + $0x1388] sm:$0xff]  ;;  %v1530_v47 = vld [vmem:[#allocation8 + $0x13b8] sm:$0xff]  ;;  %v812_v1 = vadd.f32 %v4123_v25, %v368_v15  ;;  %v1575_v11 = vld [vmem:[#allocation8 + $0x1520] sm:$0xff] }
 0x235   :  { %3206 = vmatpush1.bf16.msra.mxu0 %v3205_v38  ;;  %v1491_v38 = vld [vmem:[#allocation8 + $0x1280] sm:$0xff]  ;;  %v1554_v27 = vld [vmem:[#allocation8 + $0x1478] sm:$0xff] }
 0x236   :  { %3584 = vmatpush1.bf16.msra.mxu1 %v3583_v63  ;;  %3208 = vmatprep.subr.bf16.mxu0 %v3207_v61  ;;  %v1495_v63 = vld [vmem:[#allocation8 + $0x12a0] sm:$0xff]  ;;  %v1493_v61 = vld [vmem:[#allocation8 + $0x1290] sm:$0xff]  ;;  %v1558_v25 = vld [vmem:[#allocation8 + $0x1498] sm:$0xff] }
 0x237   :  { %3586 = vmatprep.subr.bf16.mxu1 %v3585_v59  ;;  %v1504_v59 = vld [vmem:[#allocation8 + $0x12e8] sm:$0xff]  ;;  %v3225_v2 = vpack.c.bf16 %v1495_v63, %v1491_v38  ;;  %v3603_v4 = vpack.c.bf16 %v1497_v58, %v1493_v61  ;;  %v3617_v38 = vpack.c.bf16 %v1530_v47, %v1526_v43  ;;  %v1529_v63 = vld [vmem:[#allocation8 + $0x13b0] sm:$0xff]  ;;  %v1534_v58 = vld [vmem:[#allocation8 + $0x13d8] sm:$0xff] }
 0x238   :  { %v3227_v5 = vpack.c.bf16 %v1504_v59, %v1500_v30  ;;  %v1532_v61 = vld [vmem:[#allocation8 + $0x13c8] sm:$0xff]  ;;  %v1538_v30 = vld [vmem:[#allocation8 + $0x13f8] sm:$0xff] }
 0x239   :  { %3210 = vmatpush1.bf16.msra.mxu0 %v3209_v6  ;;  %v1499_v6 = vld [vmem:[#allocation8 + $0x12c0] sm:$0xff]  ;;  %v1560_v43 = vld [vmem:[#allocation8 + $0x14a8] sm:$0xff]  ;;  %v1562_v47 = vld [vmem:[#allocation8 + $0x14b8] sm:$0xff] }
 0x23a   :  { %3588 = vmatpush1.bf16.msra.mxu1 %v3587_v56  ;;  %3212 = vmatprep.subr.bf16.mxu0 %v3211_v7  ;;  %v1503_v56 = vld [vmem:[#allocation8 + $0x12e0] sm:$0xff]  ;;  %v1501_v7 = vld [vmem:[#allocation8 + $0x12d0] sm:$0xff] }
 0x23b   :  { %3590 = vmatprep.subr.bf16.mxu1 %v3589_v49  ;;  %v1512_v49 = vld [vmem:[#allocation8 + $0x1328] sm:$0xff]  ;;  %v3229_v17 = vpack.c.bf16 %v1503_v56, %v1499_v6  ;;  %v3607_v18 = vpack.c.bf16 %v1505_v9, %v1501_v7  ;;  %v3621_v6 = vpack.c.bf16 %v1538_v30, %v1534_v58  ;;  %v1537_v56 = vld [vmem:[#allocation8 + $0x13f0] sm:$0xff]  ;;  %v1542_v9 = vld [vmem:[#allocation8 + $0x1418] sm:$0xff] }
 0x23c   :  { %v3231_v19 = vpack.c.bf16 %v1512_v49, %v1508_v10  ;;  %v1540_v7 = vld [vmem:[#allocation8 + $0x1408] sm:$0xff]  ;;  %v1546_v10 = vld [vmem:[#allocation8 + $0x1438] sm:$0xff] }
 0x23d   :  { %3214 = vmatpush1.bf16.msra.mxu0 %v3213_v20  ;;  %v1507_v20 = vld [vmem:[#allocation8 + $0x1300] sm:$0xff] }
 0x23e   :  { %3592 = vmatpush1.bf16.msra.mxu1 %v3591_v21  ;;  %3216 = vmatprep.subr.bf16.mxu0 %v3215_v22  ;;  %v1511_v21 = vld [vmem:[#allocation8 + $0x1320] sm:$0xff]  ;;  %v1509_v22 = vld [vmem:[#allocation8 + $0x1310] sm:$0xff] }
 0x23f   :  { %3594 = vmatprep.subr.bf16.mxu1 %v3593_v24  ;;  %v1520_v24 = vld [vmem:[#allocation8 + $0x1368] sm:$0xff]  ;;  %v3233_v16 = vpack.c.bf16 %v1511_v21, %v1507_v20  ;;  %v3611_v28 = vpack.c.bf16 %v1513_v23, %v1509_v22  ;;  %v1539_v20 = vld [vmem:[#allocation8 + $0x1400] sm:$0xff]  ;;  %v1541_v22 = vld [vmem:[#allocation8 + $0x1410] sm:$0xff] }
 0x240   :  { %v3235_v29 = vpack.c.bf16 %v1520_v24, %v1516_v48  ;;  %v1543_v21 = vld [vmem:[#allocation8 + $0x1420] sm:$0xff]  ;;  %v1548_v23 = vld [vmem:[#allocation8 + $0x1448] sm:$0xff]  ;;  %v1550_v24 = vld [vmem:[#allocation8 + $0x1458] sm:$0xff] }
 0x241   :  { %3218 = vmatpush1.bf16.msra.mxu0 %v3217_v33  ;;  %v1515_v33 = vld [vmem:[#allocation8 + $0x1340] sm:$0xff]  ;;  %v1552_v48 = vld [vmem:[#allocation8 + $0x1468] sm:$0xff] }
 0x242   :  { %3596 = vmatpush1.bf16.msra.mxu1 %v3595_v35  ;;  %3220 = vmatprep.subr.bf16.mxu0 %v3219_v0  ;;  %v1519_v35 = vld [vmem:[#allocation8 + $0x1360] sm:$0xff]  ;;  %v1517_v0 = vld [vmem:[#allocation8 + $0x1350] sm:$0xff] }
 0x243   :  { %3598 = vmatprep.subr.bf16.mxu1 %v3597_v42  ;;  %v1528_v42 = vld [vmem:[#allocation8 + $0x13a8] sm:$0xff]  ;;  %v3237_v51 = vpack.c.bf16 %v1519_v35, %v1515_v33  ;;  %v3615_v52 = vpack.c.bf16 %v1521_v36, %v1517_v0  ;;  %v3251_v33 = vpack.c.bf16 %v1552_v48, %v1548_v23  ;;  %v1547_v35 = vld [vmem:[#allocation8 + $0x1440] sm:$0xff]  ;;  %v3629_v36 = vpack.c.bf16 %v1554_v27, %v1550_v24 }
 0x244   :  { %v3239_v54 = vpack.c.bf16 %v1528_v42, %v1524_v41  ;;  %v1551_v0 = vld [vmem:[#allocation8 + $0x1460] sm:$0xff]  ;;  %v1553_v41 = vld [vmem:[#allocation8 + $0x1470] sm:$0xff]  ;;  %v1556_v42 = vld [vmem:[#allocation8 + $0x1488] sm:$0xff] }
 0x245   :  { %3222 = vmatpush1.bf16.msra.mxu0 %v3221_v37  ;;  %v1523_v37 = vld [vmem:[#allocation8 + $0x1380] sm:$0xff] }
 0x246   :  { %3600 = vmatpush1.bf16.msra.mxu1 %v3599_v55  ;;  %3224 = vmatprep.subr.bf16.mxu0 %v3223_v44  ;;  %v1527_v55 = vld [vmem:[#allocation8 + $0x13a0] sm:$0xff]  ;;  %v1525_v44 = vld [vmem:[#allocation8 + $0x1390] sm:$0xff] }
 0x247   :  { %3602 = vmatprep.subr.bf16.mxu1 %v3601_v31  ;;  %v1536_v31 = vld [vmem:[#allocation8 + $0x13e8] sm:$0xff]  ;;  %v3241_v59 = vpack.c.bf16 %v1527_v55, %v1523_v37  ;;  %v3619_v53 = vpack.c.bf16 %v1529_v63, %v1525_v44  ;;  %v1559_v37 = vld [vmem:[#allocation8 + $0x14a0] sm:$0xff]  ;;  %v1557_v55 = vld [vmem:[#allocation8 + $0x1490] sm:$0xff]  ;;  %v3633_v44 = vpack.c.bf16 %v1562_v47, %v1558_v25 }
 0x248   :  { %v3243_v57 = vpack.c.bf16 %v1536_v31, %v1532_v61  ;;  %v1564_v63 = vld [vmem:[#allocation8 + $0x14c8] sm:$0xff]  ;;  %v1570_v31 = vld [vmem:[#allocation8 + $0x14f8] sm:$0xff]  ;;  %v1579_v24 = vld [vmem:[#allocation8 + $0x1540] sm:$0xff] }
 0x249   :  { %3226 = vmatpush1.bf16.msra.mxu0 %v3225_v2  ;;  %v1531_v2 = vld [vmem:[#allocation8 + $0x13c0] sm:$0xff]  ;;  %v1568_v61 = vld [vmem:[#allocation8 + $0x14e8] sm:$0xff]  ;;  %v1589_v25 = vld [vmem:[#allocation8 + $0x1590] sm:$0xff] }
 0x24a   :  { %3604 = vmatpush1.bf16.msra.mxu1 %v3603_v4  ;;  %3228 = vmatprep.subr.bf16.mxu0 %v3227_v5  ;;  %v1535_v4 = vld [vmem:[#allocation8 + $0x13e0] sm:$0xff]  ;;  %v1533_v5 = vld [vmem:[#allocation8 + $0x13d0] sm:$0xff] }
 0x24b   :  { %3606 = vmatprep.subr.bf16.mxu1 %v3605_v26  ;;  %v1544_v26 = vld [vmem:[#allocation8 + $0x1428] sm:$0xff]  ;;  %v3245_v49 = vpack.c.bf16 %v1535_v4, %v1531_v2  ;;  %v1565_v2 = vld [vmem:[#allocation8 + $0x14d0] sm:$0xff]  ;;  %v1583_v27 = vld [vmem:[#allocation8 + $0x1560] sm:$0xff] }
 0x24d   :  { %3230 = vmatpush1.bf16.msra.mxu0 %v3229_v17  ;;  %v3623_v17 = vpack.c.bf16 %v1537_v56, %v1533_v5  ;;  %v1569_v5 = vld [vmem:[#allocation8 + $0x14f0] sm:$0xff]  ;;  %v1576_v56 = vld [vmem:[#allocation8 + $0x1528] sm:$0xff] }
 0x24e   :  { %3608 = vmatpush1.bf16.msra.mxu1 %v3607_v18  ;;  %3232 = vmatprep.subr.bf16.mxu0 %v3231_v19  ;;  %v3247_v18 = vpack.c.bf16 %v1544_v26, %v1540_v7  ;;  %v3625_v19 = vpack.c.bf16 %v1546_v10, %v1542_v9  ;;  %v1574_v7 = vld [vmem:[#allocation8 + $0x1518] sm:$0xff] }
 0x24f   :  { %3610 = vmatprep.subr.bf16.mxu1 %v3609_v12  ;;  %v1545_v12 = vld [vmem:[#allocation8 + $0x1430] sm:$0xff]  ;;  %v1578_v26 = vld [vmem:[#allocation8 + $0x1538] sm:$0xff] }
 0x251   :  { %3234 = vmatpush1.bf16.msra.mxu0 %v3233_v16  ;;  %v3249_v16 = vpack.c.bf16 %v1543_v21, %v1539_v20  ;;  %v1584_v20 = vld [vmem:[#allocation8 + $0x1568] sm:$0xff]  ;;  %v1582_v21 = vld [vmem:[#allocation8 + $0x1558] sm:$0xff] }
 0x252   :  { %3612 = vmatpush1.bf16.msra.mxu1 %v3611_v28  ;;  %3236 = vmatprep.subr.bf16.mxu0 %v3235_v29  ;;  %v820_v28 = vadd.f32 %v4129_v46, %v4166_v39  ;;  %v3627_v29 = vpack.c.bf16 %v1545_v12, %v1541_v22  ;;  %v3253_v46 = vpack.c.bf16 %v1551_v0, %v1547_v35  ;;  %v1586_v22 = vld [vmem:[#allocation8 + $0x1578] sm:$0xff] }
 0x253   :  { %3614 = vmatprep.subr.bf16.mxu1 %v3613_v8  ;;  %v1549_v8 = vld [vmem:[#allocation8 + $0x1450] sm:$0xff]  ;;  %v1590_v35 = vld [vmem:[#allocation8 + $0x1598] sm:$0xff] }
 0x254   :  { %v3631_v39 = vpack.c.bf16 %v1553_v41, %v1549_v8  ;;  %v1594_v0 = vld [vmem:[#allocation8 + $0x15b8] sm:$0xff]  ;;  %v3269_v8 = vpack.c.bf16 %v1583_v27, %v1579_v24 }
 0x255   :  { %3238 = vmatpush1.bf16.msra.mxu0 %v3237_v51  ;;  %v818_v51 = vadd.f32 %v4127_v45, %v368_v15  ;;  %v1566_v45 = vld [vmem:[#allocation8 + $0x14d8] sm:$0xff]  ;;  %v1573_v15 = vld [vmem:[#allocation8 + $0x1510] sm:$0xff]  ;;  %v3649_v47 = vpack.c.bf16 %v1594_v0, %v1590_v35 }
 0x256   :  { %3616 = vmatpush1.bf16.msra.mxu1 %v3615_v52  ;;  %3240 = vmatprep.subr.bf16.mxu0 %v3239_v54  ;;  %v3255_v52 = vpack.c.bf16 %v1560_v43, %v1556_v42  ;;  %v1555_v54 = vld [vmem:[#allocation8 + $0x1480] sm:$0xff]  ;;  %v3637_v4 = vpack.c.bf16 %v1570_v31, %v1566_v45  ;;  %v1601_v31 = vld [vmem:[#allocation8 + $0x15f0] sm:$0xff]  ;;  %v1626_v24 = vld [vmem:[#allocation8 + $0x16b8] sm:$0xff] }
 0x257   :  { %3618 = vmatprep.subr.bf16.mxu1 %v3617_v38  ;;  %v1561_v38 = vld [vmem:[#allocation8 + $0x14b0] sm:$0xff]  ;;  %v3257_v58 = vpack.c.bf16 %v1559_v37, %v1555_v54  ;;  %v1587_v42 = vld [vmem:[#allocation8 + $0x1580] sm:$0xff]  ;;  %v1602_v54 = vld [vmem:[#allocation8 + $0x15f8] sm:$0xff] }
 0x258   :  { %v3635_v30 = vpack.c.bf16 %v1561_v38, %v1557_v55  ;;  %v1591_v43 = vld [vmem:[#allocation8 + $0x15a0] sm:$0xff]  ;;  %v1625_v0 = vld [vmem:[#allocation8 + $0x16b0] sm:$0xff] }
 0x259   :  { %3242 = vmatpush1.bf16.msra.mxu0 %v3241_v59  ;;  %v3259_v59 = vpack.c.bf16 %v1568_v61, %v1564_v63  ;;  %v3273_v37 = vpack.c.bf16 %v1591_v43, %v1587_v42  ;;  %v1595_v38 = vld [vmem:[#allocation8 + $0x15c0] sm:$0xff]  ;;  %v1597_v61 = vld [vmem:[#allocation8 + $0x15d0] sm:$0xff]  ;;  %v1634_v42 = vld [vmem:[#allocation8 + $0x16f8] sm:$0xff] }
 0x25a   :  { %3620 = vmatpush1.bf16.msra.mxu1 %v3619_v53  ;;  %3244 = vmatprep.subr.bf16.mxu0 %v3243_v57  ;;  %v1563_v53 = vld [vmem:[#allocation8 + $0x14c0] sm:$0xff] }
 0x25b   :  { %3622 = vmatprep.subr.bf16.mxu1 %v3621_v6  ;;  %v1567_v57 = vld [vmem:[#allocation8 + $0x14e0] sm:$0xff]  ;;  %v1572_v6 = vld [vmem:[#allocation8 + $0x1508] sm:$0xff] }
 0x25c   :  { %v3261_v9 = vpack.c.bf16 %v1567_v57, %v1563_v53  ;;  %v3263_v10 = vpack.c.bf16 %v1576_v56, %v1572_v6  ;;  %v1599_v63 = vld [vmem:[#allocation8 + $0x15e0] sm:$0xff]  ;;  %v1610_v53 = vld [vmem:[#allocation8 + $0x1638] sm:$0xff]  ;;  %v1605_v56 = vld [vmem:[#allocation8 + $0x1610] sm:$0xff] }
 0x25d   :  { %3246 = vmatpush1.bf16.msra.mxu0 %v3245_v49  ;;  %v1571_v49 = vld [vmem:[#allocation8 + $0x1500] sm:$0xff]  ;;  %v3277_v57 = vpack.c.bf16 %v1599_v63, %v1595_v38  ;;  %v1642_v38 = vld [vmem:[#allocation8 + $0x1738] sm:$0xff] }
 0x25e   :  { %3624 = vmatpush1.bf16.msra.mxu1 %v3623_v17  ;;  %3248 = vmatprep.subr.bf16.mxu0 %v3247_v18  ;;  %v3641_v17 = vpack.c.bf16 %v1578_v26, %v1574_v7  ;;  %v1577_v18 = vld [vmem:[#allocation8 + $0x1530] sm:$0xff]  ;;  %v3265_v12 = vpack.c.bf16 %v1575_v11, %v1571_v49  ;;  %v1607_v6 = vld [vmem:[#allocation8 + $0x1620] sm:$0xff]  ;;  %v1618_v49 = vld [vmem:[#allocation8 + $0x1678] sm:$0xff] }
 0x25f   :  { %3626 = vmatprep.subr.bf16.mxu1 %v3625_v19  ;;  %v1580_v19 = vld [vmem:[#allocation8 + $0x1548] sm:$0xff]  ;;  %v3643_v23 = vpack.c.bf16 %v1577_v18, %v1573_v15  ;;  %v1609_v26 = vld [vmem:[#allocation8 + $0x1630] sm:$0xff]  ;;  %v1611_v18 = vld [vmem:[#allocation8 + $0x1640] sm:$0xff] }
 0x260   :  { %2065 = vmatmul.mubr.f32.vlgmr.msra.gmra.mrb[12].mxu0 %v812_v1  ;;  %v3267_v48 = vpack.c.bf16 %v1584_v20, %v1580_v19  ;;  %v3659_v15 = vpack.c.bf16 %v1609_v26, %v1605_v56  ;;  %v1615_v19 = vld [vmem:[#allocation8 + $0x1660] sm:$0xff]  ;;  %v1613_v20 = vld [vmem:[#allocation8 + $0x1650] sm:$0xff] }
 0x261   :  { %2527 = vmatmul.mubr.f32.vlgmr.msra.gmra.mrb[12].mxu1 %v812_v1  ;;  %2070 = vmatprep.mubr.f32.mxu0 %v820_v28  ;;  %v1581_v1 = vld [vmem:[#allocation8 + $0x1550] sm:$0xff]  ;;  %v3285_v27 = vpack.c.bf16 %v1615_v19, %v1611_v18  ;;  %v1643_v26 = vld [vmem:[#allocation8 + $0x1740] sm:$0xff] }
 0x262   :  { %3250 = vmatpush1.bf16.msra.mxu0 %v3249_v16  ;;  %2532 = vmatprep.mubr.f32.mxu1 %v820_v28  ;;  %v3645_v16 = vpack.c.bf16 %v1586_v22, %v1582_v21  ;;  %v1585_v28 = vld [vmem:[#allocation8 + $0x1570] sm:$0xff] }
 0x263   :  { %3628 = vmatpush1.bf16.msra.mxu1 %v3627_v29  ;;  %3252 = vmatprep.subr.bf16.mxu0 %v3251_v33  ;;  %v1588_v29 = vld [vmem:[#allocation8 + $0x1588] sm:$0xff]  ;;  %v1617_v22 = vld [vmem:[#allocation8 + $0x1670] sm:$0xff] }
 0x264   :  { %2071 = vmatmul.mubr.f32.gmra.mrb[14].mxu0 %v818_v51  ;;  %3630 = vmatprep.subr.bf16.mxu1 %v3629_v36  ;;  %v1592_v33 = vld [vmem:[#allocation8 + $0x15a8] sm:$0xff]  ;;  %v3647_v36 = vpack.c.bf16 %v1585_v28, %v1581_v1  ;;  %v3663_v1 = vpack.c.bf16 %v1617_v22, %v1613_v20  ;;  %v1619_v28 = vld [vmem:[#allocation8 + $0x1680] sm:$0xff] }
 0x265   :  { %2533 = vmatmul.mubr.f32.gmra.mrb[14].mxu1 %v818_v51  ;;  %2669 = vmatprep.mubr.msk.f32.mxu0 %vm1673_vm4, %v4139_v40  ;;  %v3271_v41 = vpack.c.bf16 %v1592_v33, %v1588_v29  ;;  %v1593_v51 = vld [vmem:[#allocation8 + $0x15b0] sm:$0xff]  ;;  %v1623_v29 = vld [vmem:[#allocation8 + $0x16a0] sm:$0xff] }
 0x266   :  { %3254 = vmatpush1.bf16.msra.mxu0 %v3253_v46  ;;  %2673 = vmatprep.mubr.msk.f32.mxu1 %vm1673_vm4, %v4139_v40  ;;  %v3639_v40 = vpack.c.bf16 %v1569_v5, %v1565_v2  ;;  %v1596_v46 = vld [vmem:[#allocation8 + $0x15c8] sm:$0xff]  ;;  %v3651_v55 = vpack.c.bf16 %v1593_v51, %v1589_v25  ;;  %v3655_v2 = vpack.c.bf16 %v1601_v31, %v1597_v61  ;;  %v1603_v5 = vld [vmem:[#allocation8 + $0x1600] sm:$0xff]  ;;  %v1621_v33 = vld [vmem:[#allocation8 + $0x1690] sm:$0xff] }
 0x267   :  { %3632 = vmatpush1.bf16.msra.mxu1 %v3631_v39  ;;  %3256 = vmatprep.subr.bf16.mxu0 %v3255_v52  ;;  %v1600_v39 = vld [vmem:[#allocation8 + $0x15e8] sm:$0xff]  ;;  %v1598_v52 = vld [vmem:[#allocation8 + $0x15d8] sm:$0xff]  ;;  %v3281_v11 = vpack.c.bf16 %v1607_v6, %v1603_v5  ;;  %v3289_v43 = vpack.c.bf16 %v1623_v29, %v1619_v28  ;;  %v3667_v25 = vpack.c.bf16 %v1625_v0, %v1621_v33  ;;  %v1627_v51 = vld [vmem:[#allocation8 + $0x16c0] sm:$0xff] }
 0x268   :  { %3634 = vmatprep.subr.bf16.mxu1 %v3633_v44  ;;  %v3275_v44 = vpack.c.bf16 %v1600_v39, %v1596_v46  ;;  %v3653_v45 = vpack.c.bf16 %v1602_v54, %v1598_v52  ;;  %v1631_v46 = vld [vmem:[#allocation8 + $0x16e0] sm:$0xff]  ;;  %v1629_v39 = vld [vmem:[#allocation8 + $0x16d0] sm:$0xff]  ;;  %v1650_v5 = vld [vmem:[#allocation8 + $0x1778] sm:$0xf] }
 0x269   :  { %v1633_v54 = vld [vmem:[#allocation8 + $0x16f0] sm:$0xff]  ;;  %v3293_v63 = vpack.c.bf16 %v1631_v46, %v1627_v51  ;;  %v1635_v31 = vld [vmem:[#allocation8 + $0x1700] sm:$0xff] }
 0x26a   :  { %3258 = vmatpush1.bf16.msra.mxu0 %v3257_v58  ;;  %v1604_v58 = vld [vmem:[#allocation8 + $0x1608] sm:$0xff]  ;;  %v3671_v61 = vpack.c.bf16 %v1633_v54, %v1629_v39 }
 0x26b   :  { %3636 = vmatpush1.bf16.msra.mxu1 %v3635_v30  ;;  %3260 = vmatprep.subr.bf16.mxu0 %v3259_v59  ;;  %v1608_v30 = vld [vmem:[#allocation8 + $0x1628] sm:$0xff]  ;;  %v1606_v59 = vld [vmem:[#allocation8 + $0x1618] sm:$0xff] }
 0x26c   :  { %3638 = vmatprep.subr.bf16.mxu1 %v3637_v4  ;;  %v3279_v4 = vpack.c.bf16 %v1608_v30, %v1604_v58  ;;  %v3657_v7 = vpack.c.bf16 %v1610_v53, %v1606_v59  ;;  %v1639_v58 = vld [vmem:[#allocation8 + $0x1720] sm:$0xff]  ;;  %v1637_v30 = vld [vmem:[#allocation8 + $0x1710] sm:$0xff] }
 0x26d   :  { %v1641_v53 = vld [vmem:[#allocation8 + $0x1730] sm:$0xff]  ;;  %v3297_v6 = vpack.c.bf16 %v1639_v58, %v1635_v31 }
 0x26e   :  { %3262 = vmatpush1.bf16.msra.mxu0 %v3261_v9  ;;  %v1612_v9 = vld [vmem:[#allocation8 + $0x1648] sm:$0xff]  ;;  %v3675_v56 = vpack.c.bf16 %v1641_v53, %v1637_v30 }
 0x26f   :  { %3640 = vmatpush1.bf16.msra.mxu1 %v3639_v40  ;;  %3264 = vmatprep.subr.bf16.mxu0 %v3263_v10  ;;  %v1616_v40 = vld [vmem:[#allocation8 + $0x1668] sm:$0xff]  ;;  %v1614_v10 = vld [vmem:[#allocation8 + $0x1658] sm:$0xff] }
 0x270   :  { %3642 = vmatprep.subr.bf16.mxu1 %v3641_v17  ;;  %v3283_v17 = vpack.c.bf16 %v1616_v40, %v1612_v9  ;;  %v3661_v21 = vpack.c.bf16 %v1618_v49, %v1614_v10  ;;  %v1647_v9 = vld [vmem:[#allocation8 + $0x1760] sm:$0xf]  ;;  %v1645_v10 = vld [vmem:[#allocation8 + $0x1750] sm:$0xff] }
 0x271   :  { %v1649_v49 = vld [vmem:[#allocation8 + $0x1770] sm:$0xf] }
 0x272   :  { %3266 = vmatpush1.bf16.msra.mxu0 %v3265_v12  ;;  %v1620_v12 = vld [vmem:[#allocation8 + $0x1688] sm:$0xff] }
 0x273   :  { %3644 = vmatpush1.bf16.msra.mxu1 %v3643_v23  ;;  %3268 = vmatprep.subr.bf16.mxu0 %v3267_v48  ;;  %v1624_v23 = vld [vmem:[#allocation8 + $0x16a8] sm:$0xff]  ;;  %v1622_v48 = vld [vmem:[#allocation8 + $0x1698] sm:$0xff] }
 0x274   :  { %3646 = vmatprep.subr.bf16.mxu1 %v3645_v16  ;;  %v3287_v16 = vpack.c.bf16 %v1624_v23, %v1620_v12  ;;  %v3665_v35 = vpack.c.bf16 %v1626_v24, %v1622_v48 }
 0x276   :  { %3270 = vmatpush1.bf16.msra.mxu0 %v3269_v8  ;;  %v1628_v8 = vld [vmem:[#allocation8 + $0x16c8] sm:$0xff] }
 0x277   :  { %3648 = vmatpush1.bf16.msra.mxu1 %v3647_v36  ;;  %3272 = vmatprep.subr.bf16.mxu0 %v3271_v41  ;;  %v1632_v36 = vld [vmem:[#allocation8 + $0x16e8] sm:$0xff]  ;;  %v1630_v41 = vld [vmem:[#allocation8 + $0x16d8] sm:$0xff] }
 0x278   :  { %3650 = vmatprep.subr.bf16.mxu1 %v3649_v47  ;;  %v3291_v47 = vpack.c.bf16 %v1632_v36, %v1628_v8  ;;  %v3669_v52 = vpack.c.bf16 %v1634_v42, %v1630_v41 }
 0x27a   :  { %3274 = vmatpush1.bf16.msra.mxu0 %v3273_v37  ;;  %v1636_v37 = vld [vmem:[#allocation8 + $0x1708] sm:$0xff] }
 0x27b   :  { %3652 = vmatpush1.bf16.msra.mxu1 %v3651_v55  ;;  %3276 = vmatprep.subr.bf16.mxu0 %v3275_v44  ;;  %v1640_v55 = vld [vmem:[#allocation8 + $0x1728] sm:$0xff]  ;;  %v1638_v44 = vld [vmem:[#allocation8 + $0x1718] sm:$0xff] }
 0x27c   :  { %3654 = vmatprep.subr.bf16.mxu1 %v3653_v45  ;;  %v3295_v45 = vpack.c.bf16 %v1640_v55, %v1636_v37  ;;  %v3673_v59 = vpack.c.bf16 %v1642_v38, %v1638_v44 }
 0x27e   :  { %3278 = vmatpush1.bf16.msra.mxu0 %v3277_v57  ;;  %v1644_v57 = vld [vmem:[#allocation8 + $0x1748] sm:$0xff] }
 0x27f   :  { %3656 = vmatpush1.bf16.msra.mxu1 %v3655_v2  ;;  %3280 = vmatprep.subr.bf16.mxu0 %v3279_v4  ;;  %v1648_v2 = vld [vmem:[#allocation8 + $0x1768] sm:$0xf]  ;;  %v1646_v4 = vld [vmem:[#allocation8 + $0x1758] sm:$0xff] }
 0x280   :  { %3658 = vmatprep.subr.bf16.mxu1 %v3657_v7  ;;  %v3299_v7 = vpack.c.bf16 %v1648_v2, %v1644_v57  ;;  %v3677_v40 = vpack.c.bf16 %v1650_v5, %v1646_v4 }
 0x282   :  { %3282 = vmatpush1.bf16.msra.mxu0 %v3281_v11  ;;  %v3302_v11 = vpack.c.bf16 %v1647_v9, %v1643_v26 }
 0x283   :  { %3660 = vmatpush1.bf16.msra.mxu1 %v3659_v15  ;;  %3284 = vmatprep.subr.bf16.mxu0 %v3283_v17  ;;  %v3680_v15 = vpack.c.bf16 %v1649_v49, %v1645_v10  ;;  %v1651_v17 = vld [vmem:[#allocation10] sm:$0xf] }
 0x284   :  { %3662 = vmatprep.subr.bf16.mxu1 %v3661_v21  ;;  %v1656_v18 = vrot.slane %v1651_v17, %v4072_v14  ;;  %v1664_v34 = vrot.slane %v1651_v17, %v4105_v50  ;;  %v1660_v19 = vrot.slane %v1651_v17, %v4067_v3  ;;  %v1668_v20 = vrot.slane %v1651_v17, %v4079_v60 }
 0x286   :  { %3286 = vmatpush1.bf16.msra.mxu0 %v3285_v27 }
 0x287   :  { %3664 = vmatpush1.bf16.msra.mxu1 %v3663_v1  ;;  %3288 = vmatprep.subr.bf16.mxu0 %v3287_v16 }
 0x288   :  { %3666 = vmatprep.subr.bf16.mxu1 %v3665_v35 }
 0x28a   :  { %3290 = vmatpush1.bf16.msra.mxu0 %v3289_v43 }
 0x28b   :  { %3668 = vmatpush1.bf16.msra.mxu1 %v3667_v25  ;;  %3292 = vmatprep.subr.bf16.mxu0 %v3291_v47 }
 0x28c   :  { %3670 = vmatprep.subr.bf16.mxu1 %v3669_v52 }
 0x28e   :  { %3294 = vmatpush1.bf16.msra.mxu0 %v3293_v63 }
 0x28f   :  { %3672 = vmatpush1.bf16.msra.mxu1 %v3671_v61  ;;  %3296 = vmatprep.subr.bf16.mxu0 %v3295_v45 }
 0x290   :  { %3674 = vmatprep.subr.bf16.mxu1 %v3673_v59 }
 0x292   :  { %3298 = vmatpush1.bf16.msra.mxu0 %v3297_v6 }
 0x293   :  { %3676 = vmatpush1.bf16.msra.mxu1 %v3675_v56  ;;  %3301 = vmatprep.subr.msk.bf16.mxu0 %vm3998_vm3, %v3299_v7 }
 0x294   :  { %3679 = vmatprep.subr.msk.bf16.mxu1 %vm3998_vm3, %v3677_v40 }
 0x296   :  { %3304 = vmatpush1.bf16.msk.msra.mxu0 %vm3998_vm3, %v3302_v11 }
 0x297   :  { %3682 = vmatpush1.bf16.msk.msra.mxu1 %vm3998_vm3, %v3680_v15 }
 0x299   :  { %2142 = vmatmul.mubr.f32.vlgmr.msra.gmra.mrb[12].mxu0 %v4137_v32 }
 0x29a   :  { %2604 = vmatmul.mubr.f32.vlgmr.msra.gmra.mrb[12].mxu1 %v4137_v32  ;;  %2670 = vmatprep.mubr.msk.f32.mxu0 %vm1673_vm4, %v4143_v62 }
 0x29b   :  { %2674 = vmatprep.mubr.msk.f32.mxu1 %vm1673_vm4, %v4143_v62 }
 0x29d   :  { %2148 = vmatmul.mubr.f32.gmra.mrb[14].mxu0 %v4141_v13 }
 0x29e   :  { %2610 = vmatmul.mubr.f32.gmra.mrb[14].mxu1 %v4141_v13 }
 0x36c   :  { %v2143_v32 = vpop.f32.mrb[12].mxu0 }
 0x36d   :  { %v3683_v21 = vadd.f32 %v2143_v32, %v1656_v18  ;;  %v2605_v22 = vpop.f32.mrb[12].mxu1  ;;  %v2145_v12 = vpop.f32.mrb[13].mxu0 }
 0x36e   :  { %v3687_v23 = vadd.f32 %v2605_v22, %v1664_v34  ;;  %v3684_v48 = vadd.f32 %v2145_v12, %v1660_v19  ;;  %v2607_v62 = vpop.f32.mrb[13].mxu1 }
 0x36f   :  { %2616 = vst [vmem:[#allocation11] sm:$0xff] %v3683_v21  ;;  %v3688_v24 = vadd.f32 %v2607_v62, %v1668_v20 }
 0x370   :  { %2618 = vst [vmem:[#allocation11 + $0x10] sm:$0xff] %v3687_v23  ;;  %2617 = vst [vmem:[#allocation11 + $0x8] sm:$0xff] %v3684_v48  ;;  %v2149_v13 = vpop.f32.mrb[14].mxu0 }
 0x371   :  { %2619 = vst [vmem:[#allocation11 + $0x18] sm:$0xff] %v3688_v24  ;;  %v3685_v14 = vadd.f32 %v2149_v13, %v1656_v18  ;;  %v2611_v50 = vpop.f32.mrb[14].mxu1  ;;  %v2151_v3 = vpop.f32.mrb[15].mxu0 }
 0x372   :  { %v3689_v27 = vadd.f32 %v2611_v50, %v1664_v34  ;;  %v3686_v60 = vadd.f32 %v2151_v3, %v1660_v19  ;;  %v2613_v1 = vpop.f32.mrb[15].mxu1 }
 0x373   :  { %2620 = vst [vmem:[#allocation11 + $0x20] sm:$0xff] %v3685_v14  ;;  %v3690_v16 = vadd.f32 %v2613_v1, %v1668_v20 }
 0x374   :  { %2622 = vst [vmem:[#allocation11 + $0x30] sm:$0xff] %v3689_v27  ;;  %2621 = vst [vmem:[#allocation11 + $0x28] sm:$0xff] %v3686_v60 }
 0x375   :  { %2623 = vst [vmem:[#allocation11 + $0x38] sm:$0xff] %v3690_v16 }
 0x376   :  { %3867 = shalt.err (!%p3864_p2)
}
 0x377   :  { %s3868_s9 = scalar_lea.hbm %s4220_s5, 1024 }
 0x378   :  { %p3869_p3 = scmp.ne.s32.totalorder %s4220_s5, %s3868_s9  ;;  %p3872_p4 = scmp.lt.u32.totalorder %s3868_s9, %s4220_s5 }
 0x37a   :  { %p3874_p5 = pnand %p3872_p4, %p3869_p3 }
 0x37c   :  { %3877 = shalt.err (!%p3874_p5)
}
 0x37d   :  { %2635 = dma.vmem_to_hbm [thread:$0]  %s2630_s30, 1024, %s4220_s5, [#allocation4], %s3890_s1, %s3890_s1, %s3891_s17  }
 0x37e   :  { %3884 = dma.done.wait [#allocation4], 1024  }
 0x37f   :  { %3885 = vsyncadd [#allocation4], 4294966272 }
 0x380   :  { %2639 = vsyncpa [#allocation3], 1 }
 0x381   :  { %2640 = vsyncpa [#allocation6], 1 }
 0x382   :  { %2641 = vsyncpa [#allocation9], 1 }
 0x383   :  { %2642 = vsyncpa [#allocation4], 1 }

</bundles_post_ra>
